<compile_context>
chip_gen: v6e
topology: v6e:2x2x1
jax: 0.10.0
libtpu: 0.0.40
codegen_flags: <defaults>
</compile_context>

<pallas_src>
import functools

import jax
import jax.numpy as jnp
import numpy as np
from jax import lax
from jax.experimental import pallas as pl
from jax.experimental.pallas import tpu as pltpu

LAYERS = 2  # kernel is specialized for opt.layers == 2


def _decoder_kernel(g0pre_ref, ctx_ref, h0_ref, c0_ref, feed0_ref,
                    w0f_ref, w0h_ref, w1x_ref, w1h_ref, b1_ref,
                    win_ref, woc_ref, woh_ref,
                    out_ref, attn_ref, hf_ref, cf_ref,
                    h_sc, c_sc, feed_sc,
                    *, seq_len, src_len, mm_dtype, approx_recip):
    """One grid step == one chunk of `time_chunk` decoder timesteps."""
    chunk = pl.program_id(0)
    tc = out_ref.shape[0]          # timesteps per chunk (static)
    rnn = feed_sc.shape[-1]
    s_pad = ctx_ref.shape[1]       # lane-padded source length

    @pl.when(chunk == 0)
    def _init():
        h_sc[...] = h0_ref[...]
        c_sc[...] = c0_ref[...]
        feed_sc[...] = feed0_ref[...]

    def mm(a, w_ref):
        # cast activations to the MXU dtype at the matmul boundary only,
        # accumulate in f32.
        return jnp.dot(a.astype(mm_dtype), w_ref[...],
                       preferred_element_type=jnp.float32)

    def lstm_cell(gates, c_prev):
        if rnn % 128 == 0:
            # lane-aligned slices: sigmoid over 3R, tanh over R (half the EUP
            # work of the masked trick).
            i = jax.nn.sigmoid(gates[:, 0 * rnn:1 * rnn])
            f = jax.nn.sigmoid(gates[:, 1 * rnn:2 * rnn])
            g = jnp.tanh(gates[:, 2 * rnn:3 * rnn])
            o = jax.nn.sigmoid(gates[:, 3 * rnn:4 * rnn])
        else:
            # sub-128 gate widths: one lane-masked pass over the full (B, 4R)
            # vector avoids four sub-vreg slice relayouts.
            lane = lax.broadcasted_iota(jnp.int32, gates.shape, 1)
            g_lane = (lane >= 2 * rnn) & (lane < 3 * rnn)
            act = jnp.where(g_lane, jnp.tanh(gates), jax.nn.sigmoid(gates))
            i = act[:, 0 * rnn:1 * rnn]
            f = act[:, 1 * rnn:2 * rnn]
            g = act[:, 2 * rnn:3 * rnn]
            o = act[:, 3 * rnn:4 * rnn]
        c_new = f * c_prev + i * g
        h_new = o * jnp.tanh(c_new)
        return h_new, c_new

    def step(s, carry):
        t = chunk * tc + s
        valid = t < seq_len        # mask for padded tail timesteps

        feed = feed_sc[...]        # (B, R) input feed
        h0p, c0p = h_sc[0], c_sc[0]
        h1p, c1p = h_sc[1], c_sc[1]

        # --- StackedLSTM layer 0: emb part precomputed outside the loop ---
        gates0 = g0pre_ref[s] + mm(feed, w0f_ref) + mm(h0p, w0h_ref)
        h0n, c0n = lstm_cell(gates0, c0p)

        # --- StackedLSTM layer 1 (inter-layer dropout p=0 -> identity) ---
        gates1 = b1_ref[...] + mm(h0n, w1x_ref) + mm(h1p, w1h_ref)
        h1n, c1n = lstm_cell(gates1, c1p)
        rnn_out = h1n              # (B, R)

        # --- GlobalAttention, attn_type='general' -----------------------
        target = mm(rnn_out, win_ref)                    # (B, R) f32

        ctx = ctx_ref[...]         # re-read per step (bounds live ranges)
        # q=1 contractions: VPU broadcast-multiply + XLU reduce (MXU stays
        # free for the LSTM/linear matmuls).
        align = jnp.sum(target[:, None, :] * ctx, axis=-1)     # (B, S_pad)
        if s_pad != src_len:
            lane = lax.broadcasted_iota(jnp.int32, align.shape, 1)
            align = jnp.where(lane < src_len, align, jnp.float32(-1e30))
        align = align - jnp.max(align, axis=-1, keepdims=True)
        p = jnp.exp(align)
        denom = jnp.sum(p, axis=-1, keepdims=True)
        align_v = p * pl.reciprocal(denom, approx=approx_recip)  # softmax
        c_vec = jnp.sum(align_v[:, :, None] * ctx, axis=1)       # (B, R)

        # linear_out([c ; rnn_out]) then tanh (no bias for 'general'),
        # as two split dots into one f32 accumulator (no concat).
        attn_h = jnp.tanh(mm(c_vec, woc_ref) + mm(rnn_out, woh_ref))

        # stream outputs (padded rows are sliced off by the wrapper)
        out_ref[s] = attn_h
        attn_ref[s] = align_v

        # masked recurrent-state update: padded tail steps are no-ops.
        h_sc[0] = jnp.where(valid, h0n, h0p)
        c_sc[0] = jnp.where(valid, c0n, c0p)
        h_sc[1] = jnp.where(valid, h1n, h1p)
        c_sc[1] = jnp.where(valid, c1n, c1p)
        feed_sc[...] = jnp.where(valid, attn_h, feed)
        return carry

    lax.fori_loop(0, tc, step, 0, unroll=True)

    @pl.when(chunk == pl.num_programs(0) - 1)
    def _finalize():
        hf_ref[...] = h_sc[...]
        cf_ref[...] = c_sc[...]


def decoder_forward(inp_tokens, context, params, h0, c0, input_feed0, *,
                    time_chunk=16, matmul_dtype=jnp.bfloat16,
                    approx_recip=True):
    """Mirrors Decoder.forward.

    inp_tokens:  (t_len, batch) int32 target tokens
    context:     (src_len, batch, rnn) encoder memory bank
    params:      raw PyTorch-shaped parameters (see __main__)
    h0, c0:      (layers, batch, rnn) initial decoder hidden state
    input_feed0: (batch, rnn) initial input feed (zeros from init_input_feed)
    """
    t_len, batch = inp_tokens.shape
    s_len, _, rnn = context.shape
    e_dim = params['emb'].shape[1]
    four_r = 4 * rnn
    mm_dtype = jnp.dtype(matmul_dtype)

    # ---- plain-JAX glue: embedding lookup + hoisted layer-0 emb GEMM ----
    emb = params['emb'][inp_tokens].astype(jnp.float32)     # (t_len, B, E)
    w_ih0 = params['W_ih0']                                  # (4R, E+R)
    w0_emb = w_ih0[:, :e_dim].T                              # (E, 4R)
    w0_feed = w_ih0[:, e_dim:].T.astype(mm_dtype)            # (R, 4R)
    w0_hh = params['W_hh0'].T.astype(mm_dtype)               # (R, 4R)
    b0 = (params['b_ih0'] + params['b_hh0']).astype(jnp.float32)
    # emb does not depend on the recurrence: one big (t*B, E) x (E, 4R) GEMM.
    g0_pre = jnp.einsum('tbe,ef->tbf',
                        emb.astype(mm_dtype), w0_emb.astype(mm_dtype),
                        preferred_element_type=jnp.float32) + b0
    g0_pre = g0_pre.astype(jnp.float32)                      # (t_len, B, 4R)

    w1x = params['W_ih1'].T.astype(mm_dtype)                 # (R, 4R)
    w1h = params['W_hh1'].T.astype(mm_dtype)                 # (R, 4R)
    b1 = (params['b_ih1'] + params['b_hh1'])[None, :].astype(jnp.float32)
    win = params['W_in'].T.astype(mm_dtype)                  # (R, R)
    wout = params['W_out'].T                                 # (2R, R)
    woc = wout[:rnn].astype(mm_dtype)                        # context half
    woh = wout[rnn:].astype(mm_dtype)                        # rnn_out half

    # context (S, B, R) -> (B, S, R); pad S to a multiple of 128 so the
    # attention vector / its store is lane-dense (padded scores are masked).
    ctx_bt = jnp.transpose(context, (1, 0, 2)).astype(jnp.float32)
    s_pad = int(pl.cdiv(s_len, 128)) * 128
    if s_pad != s_len:
        ctx_bt = jnp.pad(ctx_bt, ((0, 0), (0, s_pad - s_len), (0, 0)))

    # ---- chunk the time axis ----
    tc = int(time_chunk)
    n_chunks = int(pl.cdiv(t_len, tc))
    t_pad = n_chunks * tc
    if t_pad != t_len:
        g0_pre = jnp.pad(g0_pre, ((0, t_pad - t_len), (0, 0), (0, 0)))

    h0 = h0.astype(jnp.float32)
    c0 = c0.astype(jnp.float32)
    input_feed0 = input_feed0.astype(jnp.float32)

    # constant-index blocks: single-buffered (no useless double buffering).
    def _const(shape):
        return pl.BlockSpec(shape, lambda i, _n=len(shape): (0,) * _n,
                            pipeline_mode=pl.Buffered(1))

    in_specs = [
        pl.BlockSpec((tc, batch, four_r), lambda i: (i, 0, 0)),   # g0_pre chunk
        _const((batch, s_pad, rnn)),                              # context
        _const((LAYERS, batch, rnn)),                             # h0
        _const((LAYERS, batch, rnn)),                             # c0
        _const((batch, rnn)),                                     # input_feed0
        _const((rnn, four_r)),                                    # W0 feed part
        _const((rnn, four_r)),                                    # W0 hidden part
        _const((rnn, four_r)),                                    # W1 input part
        _const((rnn, four_r)),                                    # W1 hidden part
        _const((1, four_r)),                                      # b1
        _const((rnn, rnn)),                                       # linear_in^T
        _const((rnn, rnn)),                                       # linear_out^T (ctx half)
        _const((rnn, rnn)),                                       # linear_out^T (rnn half)
    ]
    out_specs = [
        pl.BlockSpec((tc, batch, rnn), lambda i: (i, 0, 0)),      # outputs chunk
        pl.BlockSpec((tc, batch, s_pad), lambda i: (i, 0, 0)),    # attns['std'] chunk
        pl.BlockSpec((LAYERS, batch, rnn), lambda i: (0, 0, 0)),  # final h
        pl.BlockSpec((LAYERS, batch, rnn), lambda i: (0, 0, 0)),  # final c
    ]
    out_shape = (
        jax.ShapeDtypeStruct((t_pad, batch, rnn), jnp.float32),
        jax.ShapeDtypeStruct((t_pad, batch, s_pad), jnp.float32),
        jax.ShapeDtypeStruct((LAYERS, batch, rnn), jnp.float32),
        jax.ShapeDtypeStruct((LAYERS, batch, rnn), jnp.float32),
    )

    # explicit VMEM budget: single-buffered constants + double-buffered
    # streamed chunks + scratch, with headroom.
    def _nbytes(shape, dt):
        return int(np.prod(shape)) * jnp.dtype(dt).itemsize
    vmem_need = (
        2 * _nbytes((tc, batch, four_r), jnp.float32)
        + _nbytes((batch, s_pad, rnn), jnp.float32)
        + 2 * _nbytes((LAYERS, batch, rnn), jnp.float32)
        + _nbytes((batch, rnn), jnp.float32)
        + 4 * _nbytes((rnn, four_r), mm_dtype)
        + _nbytes((1, four_r), jnp.float32)
        + 3 * _nbytes((rnn, rnn), mm_dtype)
        + 2 * (_nbytes((tc, batch, rnn), jnp.float32)
               + _nbytes((tc, batch, s_pad), jnp.float32))
        + 4 * _nbytes((LAYERS, batch, rnn), jnp.float32)
        + (2 * LAYERS * batch * rnn + batch * rnn) * 4
    )
    vmem_limit = int(min(max(2 * vmem_need + (2 << 20), 8 << 20), 48 << 20))

    grid_spec = pltpu.PrefetchScalarGridSpec(
        num_scalar_prefetch=0,
        grid=(n_chunks,),
        in_specs=in_specs,
        out_specs=out_specs,
        scratch_shapes=[pltpu.VMEM((LAYERS, batch, rnn), jnp.float32),  # h carry
                        pltpu.VMEM((LAYERS, batch, rnn), jnp.float32),  # c carry
                        pltpu.VMEM((batch, rnn), jnp.float32)])         # input feed

    outputs_p, attns_p, hf, cf = pl.pallas_call(
        functools.partial(_decoder_kernel, seq_len=t_len, src_len=s_len,
                          mm_dtype=mm_dtype, approx_recip=approx_recip),
        out_shape=out_shape,
        grid_spec=grid_spec,
        compiler_params=pltpu.CompilerParams(
            dimension_semantics=("arbitrary",),   # recurrence over time chunks
            vmem_limit_bytes=vmem_limit),
    )(g0_pre, ctx_bt, h0, c0, input_feed0,
      w0_feed, w0_hh, w1x, w1h, b1, win, woc, woh)

    outputs = outputs_p[:t_len]
    attns_std = attns_p[:t_len, :, :s_len]
    state = {'hidden': (hf, cf),
             'input_feed': outputs[-1][None],   # output.unsqueeze(0)
             'coverage': None}                  # coverage_attn=False
    return outputs, state, {'std': attns_std}


# ----------------------------- pure-JAX reference -----------------------------
def reference_forward(tokens, context, raw, h0, c0, feed0):
    emb = raw['emb'][tokens]
    ctx = jnp.transpose(context, (1, 0, 2))
    t_len = tokens.shape[0]
    h = [h0[0], h0[1]]
    c = [c0[0], c0[1]]
    feed = feed0
    outs, attns = [], []

    def cell(x, hp, cp, Wih, Whh, bih, bhh):
        g = x @ Wih.T + bih + hp @ Whh.T + bhh
        i, f, gg, o = jnp.split(g, 4, axis=1)
        cn = jax.nn.sigmoid(f) * cp + jax.nn.sigmoid(i) * jnp.tanh(gg)
        hn = jax.nn.sigmoid(o) * jnp.tanh(cn)
        return hn, cn

    for t in range(t_len):
        x = jnp.concatenate([emb[t], feed], axis=1)
        h[0], c[0] = cell(x, h[0], c[0], raw['W_ih0'], raw['W_hh0'], raw['b_ih0'], raw['b_hh0'])
        h[1], c[1] = cell(h[0], h[1], c[1], raw['W_ih1'], raw['W_hh1'], raw['b_ih1'], raw['b_hh1'])
        rnn_out = h[1]
        target = rnn_out @ raw['W_in'].T
        align = jnp.einsum('bd,bsd->bs', target, ctx)
        av = jax.nn.softmax(align, axis=-1)
        cv = jnp.einsum('bs,bsd->bd', av, ctx)
        attn_h = jnp.tanh(jnp.concatenate([cv, rnn_out], axis=1) @ raw['W_out'].T)
        feed = attn_h
        outs.append(attn_h)
        attns.append(av)
    return jnp.stack(outs), jnp.stack(attns), jnp.stack(h), jnp.stack(c)


if __name__ == "__main__":
    # small shapes consistent with the module
    T_LEN, BATCH, SRC_LEN = 6, 2, 8
    VOCAB, EMB, RNN = 20, 32, 32

    key = jax.random.PRNGKey(0)
    ks = jax.random.split(key, 16)

    def rnd(k, shape):
        return (0.1 * jax.random.normal(k, shape)).astype(jnp.float32)

    # raw PyTorch-shaped parameters (deterministic, synthetic)
    emb_table = rnd(ks[0], (VOCAB, EMB)).at[0].set(0.0)     # padding_idx = PAD = 0
    params = dict(
        emb=emb_table,
        W_ih0=rnd(ks[1], (4 * RNN, EMB + RNN)), W_hh0=rnd(ks[2], (4 * RNN, RNN)),
        b_ih0=rnd(ks[3], (4 * RNN,)), b_hh0=rnd(ks[4], (4 * RNN,)),
        W_ih1=rnd(ks[5], (4 * RNN, RNN)), W_hh1=rnd(ks[6], (4 * RNN, RNN)),
        b_ih1=rnd(ks[7], (4 * RNN,)), b_hh1=rnd(ks[8], (4 * RNN,)),
        W_in=rnd(ks[9], (RNN, RNN)),                        # GlobalAttention linear_in
        W_out=rnd(ks[10], (RNN, 2 * RNN)),                  # GlobalAttention linear_out (no bias)
    )

    # inputs: target tokens (len x batch), encoder context, initial decoder state
    tokens = jax.random.randint(ks[11], (T_LEN, BATCH), 1, VOCAB).astype(jnp.int32)
    context = rnd(ks[12], (SRC_LEN, BATCH, RNN))
    h0 = rnd(ks[13], (LAYERS, BATCH, RNN))
    c0 = rnd(ks[14], (LAYERS, BATCH, RNN))
    feed0 = jnp.zeros((BATCH, RNN), jnp.float32)            # init_input_feed -> zeros

    ref_out, ref_attn, ref_h, ref_c = reference_forward(tokens, context, params, h0, c0, feed0)

    # --- exact-path validation (f32 matmuls, exact reciprocal), time_chunk=4
    #     exercises both the cross-chunk state carry and masked tail steps. ---
    outputs, state, attns = decoder_forward(
        tokens, context, params, h0, c0, feed0,
        time_chunk=4, matmul_dtype=jnp.float32, approx_recip=False)
    jax.block_until_ready(outputs)
    np.testing.assert_allclose(np.asarray(outputs), np.asarray(ref_out), rtol=1e-3, atol=1e-3)
    np.testing.assert_allclose(np.asarray(attns['std']), np.asarray(ref_attn), rtol=1e-3, atol=1e-3)
    np.testing.assert_allclose(np.asarray(state['hidden'][0]), np.asarray(ref_h), rtol=1e-3, atol=1e-3)
    np.testing.assert_allclose(np.asarray(state['hidden'][1]), np.asarray(ref_c), rtol=1e-3, atol=1e-3)

    # --- fast path: bf16 MXU operands + approx reciprocal (default config) ---
    outputs_b, state_b, attns_b = decoder_forward(
        tokens, context, params, h0, c0, feed0,
        time_chunk=4, matmul_dtype=jnp.bfloat16, approx_recip=True)
    jax.block_until_ready(outputs_b)
    jax.block_until_ready(attns_b['std'])
    jax.block_until_ready(state_b['hidden'])
    np.testing.assert_allclose(np.asarray(outputs_b), np.asarray(ref_out), rtol=2e-2, atol=2e-2)
    np.testing.assert_allclose(np.asarray(attns_b['std']), np.asarray(ref_attn), rtol=2e-2, atol=2e-2)
    np.testing.assert_allclose(np.asarray(state_b['hidden'][0]), np.asarray(ref_h), rtol=2e-2, atol=2e-2)
    np.testing.assert_allclose(np.asarray(state_b['hidden'][1]), np.asarray(ref_c), rtol=2e-2, atol=2e-2)

    print("KERNEL_OK")
</pallas_src>

<mosaic_0001>
module attributes {stable_mosaic.version = 11 : i64} {
  func.func @_decoder_kernel(%arg0: i32, %arg1: memref<4x2x128xf32, #tpu.memory_space<vmem>>, %arg2: memref<2x128x32xf32, #tpu.memory_space<vmem>>, %arg3: memref<2x2x32xf32, #tpu.memory_space<vmem>>, %arg4: memref<2x2x32xf32, #tpu.memory_space<vmem>>, %arg5: memref<2x32xf32, #tpu.memory_space<vmem>>, %arg6: memref<32x128xf32, #tpu.memory_space<vmem>>, %arg7: memref<32x128xf32, #tpu.memory_space<vmem>>, %arg8: memref<32x128xf32, #tpu.memory_space<vmem>>, %arg9: memref<32x128xf32, #tpu.memory_space<vmem>>, %arg10: memref<1x128xf32, #tpu.memory_space<vmem>>, %arg11: memref<32x32xf32, #tpu.memory_space<vmem>>, %arg12: memref<32x32xf32, #tpu.memory_space<vmem>>, %arg13: memref<32x32xf32, #tpu.memory_space<vmem>>, %arg14: memref<4x2x32xf32, #tpu.memory_space<vmem>>, %arg15: memref<4x2x128xf32, #tpu.memory_space<vmem>>, %arg16: memref<2x2x32xf32, #tpu.memory_space<vmem>>, %arg17: memref<2x2x32xf32, #tpu.memory_space<vmem>>, %arg18: memref<2x2x32xf32, #tpu.memory_space<vmem>>, %arg19: memref<2x2x32xf32, #tpu.memory_space<vmem>>, %arg20: memref<2x32xf32, #tpu.memory_space<vmem>>) attributes {dimension_semantics = [#tpu.dimension_semantics<arbitrary>], iteration_bounds = array<i64: 2>, scalar_prefetch = 0 : i64, scratch_operands = 3 : i64, tpu.core_type = #tpu.core_type<tc>, window_params = [{transform_indices = @transform_0, window_bounds = array<i64: 4, 2, 128>}, {pipeline_mode = #tpu.pipeline_mode<synchronous>, transform_indices = @transform_1, window_bounds = array<i64: 2, 128, 32>}, {pipeline_mode = #tpu.pipeline_mode<synchronous>, transform_indices = @transform_2, window_bounds = array<i64: 2, 2, 32>}, {pipeline_mode = #tpu.pipeline_mode<synchronous>, transform_indices = @transform_3, window_bounds = array<i64: 2, 2, 32>}, {pipeline_mode = #tpu.pipeline_mode<synchronous>, transform_indices = @transform_4, window_bounds = array<i64: 2, 32>}, {pipeline_mode = #tpu.pipeline_mode<synchronous>, transform_indices = @transform_5, window_bounds = array<i64: 32, 128>}, {pipeline_mode = #tpu.pipeline_mode<synchronous>, transform_indices = @transform_6, window_bounds = array<i64: 32, 128>}, {pipeline_mode = #tpu.pipeline_mode<synchronous>, transform_indices = @transform_7, window_bounds = array<i64: 32, 128>}, {pipeline_mode = #tpu.pipeline_mode<synchronous>, transform_indices = @transform_8, window_bounds = array<i64: 32, 128>}, {pipeline_mode = #tpu.pipeline_mode<synchronous>, transform_indices = @transform_9, window_bounds = array<i64: 1, 128>}, {pipeline_mode = #tpu.pipeline_mode<synchronous>, transform_indices = @transform_10, window_bounds = array<i64: 32, 32>}, {pipeline_mode = #tpu.pipeline_mode<synchronous>, transform_indices = @transform_11, window_bounds = array<i64: 32, 32>}, {pipeline_mode = #tpu.pipeline_mode<synchronous>, transform_indices = @transform_12, window_bounds = array<i64: 32, 32>}, {transform_indices = @transform_13, window_bounds = array<i64: 4, 2, 32>}, {transform_indices = @transform_14, window_bounds = array<i64: 4, 2, 128>}, {pipeline_mode = #tpu.pipeline_mode<synchronous>, transform_indices = @transform_15, window_bounds = array<i64: 2, 2, 32>}, {pipeline_mode = #tpu.pipeline_mode<synchronous>, transform_indices = @transform_16, window_bounds = array<i64: 2, 2, 32>}]} {
    %c0_i32 = arith.constant 0 : i32
    %0 = arith.cmpi eq, %arg0, %c0_i32 : i32
    %1 = arith.extui %0 : i1 to i32
    %c0_i32_0 = arith.constant 0 : i32
    %2 = arith.cmpi ne, %1, %c0_i32_0 : i32
    scf.if %2 {
      %c0_293 = arith.constant 0 : index
      %c0_294 = arith.constant 0 : index
      %c0_295 = arith.constant 0 : index
      %530 = vector.load %arg3[%c0_293, %c0_294, %c0_295] : memref<2x2x32xf32, #tpu.memory_space<vmem>>, vector<2x2x32xf32>
      %c0_296 = arith.constant 0 : index
      %c0_297 = arith.constant 0 : index
      %c0_298 = arith.constant 0 : index
      %531 = vector.load %arg18[%c0_296, %c0_297, %c0_298] : memref<2x2x32xf32, #tpu.memory_space<vmem>>, vector<2x2x32xf32>
      tpu.vector_store %arg18[%c0_296, %c0_297, %c0_298], %530 {strides = array<i32>} : memref<2x2x32xf32, #tpu.memory_space<vmem>>, vector<2x2x32xf32>,
      %c0_299 = arith.constant 0 : index
      %c0_300 = arith.constant 0 : index
      %c0_301 = arith.constant 0 : index
      %532 = vector.load %arg4[%c0_299, %c0_300, %c0_301] : memref<2x2x32xf32, #tpu.memory_space<vmem>>, vector<2x2x32xf32>
      %c0_302 = arith.constant 0 : index
      %c0_303 = arith.constant 0 : index
      %c0_304 = arith.constant 0 : index
      %533 = vector.load %arg19[%c0_302, %c0_303, %c0_304] : memref<2x2x32xf32, #tpu.memory_space<vmem>>, vector<2x2x32xf32>
      tpu.vector_store %arg19[%c0_302, %c0_303, %c0_304], %532 {strides = array<i32>} : memref<2x2x32xf32, #tpu.memory_space<vmem>>, vector<2x2x32xf32>,
      %c0_305 = arith.constant 0 : index
      %c0_306 = arith.constant 0 : index
      %534 = vector.load %arg5[%c0_305, %c0_306] : memref<2x32xf32, #tpu.memory_space<vmem>>, vector<2x32xf32>
      %c0_307 = arith.constant 0 : index
      %c0_308 = arith.constant 0 : index
      %535 = vector.load %arg20[%c0_307, %c0_308] : memref<2x32xf32, #tpu.memory_space<vmem>>, vector<2x32xf32>
      tpu.vector_store %arg20[%c0_307, %c0_308], %534 {strides = array<i32>} : memref<2x32xf32, #tpu.memory_space<vmem>>, vector<2x32xf32>,
    } else {
    }
    %c0_i32_1 = arith.constant 0 : i32
    %c4_i32 = arith.constant 4 : i32
    %3 = arith.muli %arg0, %c4_i32 : i32
    %4 = arith.addi %3, %c0_i32_1 : i32
    %c6_i32 = arith.constant 6 : i32
    %5 = arith.cmpi slt, %4, %c6_i32 : i32
    %c0 = arith.constant 0 : index
    %c0_2 = arith.constant 0 : index
    %6 = vector.load %arg20[%c0, %c0_2] : memref<2x32xf32, #tpu.memory_space<vmem>>, vector<2x32xf32>
    %c0_3 = arith.constant 0 : index
    %c0_4 = arith.constant 0 : index
    %c0_5 = arith.constant 0 : index
    %7 = vector.load %arg18[%c0_3, %c0_4, %c0_5] : memref<2x2x32xf32, #tpu.memory_space<vmem>>, vector<1x2x32xf32>
    %8 = vector.shape_cast %7 : vector<1x2x32xf32> to vector<2x32xf32>
    %c0_6 = arith.constant 0 : index
    %c0_7 = arith.constant 0 : index
    %c0_8 = arith.constant 0 : index
    %9 = vector.load %arg19[%c0_6, %c0_7, %c0_8] : memref<2x2x32xf32, #tpu.memory_space<vmem>>, vector<1x2x32xf32>
    %10 = vector.shape_cast %9 : vector<1x2x32xf32> to vector<2x32xf32>
    %c1 = arith.constant 1 : index
    %c0_9 = arith.constant 0 : index
    %c0_10 = arith.constant 0 : index
    %11 = vector.load %arg18[%c1, %c0_9, %c0_10] : memref<2x2x32xf32, #tpu.memory_space<vmem>>, vector<1x2x32xf32>
    %12 = vector.shape_cast %11 : vector<1x2x32xf32> to vector<2x32xf32>
    %c1_11 = arith.constant 1 : index
    %c0_12 = arith.constant 0 : index
    %c0_13 = arith.constant 0 : index
    %13 = vector.load %arg19[%c1_11, %c0_12, %c0_13] : memref<2x2x32xf32, #tpu.memory_space<vmem>>, vector<1x2x32xf32>
    %14 = vector.shape_cast %13 : vector<1x2x32xf32> to vector<2x32xf32>
    %15 = arith.index_cast %c0_i32_1 : i32 to index
    %c0_14 = arith.constant 0 : index
    %c0_15 = arith.constant 0 : index
    %16 = vector.load %arg1[%15, %c0_14, %c0_15] : memref<4x2x128xf32, #tpu.memory_space<vmem>>, vector<1x2x128xf32>
    %17 = vector.shape_cast %16 : vector<1x2x128xf32> to vector<2x128xf32>
    %c0_16 = arith.constant 0 : index
    %c0_17 = arith.constant 0 : index
    %18 = vector.load %arg6[%c0_16, %c0_17] : memref<32x128xf32, #tpu.memory_space<vmem>>, vector<32x128xf32>
    %cst = arith.constant dense<0.000000e+00> : vector<2x128xf32>
    %19 = tpu.matmul %6, %18, %cst {dimension_numbers = #tpu.dot_dimension_numbers<[1], [0], [0], [1], [0, 0, 1, 1], [], []>} : vector<2x32xf32>, vector<32x128xf32>, vector<2x128xf32> -> vector<2x128xf32>
    %20 = arith.addf %17, %19 : vector<2x128xf32>
    %c0_18 = arith.constant 0 : index
    %c0_19 = arith.constant 0 : index
    %21 = vector.load %arg7[%c0_18, %c0_19] : memref<32x128xf32, #tpu.memory_space<vmem>>, vector<32x128xf32>
    %cst_20 = arith.constant dense<0.000000e+00> : vector<2x128xf32>
    %22 = tpu.matmul %8, %21, %cst_20 {dimension_numbers = #tpu.dot_dimension_numbers<[1], [0], [0], [1], [0, 0, 1, 1], [], []>} : vector<2x32xf32>, vector<32x128xf32>, vector<2x128xf32> -> vector<2x128xf32>
    %23 = arith.addf %20, %22 : vector<2x128xf32>
    %24 = tpu.iota {dimensions = array<i32: 1>} : vector<2x128xi32>
    %c64_i32 = arith.constant 64 : i32
    %25 = vector.broadcast %c64_i32 : i32 to vector<2x128xi32>
    %26 = arith.cmpi sge, %24, %25 : vector<2x128xi32>
    %c96_i32 = arith.constant 96 : i32
    %27 = vector.broadcast %c96_i32 : i32 to vector<2x128xi32>
    %28 = arith.cmpi slt, %24, %27 : vector<2x128xi32>
    %29 = arith.andi %26, %28 : vector<2x128xi1>
    %30 = math.tanh %23 : vector<2x128xf32>
    %31 = arith.negf %23 : vector<2x128xf32>
    %32 = math.exp %31 : vector<2x128xf32>
    %cst_21 = arith.constant 1.000000e+00 : f32
    %33 = vector.broadcast %cst_21 : f32 to vector<2x128xf32>
    %34 = arith.addf %33, %32 : vector<2x128xf32>
    %35 = arith.divf %33, %34 : vector<2x128xf32>
    %36 = arith.select %29, %30, %35 : vector<2x128xi1>, vector<2x128xf32>
    %37 = vector.extract_strided_slice %36 {offsets = [0, 0], sizes = [2, 32], strides = [1, 1]} : vector<2x128xf32> to vector<2x32xf32>
    %38 = vector.extract_strided_slice %36 {offsets = [0, 32], sizes = [2, 32], strides = [1, 1]} : vector<2x128xf32> to vector<2x32xf32>
    %39 = vector.extract_strided_slice %36 {offsets = [0, 64], sizes = [2, 32], strides = [1, 1]} : vector<2x128xf32> to vector<2x32xf32>
    %40 = vector.extract_strided_slice %36 {offsets = [0, 96], sizes = [2, 32], strides = [1, 1]} : vector<2x128xf32> to vector<2x32xf32>
    %41 = arith.mulf %38, %10 : vector<2x32xf32>
    %42 = arith.mulf %37, %39 : vector<2x32xf32>
    %43 = arith.addf %41, %42 : vector<2x32xf32>
    %44 = math.tanh %43 : vector<2x32xf32>
    %45 = arith.mulf %40, %44 : vector<2x32xf32>
    %c0_22 = arith.constant 0 : index
    %c0_23 = arith.constant 0 : index
    %46 = vector.load %arg10[%c0_22, %c0_23] : memref<1x128xf32, #tpu.memory_space<vmem>>, vector<1x128xf32>
    %c0_24 = arith.constant 0 : index
    %c0_25 = arith.constant 0 : index
    %47 = vector.load %arg8[%c0_24, %c0_25] : memref<32x128xf32, #tpu.memory_space<vmem>>, vector<32x128xf32>
    %cst_26 = arith.constant dense<0.000000e+00> : vector<2x128xf32>
    %48 = tpu.matmul %45, %47, %cst_26 {dimension_numbers = #tpu.dot_dimension_numbers<[1], [0], [0], [1], [0, 0, 1, 1], [], []>} : vector<2x32xf32>, vector<32x128xf32>, vector<2x128xf32> -> vector<2x128xf32>
    %49 = vector.broadcast %46 : vector<1x128xf32> to vector<2x128xf32>
    %50 = arith.addf %49, %48 : vector<2x128xf32>
    %c0_27 = arith.constant 0 : index
    %c0_28 = arith.constant 0 : index
    %51 = vector.load %arg9[%c0_27, %c0_28] : memref<32x128xf32, #tpu.memory_space<vmem>>, vector<32x128xf32>
    %cst_29 = arith.constant dense<0.000000e+00> : vector<2x128xf32>
    %52 = tpu.matmul %12, %51, %cst_29 {dimension_numbers = #tpu.dot_dimension_numbers<[1], [0], [0], [1], [0, 0, 1, 1], [], []>} : vector<2x32xf32>, vector<32x128xf32>, vector<2x128xf32> -> vector<2x128xf32>
    %53 = arith.addf %50, %52 : vector<2x128xf32>
    %54 = tpu.iota {dimensions = array<i32: 1>} : vector<2x128xi32>
    %c64_i32_30 = arith.constant 64 : i32
    %55 = vector.broadcast %c64_i32_30 : i32 to vector<2x128xi32>
    %56 = arith.cmpi sge, %54, %55 : vector<2x128xi32>
    %c96_i32_31 = arith.constant 96 : i32
    %57 = vector.broadcast %c96_i32_31 : i32 to vector<2x128xi32>
    %58 = arith.cmpi slt, %54, %57 : vector<2x128xi32>
    %59 = arith.andi %56, %58 : vector<2x128xi1>
    %60 = math.tanh %53 : vector<2x128xf32>
    %61 = arith.negf %53 : vector<2x128xf32>
    %62 = math.exp %61 : vector<2x128xf32>
    %cst_32 = arith.constant 1.000000e+00 : f32
    %63 = vector.broadcast %cst_32 : f32 to vector<2x128xf32>
    %64 = arith.addf %63, %62 : vector<2x128xf32>
    %65 = arith.divf %63, %64 : vector<2x128xf32>
    %66 = arith.select %59, %60, %65 : vector<2x128xi1>, vector<2x128xf32>
    %67 = vector.extract_strided_slice %66 {offsets = [0, 0], sizes = [2, 32], strides = [1, 1]} : vector<2x128xf32> to vector<2x32xf32>
    %68 = vector.extract_strided_slice %66 {offsets = [0, 32], sizes = [2, 32], strides = [1, 1]} : vector<2x128xf32> to vector<2x32xf32>
    %69 = vector.extract_strided_slice %66 {offsets = [0, 64], sizes = [2, 32], strides = [1, 1]} : vector<2x128xf32> to vector<2x32xf32>
    %70 = vector.extract_strided_slice %66 {offsets = [0, 96], sizes = [2, 32], strides = [1, 1]} : vector<2x128xf32> to vector<2x32xf32>
    %71 = arith.mulf %68, %14 : vector<2x32xf32>
    %72 = arith.mulf %67, %69 : vector<2x32xf32>
    %73 = arith.addf %71, %72 : vector<2x32xf32>
    %74 = math.tanh %73 : vector<2x32xf32>
    %75 = arith.mulf %70, %74 : vector<2x32xf32>
    %c0_33 = arith.constant 0 : index
    %c0_34 = arith.constant 0 : index
    %76 = vector.load %arg11[%c0_33, %c0_34] : memref<32x32xf32, #tpu.memory_space<vmem>>, vector<32x32xf32>
    %cst_35 = arith.constant dense<0.000000e+00> : vector<2x32xf32>
    %77 = tpu.matmul %75, %76, %cst_35 {dimension_numbers = #tpu.dot_dimension_numbers<[1], [0], [0], [1], [0, 0, 1, 1], [], []>} : vector<2x32xf32>, vector<32x32xf32>, vector<2x32xf32> -> vector<2x32xf32>
    %c0_36 = arith.constant 0 : index
    %c0_37 = arith.constant 0 : index
    %c0_38 = arith.constant 0 : index
    %78 = vector.load %arg2[%c0_36, %c0_37, %c0_38] : memref<2x128x32xf32, #tpu.memory_space<vmem>>, vector<2x128x32xf32>
    %79 = vector.shape_cast %77 : vector<2x32xf32> to vector<2x1x32xf32>
    %80 = vector.broadcast %79 : vector<2x1x32xf32> to vector<2x128x32xf32>
    %81 = arith.mulf %80, %78 : vector<2x128x32xf32>
    %cst_39 = arith.constant dense<0.000000e+00> : vector<2x128xf32>
    %82 = vector.multi_reduction <add>, %81, %cst_39 [2] : vector<2x128x32xf32> to vector<2x128xf32>
    %83 = tpu.iota {dimensions = array<i32: 1>} : vector<2x128xi32>
    %c8_i32 = arith.constant 8 : i32
    %84 = vector.broadcast %c8_i32 : i32 to vector<2x128xi32>
    %85 = arith.cmpi slt, %83, %84 : vector<2x128xi32>
    %cst_40 = arith.constant -1.000000e+30 : f32
    %86 = vector.broadcast %cst_40 : f32 to vector<2x128xf32>
    %87 = arith.select %85, %82, %86 : vector<2x128xi1>, vector<2x128xf32>
    %cst_41 = arith.constant dense<0xFF800000> : vector<2xf32>
    %88 = vector.multi_reduction <maximumf>, %87, %cst_41 [1] : vector<2x128xf32> to vector<2xf32>
    %89 = vector.shape_cast %88 : vector<2xf32> to vector<2x1xf32>
    %90 = vector.broadcast %89 : vector<2x1xf32> to vector<2x128xf32>
    %91 = arith.subf %87, %90 : vector<2x128xf32>
    %92 = math.exp %91 : vector<2x128xf32>
    %cst_42 = arith.constant dense<0.000000e+00> : vector<2xf32>
    %93 = vector.multi_reduction <add>, %92, %cst_42 [1] : vector<2x128xf32> to vector<2xf32>
    %94 = vector.shape_cast %93 : vector<2xf32> to vector<2x1xf32>
    %95 = tpu.reciprocal %94 : vector<2x1xf32> -> vector<2x1xf32>
    %96 = vector.broadcast %95 : vector<2x1xf32> to vector<2x128xf32>
    %97 = arith.mulf %92, %96 : vector<2x128xf32>
    %98 = vector.shape_cast %97 : vector<2x128xf32> to vector<2x128x1xf32>
    %99 = vector.broadcast %98 : vector<2x128x1xf32> to vector<2x128x32xf32>
    %100 = arith.mulf %99, %78 : vector<2x128x32xf32>
    %cst_43 = arith.constant dense<0.000000e+00> : vector<2x32xf32>
    %101 = vector.multi_reduction <add>, %100, %cst_43 [1] : vector<2x128x32xf32> to vector<2x32xf32>
    %c0_44 = arith.constant 0 : index
    %c0_45 = arith.constant 0 : index
    %102 = vector.load %arg12[%c0_44, %c0_45] : memref<32x32xf32, #tpu.memory_space<vmem>>, vector<32x32xf32>
    %cst_46 = arith.constant dense<0.000000e+00> : vector<2x32xf32>
    %103 = tpu.matmul %101, %102, %cst_46 {dimension_numbers = #tpu.dot_dimension_numbers<[1], [0], [0], [1], [0, 0, 1, 1], [], []>} : vector<2x32xf32>, vector<32x32xf32>, vector<2x32xf32> -> vector<2x32xf32>
    %c0_47 = arith.constant 0 : index
    %c0_48 = arith.constant 0 : index
    %104 = vector.load %arg13[%c0_47, %c0_48] : memref<32x32xf32, #tpu.memory_space<vmem>>, vector<32x32xf32>
    %cst_49 = arith.constant dense<0.000000e+00> : vector<2x32xf32>
    %105 = tpu.matmul %75, %104, %cst_49 {dimension_numbers = #tpu.dot_dimension_numbers<[1], [0], [0], [1], [0, 0, 1, 1], [], []>} : vector<2x32xf32>, vector<32x32xf32>, vector<2x32xf32> -> vector<2x32xf32>
    %106 = arith.addf %103, %105 : vector<2x32xf32>
    %107 = math.tanh %106 : vector<2x32xf32>
    %108 = arith.index_cast %c0_i32_1 : i32 to index
    %c0_50 = arith.constant 0 : index
    %c0_51 = arith.constant 0 : index
    %109 = vector.load %arg14[%108, %c0_50, %c0_51] : memref<4x2x32xf32, #tpu.memory_space<vmem>>, vector<1x2x32xf32>
    %110 = vector.shape_cast %109 : vector<1x2x32xf32> to vector<2x32xf32>
    %111 = vector.shape_cast %107 : vector<2x32xf32> to vector<1x2x32xf32>
    tpu.vector_store %arg14[%108, %c0_50, %c0_51], %111 {strides = array<i32>} : memref<4x2x32xf32, #tpu.memory_space<vmem>>, vector<1x2x32xf32>,
    %112 = arith.index_cast %c0_i32_1 : i32 to index
    %c0_52 = arith.constant 0 : index
    %c0_53 = arith.constant 0 : index
    %113 = vector.load %arg15[%112, %c0_52, %c0_53] : memref<4x2x128xf32, #tpu.memory_space<vmem>>, vector<1x2x128xf32>
    %114 = vector.shape_cast %113 : vector<1x2x128xf32> to vector<2x128xf32>
    %115 = vector.shape_cast %97 : vector<2x128xf32> to vector<1x2x128xf32>
    tpu.vector_store %arg15[%112, %c0_52, %c0_53], %115 {strides = array<i32>} : memref<4x2x128xf32, #tpu.memory_space<vmem>>, vector<1x2x128xf32>,
    %116 = arith.select %5, %45, %8 : vector<2x32xf32>
    %c0_54 = arith.constant 0 : index
    %c0_55 = arith.constant 0 : index
    %c0_56 = arith.constant 0 : index
    %117 = vector.load %arg18[%c0_54, %c0_55, %c0_56] : memref<2x2x32xf32, #tpu.memory_space<vmem>>, vector<1x2x32xf32>
    %118 = vector.shape_cast %117 : vector<1x2x32xf32> to vector<2x32xf32>
    %119 = vector.shape_cast %116 : vector<2x32xf32> to vector<1x2x32xf32>
    tpu.vector_store %arg18[%c0_54, %c0_55, %c0_56], %119 {strides = array<i32>} : memref<2x2x32xf32, #tpu.memory_space<vmem>>, vector<1x2x32xf32>,
    %120 = arith.select %5, %43, %10 : vector<2x32xf32>
    %c0_57 = arith.constant 0 : index
    %c0_58 = arith.constant 0 : index
    %c0_59 = arith.constant 0 : index
    %121 = vector.load %arg19[%c0_57, %c0_58, %c0_59] : memref<2x2x32xf32, #tpu.memory_space<vmem>>, vector<1x2x32xf32>
    %122 = vector.shape_cast %121 : vector<1x2x32xf32> to vector<2x32xf32>
    %123 = vector.shape_cast %120 : vector<2x32xf32> to vector<1x2x32xf32>
    tpu.vector_store %arg19[%c0_57, %c0_58, %c0_59], %123 {strides = array<i32>} : memref<2x2x32xf32, #tpu.memory_space<vmem>>, vector<1x2x32xf32>,
    %124 = arith.select %5, %75, %12 : vector<2x32xf32>
    %c1_60 = arith.constant 1 : index
    %c0_61 = arith.constant 0 : index
    %c0_62 = arith.constant 0 : index
    %125 = vector.load %arg18[%c1_60, %c0_61, %c0_62] : memref<2x2x32xf32, #tpu.memory_space<vmem>>, vector<1x2x32xf32>
    %126 = vector.shape_cast %125 : vector<1x2x32xf32> to vector<2x32xf32>
    %127 = vector.shape_cast %124 : vector<2x32xf32> to vector<1x2x32xf32>
    tpu.vector_store %arg18[%c1_60, %c0_61, %c0_62], %127 {strides = array<i32>} : memref<2x2x32xf32, #tpu.memory_space<vmem>>, vector<1x2x32xf32>,
    %128 = arith.select %5, %73, %14 : vector<2x32xf32>
    %c1_63 = arith.constant 1 : index
    %c0_64 = arith.constant 0 : index
    %c0_65 = arith.constant 0 : index
    %129 = vector.load %arg19[%c1_63, %c0_64, %c0_65] : memref<2x2x32xf32, #tpu.memory_space<vmem>>, vector<1x2x32xf32>
    %130 = vector.shape_cast %129 : vector<1x2x32xf32> to vector<2x32xf32>
    %131 = vector.shape_cast %128 : vector<2x32xf32> to vector<1x2x32xf32>
    tpu.vector_store %arg19[%c1_63, %c0_64, %c0_65], %131 {strides = array<i32>} : memref<2x2x32xf32, #tpu.memory_space<vmem>>, vector<1x2x32xf32>,
    %132 = arith.select %5, %107, %6 : vector<2x32xf32>
    %c0_66 = arith.constant 0 : index
    %c0_67 = arith.constant 0 : index
    %133 = vector.load %arg20[%c0_66, %c0_67] : memref<2x32xf32, #tpu.memory_space<vmem>>, vector<2x32xf32>
    tpu.vector_store %arg20[%c0_66, %c0_67], %132 {strides = array<i32>} : memref<2x32xf32, #tpu.memory_space<vmem>>, vector<2x32xf32>,
    %c1_i32 = arith.constant 1 : i32
    %c4_i32_68 = arith.constant 4 : i32
    %134 = arith.muli %arg0, %c4_i32_68 : i32
    %135 = arith.addi %134, %c1_i32 : i32
    %c6_i32_69 = arith.constant 6 : i32
    %136 = arith.cmpi slt, %135, %c6_i32_69 : i32
    %c0_70 = arith.constant 0 : index
    %c0_71 = arith.constant 0 : index
    %137 = vector.load %arg20[%c0_70, %c0_71] : memref<2x32xf32, #tpu.memory_space<vmem>>, vector<2x32xf32>
    %c0_72 = arith.constant 0 : index
    %c0_73 = arith.constant 0 : index
    %c0_74 = arith.constant 0 : index
    %138 = vector.load %arg18[%c0_72, %c0_73, %c0_74] : memref<2x2x32xf32, #tpu.memory_space<vmem>>, vector<1x2x32xf32>
    %139 = vector.shape_cast %138 : vector<1x2x32xf32> to vector<2x32xf32>
    %c0_75 = arith.constant 0 : index
    %c0_76 = arith.constant 0 : index
    %c0_77 = arith.constant 0 : index
    %140 = vector.load %arg19[%c0_75, %c0_76, %c0_77] : memref<2x2x32xf32, #tpu.memory_space<vmem>>, vector<1x2x32xf32>
    %141 = vector.shape_cast %140 : vector<1x2x32xf32> to vector<2x32xf32>
    %c1_78 = arith.constant 1 : index
    %c0_79 = arith.constant 0 : index
    %c0_80 = arith.constant 0 : index
    %142 = vector.load %arg18[%c1_78, %c0_79, %c0_80] : memref<2x2x32xf32, #tpu.memory_space<vmem>>, vector<1x2x32xf32>
    %143 = vector.shape_cast %142 : vector<1x2x32xf32> to vector<2x32xf32>
    %c1_81 = arith.constant 1 : index
    %c0_82 = arith.constant 0 : index
    %c0_83 = arith.constant 0 : index
    %144 = vector.load %arg19[%c1_81, %c0_82, %c0_83] : memref<2x2x32xf32, #tpu.memory_space<vmem>>, vector<1x2x32xf32>
    %145 = vector.shape_cast %144 : vector<1x2x32xf32> to vector<2x32xf32>
    %146 = arith.index_cast %c1_i32 : i32 to index
    %c0_84 = arith.constant 0 : index
    %c0_85 = arith.constant 0 : index
    %147 = vector.load %arg1[%146, %c0_84, %c0_85] : memref<4x2x128xf32, #tpu.memory_space<vmem>>, vector<1x2x128xf32>
    %148 = vector.shape_cast %147 : vector<1x2x128xf32> to vector<2x128xf32>
    %c0_86 = arith.constant 0 : index
    %c0_87 = arith.constant 0 : index
    %149 = vector.load %arg6[%c0_86, %c0_87] : memref<32x128xf32, #tpu.memory_space<vmem>>, vector<32x128xf32>
    %cst_88 = arith.constant dense<0.000000e+00> : vector<2x128xf32>
    %150 = tpu.matmul %137, %149, %cst_88 {dimension_numbers = #tpu.dot_dimension_numbers<[1], [0], [0], [1], [0, 0, 1, 1], [], []>} : vector<2x32xf32>, vector<32x128xf32>, vector<2x128xf32> -> vector<2x128xf32>
    %151 = arith.addf %148, %150 : vector<2x128xf32>
    %c0_89 = arith.constant 0 : index
    %c0_90 = arith.constant 0 : index
    %152 = vector.load %arg7[%c0_89, %c0_90] : memref<32x128xf32, #tpu.memory_space<vmem>>, vector<32x128xf32>
    %cst_91 = arith.constant dense<0.000000e+00> : vector<2x128xf32>
    %153 = tpu.matmul %139, %152, %cst_91 {dimension_numbers = #tpu.dot_dimension_numbers<[1], [0], [0], [1], [0, 0, 1, 1], [], []>} : vector<2x32xf32>, vector<32x128xf32>, vector<2x128xf32> -> vector<2x128xf32>
    %154 = arith.addf %151, %153 : vector<2x128xf32>
    %155 = tpu.iota {dimensions = array<i32: 1>} : vector<2x128xi32>
    %c64_i32_92 = arith.constant 64 : i32
    %156 = vector.broadcast %c64_i32_92 : i32 to vector<2x128xi32>
    %157 = arith.cmpi sge, %155, %156 : vector<2x128xi32>
    %c96_i32_93 = arith.constant 96 : i32
    %158 = vector.broadcast %c96_i32_93 : i32 to vector<2x128xi32>
    %159 = arith.cmpi slt, %155, %158 : vector<2x128xi32>
    %160 = arith.andi %157, %159 : vector<2x128xi1>
    %161 = math.tanh %154 : vector<2x128xf32>
    %162 = arith.negf %154 : vector<2x128xf32>
    %163 = math.exp %162 : vector<2x128xf32>
    %cst_94 = arith.constant 1.000000e+00 : f32
    %164 = vector.broadcast %cst_94 : f32 to vector<2x128xf32>
    %165 = arith.addf %164, %163 : vector<2x128xf32>
    %166 = arith.divf %164, %165 : vector<2x128xf32>
    %167 = arith.select %160, %161, %166 : vector<2x128xi1>, vector<2x128xf32>
    %168 = vector.extract_strided_slice %167 {offsets = [0, 0], sizes = [2, 32], strides = [1, 1]} : vector<2x128xf32> to vector<2x32xf32>
    %169 = vector.extract_strided_slice %167 {offsets = [0, 32], sizes = [2, 32], strides = [1, 1]} : vector<2x128xf32> to vector<2x32xf32>
    %170 = vector.extract_strided_slice %167 {offsets = [0, 64], sizes = [2, 32], strides = [1, 1]} : vector<2x128xf32> to vector<2x32xf32>
    %171 = vector.extract_strided_slice %167 {offsets = [0, 96], sizes = [2, 32], strides = [1, 1]} : vector<2x128xf32> to vector<2x32xf32>
    %172 = arith.mulf %169, %141 : vector<2x32xf32>
    %173 = arith.mulf %168, %170 : vector<2x32xf32>
    %174 = arith.addf %172, %173 : vector<2x32xf32>
    %175 = math.tanh %174 : vector<2x32xf32>
    %176 = arith.mulf %171, %175 : vector<2x32xf32>
    %c0_95 = arith.constant 0 : index
    %c0_96 = arith.constant 0 : index
    %177 = vector.load %arg10[%c0_95, %c0_96] : memref<1x128xf32, #tpu.memory_space<vmem>>, vector<1x128xf32>
    %c0_97 = arith.constant 0 : index
    %c0_98 = arith.constant 0 : index
    %178 = vector.load %arg8[%c0_97, %c0_98] : memref<32x128xf32, #tpu.memory_space<vmem>>, vector<32x128xf32>
    %cst_99 = arith.constant dense<0.000000e+00> : vector<2x128xf32>
    %179 = tpu.matmul %176, %178, %cst_99 {dimension_numbers = #tpu.dot_dimension_numbers<[1], [0], [0], [1], [0, 0, 1, 1], [], []>} : vector<2x32xf32>, vector<32x128xf32>, vector<2x128xf32> -> vector<2x128xf32>
    %180 = vector.broadcast %177 : vector<1x128xf32> to vector<2x128xf32>
    %181 = arith.addf %180, %179 : vector<2x128xf32>
    %c0_100 = arith.constant 0 : index
    %c0_101 = arith.constant 0 : index
    %182 = vector.load %arg9[%c0_100, %c0_101] : memref<32x128xf32, #tpu.memory_space<vmem>>, vector<32x128xf32>
    %cst_102 = arith.constant dense<0.000000e+00> : vector<2x128xf32>
    %183 = tpu.matmul %143, %182, %cst_102 {dimension_numbers = #tpu.dot_dimension_numbers<[1], [0], [0], [1], [0, 0, 1, 1], [], []>} : vector<2x32xf32>, vector<32x128xf32>, vector<2x128xf32> -> vector<2x128xf32>
    %184 = arith.addf %181, %183 : vector<2x128xf32>
    %185 = tpu.iota {dimensions = array<i32: 1>} : vector<2x128xi32>
    %c64_i32_103 = arith.constant 64 : i32
    %186 = vector.broadcast %c64_i32_103 : i32 to vector<2x128xi32>
    %187 = arith.cmpi sge, %185, %186 : vector<2x128xi32>
    %c96_i32_104 = arith.constant 96 : i32
    %188 = vector.broadcast %c96_i32_104 : i32 to vector<2x128xi32>
    %189 = arith.cmpi slt, %185, %188 : vector<2x128xi32>
    %190 = arith.andi %187, %189 : vector<2x128xi1>
    %191 = math.tanh %184 : vector<2x128xf32>
    %192 = arith.negf %184 : vector<2x128xf32>
    %193 = math.exp %192 : vector<2x128xf32>
    %cst_105 = arith.constant 1.000000e+00 : f32
    %194 = vector.broadcast %cst_105 : f32 to vector<2x128xf32>
    %195 = arith.addf %194, %193 : vector<2x128xf32>
    %196 = arith.divf %194, %195 : vector<2x128xf32>
    %197 = arith.select %190, %191, %196 : vector<2x128xi1>, vector<2x128xf32>
    %198 = vector.extract_strided_slice %197 {offsets = [0, 0], sizes = [2, 32], strides = [1, 1]} : vector<2x128xf32> to vector<2x32xf32>
    %199 = vector.extract_strided_slice %197 {offsets = [0, 32], sizes = [2, 32], strides = [1, 1]} : vector<2x128xf32> to vector<2x32xf32>
    %200 = vector.extract_strided_slice %197 {offsets = [0, 64], sizes = [2, 32], strides = [1, 1]} : vector<2x128xf32> to vector<2x32xf32>
    %201 = vector.extract_strided_slice %197 {offsets = [0, 96], sizes = [2, 32], strides = [1, 1]} : vector<2x128xf32> to vector<2x32xf32>
    %202 = arith.mulf %199, %145 : vector<2x32xf32>
    %203 = arith.mulf %198, %200 : vector<2x32xf32>
    %204 = arith.addf %202, %203 : vector<2x32xf32>
    %205 = math.tanh %204 : vector<2x32xf32>
    %206 = arith.mulf %201, %205 : vector<2x32xf32>
    %c0_106 = arith.constant 0 : index
    %c0_107 = arith.constant 0 : index
    %207 = vector.load %arg11[%c0_106, %c0_107] : memref<32x32xf32, #tpu.memory_space<vmem>>, vector<32x32xf32>
    %cst_108 = arith.constant dense<0.000000e+00> : vector<2x32xf32>
    %208 = tpu.matmul %206, %207, %cst_108 {dimension_numbers = #tpu.dot_dimension_numbers<[1], [0], [0], [1], [0, 0, 1, 1], [], []>} : vector<2x32xf32>, vector<32x32xf32>, vector<2x32xf32> -> vector<2x32xf32>
    %c0_109 = arith.constant 0 : index
    %c0_110 = arith.constant 0 : index
    %c0_111 = arith.constant 0 : index
    %209 = vector.load %arg2[%c0_109, %c0_110, %c0_111] : memref<2x128x32xf32, #tpu.memory_space<vmem>>, vector<2x128x32xf32>
    %210 = vector.shape_cast %208 : vector<2x32xf32> to vector<2x1x32xf32>
    %211 = vector.broadcast %210 : vector<2x1x32xf32> to vector<2x128x32xf32>
    %212 = arith.mulf %211, %209 : vector<2x128x32xf32>
    %cst_112 = arith.constant dense<0.000000e+00> : vector<2x128xf32>
    %213 = vector.multi_reduction <add>, %212, %cst_112 [2] : vector<2x128x32xf32> to vector<2x128xf32>
    %214 = tpu.iota {dimensions = array<i32: 1>} : vector<2x128xi32>
    %c8_i32_113 = arith.constant 8 : i32
    %215 = vector.broadcast %c8_i32_113 : i32 to vector<2x128xi32>
    %216 = arith.cmpi slt, %214, %215 : vector<2x128xi32>
    %cst_114 = arith.constant -1.000000e+30 : f32
    %217 = vector.broadcast %cst_114 : f32 to vector<2x128xf32>
    %218 = arith.select %216, %213, %217 : vector<2x128xi1>, vector<2x128xf32>
    %cst_115 = arith.constant dense<0xFF800000> : vector<2xf32>
    %219 = vector.multi_reduction <maximumf>, %218, %cst_115 [1] : vector<2x128xf32> to vector<2xf32>
    %220 = vector.shape_cast %219 : vector<2xf32> to vector<2x1xf32>
    %221 = vector.broadcast %220 : vector<2x1xf32> to vector<2x128xf32>
    %222 = arith.subf %218, %221 : vector<2x128xf32>
    %223 = math.exp %222 : vector<2x128xf32>
    %cst_116 = arith.constant dense<0.000000e+00> : vector<2xf32>
    %224 = vector.multi_reduction <add>, %223, %cst_116 [1] : vector<2x128xf32> to vector<2xf32>
    %225 = vector.shape_cast %224 : vector<2xf32> to vector<2x1xf32>
    %226 = tpu.reciprocal %225 : vector<2x1xf32> -> vector<2x1xf32>
    %227 = vector.broadcast %226 : vector<2x1xf32> to vector<2x128xf32>
    %228 = arith.mulf %223, %227 : vector<2x128xf32>
    %229 = vector.shape_cast %228 : vector<2x128xf32> to vector<2x128x1xf32>
    %230 = vector.broadcast %229 : vector<2x128x1xf32> to vector<2x128x32xf32>
    %231 = arith.mulf %230, %209 : vector<2x128x32xf32>
    %cst_117 = arith.constant dense<0.000000e+00> : vector<2x32xf32>
    %232 = vector.multi_reduction <add>, %231, %cst_117 [1] : vector<2x128x32xf32> to vector<2x32xf32>
    %c0_118 = arith.constant 0 : index
    %c0_119 = arith.constant 0 : index
    %233 = vector.load %arg12[%c0_118, %c0_119] : memref<32x32xf32, #tpu.memory_space<vmem>>, vector<32x32xf32>
    %cst_120 = arith.constant dense<0.000000e+00> : vector<2x32xf32>
    %234 = tpu.matmul %232, %233, %cst_120 {dimension_numbers = #tpu.dot_dimension_numbers<[1], [0], [0], [1], [0, 0, 1, 1], [], []>} : vector<2x32xf32>, vector<32x32xf32>, vector<2x32xf32> -> vector<2x32xf32>
    %c0_121 = arith.constant 0 : index
    %c0_122 = arith.constant 0 : index
    %235 = vector.load %arg13[%c0_121, %c0_122] : memref<32x32xf32, #tpu.memory_space<vmem>>, vector<32x32xf32>
    %cst_123 = arith.constant dense<0.000000e+00> : vector<2x32xf32>
    %236 = tpu.matmul %206, %235, %cst_123 {dimension_numbers = #tpu.dot_dimension_numbers<[1], [0], [0], [1], [0, 0, 1, 1], [], []>} : vector<2x32xf32>, vector<32x32xf32>, vector<2x32xf32> -> vector<2x32xf32>
    %237 = arith.addf %234, %236 : vector<2x32xf32>
    %238 = math.tanh %237 : vector<2x32xf32>
    %239 = arith.index_cast %c1_i32 : i32 to index
    %c0_124 = arith.constant 0 : index
    %c0_125 = arith.constant 0 : index
    %240 = vector.load %arg14[%239, %c0_124, %c0_125] : memref<4x2x32xf32, #tpu.memory_space<vmem>>, vector<1x2x32xf32>
    %241 = vector.shape_cast %240 : vector<1x2x32xf32> to vector<2x32xf32>
    %242 = vector.shape_cast %238 : vector<2x32xf32> to vector<1x2x32xf32>
    tpu.vector_store %arg14[%239, %c0_124, %c0_125], %242 {strides = array<i32>} : memref<4x2x32xf32, #tpu.memory_space<vmem>>, vector<1x2x32xf32>,
    %243 = arith.index_cast %c1_i32 : i32 to index
    %c0_126 = arith.constant 0 : index
    %c0_127 = arith.constant 0 : index
    %244 = vector.load %arg15[%243, %c0_126, %c0_127] : memref<4x2x128xf32, #tpu.memory_space<vmem>>, vector<1x2x128xf32>
    %245 = vector.shape_cast %244 : vector<1x2x128xf32> to vector<2x128xf32>
    %246 = vector.shape_cast %228 : vector<2x128xf32> to vector<1x2x128xf32>
    tpu.vector_store %arg15[%243, %c0_126, %c0_127], %246 {strides = array<i32>} : memref<4x2x128xf32, #tpu.memory_space<vmem>>, vector<1x2x128xf32>,
    %247 = arith.select %136, %176, %139 : vector<2x32xf32>
    %c0_128 = arith.constant 0 : index
    %c0_129 = arith.constant 0 : index
    %c0_130 = arith.constant 0 : index
    %248 = vector.load %arg18[%c0_128, %c0_129, %c0_130] : memref<2x2x32xf32, #tpu.memory_space<vmem>>, vector<1x2x32xf32>
    %249 = vector.shape_cast %248 : vector<1x2x32xf32> to vector<2x32xf32>
    %250 = vector.shape_cast %247 : vector<2x32xf32> to vector<1x2x32xf32>
    tpu.vector_store %arg18[%c0_128, %c0_129, %c0_130], %250 {strides = array<i32>} : memref<2x2x32xf32, #tpu.memory_space<vmem>>, vector<1x2x32xf32>,
    %251 = arith.select %136, %174, %141 : vector<2x32xf32>
    %c0_131 = arith.constant 0 : index
    %c0_132 = arith.constant 0 : index
    %c0_133 = arith.constant 0 : index
    %252 = vector.load %arg19[%c0_131, %c0_132, %c0_133] : memref<2x2x32xf32, #tpu.memory_space<vmem>>, vector<1x2x32xf32>
    %253 = vector.shape_cast %252 : vector<1x2x32xf32> to vector<2x32xf32>
    %254 = vector.shape_cast %251 : vector<2x32xf32> to vector<1x2x32xf32>
    tpu.vector_store %arg19[%c0_131, %c0_132, %c0_133], %254 {strides = array<i32>} : memref<2x2x32xf32, #tpu.memory_space<vmem>>, vector<1x2x32xf32>,
    %255 = arith.select %136, %206, %143 : vector<2x32xf32>
    %c1_134 = arith.constant 1 : index
    %c0_135 = arith.constant 0 : index
    %c0_136 = arith.constant 0 : index
    %256 = vector.load %arg18[%c1_134, %c0_135, %c0_136] : memref<2x2x32xf32, #tpu.memory_space<vmem>>, vector<1x2x32xf32>
    %257 = vector.shape_cast %256 : vector<1x2x32xf32> to vector<2x32xf32>
    %258 = vector.shape_cast %255 : vector<2x32xf32> to vector<1x2x32xf32>
    tpu.vector_store %arg18[%c1_134, %c0_135, %c0_136], %258 {strides = array<i32>} : memref<2x2x32xf32, #tpu.memory_space<vmem>>, vector<1x2x32xf32>,
    %259 = arith.select %136, %204, %145 : vector<2x32xf32>
    %c1_137 = arith.constant 1 : index
    %c0_138 = arith.constant 0 : index
    %c0_139 = arith.constant 0 : index
    %260 = vector.load %arg19[%c1_137, %c0_138, %c0_139] : memref<2x2x32xf32, #tpu.memory_space<vmem>>, vector<1x2x32xf32>
    %261 = vector.shape_cast %260 : vector<1x2x32xf32> to vector<2x32xf32>
    %262 = vector.shape_cast %259 : vector<2x32xf32> to vector<1x2x32xf32>
    tpu.vector_store %arg19[%c1_137, %c0_138, %c0_139], %262 {strides = array<i32>} : memref<2x2x32xf32, #tpu.memory_space<vmem>>, vector<1x2x32xf32>,
    %263 = arith.select %136, %238, %137 : vector<2x32xf32>
    %c0_140 = arith.constant 0 : index
    %c0_141 = arith.constant 0 : index
    %264 = vector.load %arg20[%c0_140, %c0_141] : memref<2x32xf32, #tpu.memory_space<vmem>>, vector<2x32xf32>
    tpu.vector_store %arg20[%c0_140, %c0_141], %263 {strides = array<i32>} : memref<2x32xf32, #tpu.memory_space<vmem>>, vector<2x32xf32>,
    %c2_i32 = arith.constant 2 : i32
    %c4_i32_142 = arith.constant 4 : i32
    %265 = arith.muli %arg0, %c4_i32_142 : i32
    %266 = arith.addi %265, %c2_i32 : i32
    %c6_i32_143 = arith.constant 6 : i32
    %267 = arith.cmpi slt, %266, %c6_i32_143 : i32
    %c0_144 = arith.constant 0 : index
    %c0_145 = arith.constant 0 : index
    %268 = vector.load %arg20[%c0_144, %c0_145] : memref<2x32xf32, #tpu.memory_space<vmem>>, vector<2x32xf32>
    %c0_146 = arith.constant 0 : index
    %c0_147 = arith.constant 0 : index
    %c0_148 = arith.constant 0 : index
    %269 = vector.load %arg18[%c0_146, %c0_147, %c0_148] : memref<2x2x32xf32, #tpu.memory_space<vmem>>, vector<1x2x32xf32>
    %270 = vector.shape_cast %269 : vector<1x2x32xf32> to vector<2x32xf32>
    %c0_149 = arith.constant 0 : index
    %c0_150 = arith.constant 0 : index
    %c0_151 = arith.constant 0 : index
    %271 = vector.load %arg19[%c0_149, %c0_150, %c0_151] : memref<2x2x32xf32, #tpu.memory_space<vmem>>, vector<1x2x32xf32>
    %272 = vector.shape_cast %271 : vector<1x2x32xf32> to vector<2x32xf32>
    %c1_152 = arith.constant 1 : index
    %c0_153 = arith.constant 0 : index
    %c0_154 = arith.constant 0 : index
    %273 = vector.load %arg18[%c1_152, %c0_153, %c0_154] : memref<2x2x32xf32, #tpu.memory_space<vmem>>, vector<1x2x32xf32>
    %274 = vector.shape_cast %273 : vector<1x2x32xf32> to vector<2x32xf32>
    %c1_155 = arith.constant 1 : index
    %c0_156 = arith.constant 0 : index
    %c0_157 = arith.constant 0 : index
    %275 = vector.load %arg19[%c1_155, %c0_156, %c0_157] : memref<2x2x32xf32, #tpu.memory_space<vmem>>, vector<1x2x32xf32>
    %276 = vector.shape_cast %275 : vector<1x2x32xf32> to vector<2x32xf32>
    %277 = arith.index_cast %c2_i32 : i32 to index
    %c0_158 = arith.constant 0 : index
    %c0_159 = arith.constant 0 : index
    %278 = vector.load %arg1[%277, %c0_158, %c0_159] : memref<4x2x128xf32, #tpu.memory_space<vmem>>, vector<1x2x128xf32>
    %279 = vector.shape_cast %278 : vector<1x2x128xf32> to vector<2x128xf32>
    %c0_160 = arith.constant 0 : index
    %c0_161 = arith.constant 0 : index
    %280 = vector.load %arg6[%c0_160, %c0_161] : memref<32x128xf32, #tpu.memory_space<vmem>>, vector<32x128xf32>
    %cst_162 = arith.constant dense<0.000000e+00> : vector<2x128xf32>
    %281 = tpu.matmul %268, %280, %cst_162 {dimension_numbers = #tpu.dot_dimension_numbers<[1], [0], [0], [1], [0, 0, 1, 1], [], []>} : vector<2x32xf32>, vector<32x128xf32>, vector<2x128xf32> -> vector<2x128xf32>
    %282 = arith.addf %279, %281 : vector<2x128xf32>
    %c0_163 = arith.constant 0 : index
    %c0_164 = arith.constant 0 : index
    %283 = vector.load %arg7[%c0_163, %c0_164] : memref<32x128xf32, #tpu.memory_space<vmem>>, vector<32x128xf32>
    %cst_165 = arith.constant dense<0.000000e+00> : vector<2x128xf32>
    %284 = tpu.matmul %270, %283, %cst_165 {dimension_numbers = #tpu.dot_dimension_numbers<[1], [0], [0], [1], [0, 0, 1, 1], [], []>} : vector<2x32xf32>, vector<32x128xf32>, vector<2x128xf32> -> vector<2x128xf32>
    %285 = arith.addf %282, %284 : vector<2x128xf32>
    %286 = tpu.iota {dimensions = array<i32: 1>} : vector<2x128xi32>
    %c64_i32_166 = arith.constant 64 : i32
    %287 = vector.broadcast %c64_i32_166 : i32 to vector<2x128xi32>
    %288 = arith.cmpi sge, %286, %287 : vector<2x128xi32>
    %c96_i32_167 = arith.constant 96 : i32
    %289 = vector.broadcast %c96_i32_167 : i32 to vector<2x128xi32>
    %290 = arith.cmpi slt, %286, %289 : vector<2x128xi32>
    %291 = arith.andi %288, %290 : vector<2x128xi1>
    %292 = math.tanh %285 : vector<2x128xf32>
    %293 = arith.negf %285 : vector<2x128xf32>
    %294 = math.exp %293 : vector<2x128xf32>
    %cst_168 = arith.constant 1.000000e+00 : f32
    %295 = vector.broadcast %cst_168 : f32 to vector<2x128xf32>
    %296 = arith.addf %295, %294 : vector<2x128xf32>
    %297 = arith.divf %295, %296 : vector<2x128xf32>
    %298 = arith.select %291, %292, %297 : vector<2x128xi1>, vector<2x128xf32>
    %299 = vector.extract_strided_slice %298 {offsets = [0, 0], sizes = [2, 32], strides = [1, 1]} : vector<2x128xf32> to vector<2x32xf32>
    %300 = vector.extract_strided_slice %298 {offsets = [0, 32], sizes = [2, 32], strides = [1, 1]} : vector<2x128xf32> to vector<2x32xf32>
    %301 = vector.extract_strided_slice %298 {offsets = [0, 64], sizes = [2, 32], strides = [1, 1]} : vector<2x128xf32> to vector<2x32xf32>
    %302 = vector.extract_strided_slice %298 {offsets = [0, 96], sizes = [2, 32], strides = [1, 1]} : vector<2x128xf32> to vector<2x32xf32>
    %303 = arith.mulf %300, %272 : vector<2x32xf32>
    %304 = arith.mulf %299, %301 : vector<2x32xf32>
    %305 = arith.addf %303, %304 : vector<2x32xf32>
    %306 = math.tanh %305 : vector<2x32xf32>
    %307 = arith.mulf %302, %306 : vector<2x32xf32>
    %c0_169 = arith.constant 0 : index
    %c0_170 = arith.constant 0 : index
    %308 = vector.load %arg10[%c0_169, %c0_170] : memref<1x128xf32, #tpu.memory_space<vmem>>, vector<1x128xf32>
    %c0_171 = arith.constant 0 : index
    %c0_172 = arith.constant 0 : index
    %309 = vector.load %arg8[%c0_171, %c0_172] : memref<32x128xf32, #tpu.memory_space<vmem>>, vector<32x128xf32>
    %cst_173 = arith.constant dense<0.000000e+00> : vector<2x128xf32>
    %310 = tpu.matmul %307, %309, %cst_173 {dimension_numbers = #tpu.dot_dimension_numbers<[1], [0], [0], [1], [0, 0, 1, 1], [], []>} : vector<2x32xf32>, vector<32x128xf32>, vector<2x128xf32> -> vector<2x128xf32>
    %311 = vector.broadcast %308 : vector<1x128xf32> to vector<2x128xf32>
    %312 = arith.addf %311, %310 : vector<2x128xf32>
    %c0_174 = arith.constant 0 : index
    %c0_175 = arith.constant 0 : index
    %313 = vector.load %arg9[%c0_174, %c0_175] : memref<32x128xf32, #tpu.memory_space<vmem>>, vector<32x128xf32>
    %cst_176 = arith.constant dense<0.000000e+00> : vector<2x128xf32>
    %314 = tpu.matmul %274, %313, %cst_176 {dimension_numbers = #tpu.dot_dimension_numbers<[1], [0], [0], [1], [0, 0, 1, 1], [], []>} : vector<2x32xf32>, vector<32x128xf32>, vector<2x128xf32> -> vector<2x128xf32>
    %315 = arith.addf %312, %314 : vector<2x128xf32>
    %316 = tpu.iota {dimensions = array<i32: 1>} : vector<2x128xi32>
    %c64_i32_177 = arith.constant 64 : i32
    %317 = vector.broadcast %c64_i32_177 : i32 to vector<2x128xi32>
    %318 = arith.cmpi sge, %316, %317 : vector<2x128xi32>
    %c96_i32_178 = arith.constant 96 : i32
    %319 = vector.broadcast %c96_i32_178 : i32 to vector<2x128xi32>
    %320 = arith.cmpi slt, %316, %319 : vector<2x128xi32>
    %321 = arith.andi %318, %320 : vector<2x128xi1>
    %322 = math.tanh %315 : vector<2x128xf32>
    %323 = arith.negf %315 : vector<2x128xf32>
    %324 = math.exp %323 : vector<2x128xf32>
    %cst_179 = arith.constant 1.000000e+00 : f32
    %325 = vector.broadcast %cst_179 : f32 to vector<2x128xf32>
    %326 = arith.addf %325, %324 : vector<2x128xf32>
    %327 = arith.divf %325, %326 : vector<2x128xf32>
    %328 = arith.select %321, %322, %327 : vector<2x128xi1>, vector<2x128xf32>
    %329 = vector.extract_strided_slice %328 {offsets = [0, 0], sizes = [2, 32], strides = [1, 1]} : vector<2x128xf32> to vector<2x32xf32>
    %330 = vector.extract_strided_slice %328 {offsets = [0, 32], sizes = [2, 32], strides = [1, 1]} : vector<2x128xf32> to vector<2x32xf32>
    %331 = vector.extract_strided_slice %328 {offsets = [0, 64], sizes = [2, 32], strides = [1, 1]} : vector<2x128xf32> to vector<2x32xf32>
    %332 = vector.extract_strided_slice %328 {offsets = [0, 96], sizes = [2, 32], strides = [1, 1]} : vector<2x128xf32> to vector<2x32xf32>
    %333 = arith.mulf %330, %276 : vector<2x32xf32>
    %334 = arith.mulf %329, %331 : vector<2x32xf32>
    %335 = arith.addf %333, %334 : vector<2x32xf32>
    %336 = math.tanh %335 : vector<2x32xf32>
    %337 = arith.mulf %332, %336 : vector<2x32xf32>
    %c0_180 = arith.constant 0 : index
    %c0_181 = arith.constant 0 : index
    %338 = vector.load %arg11[%c0_180, %c0_181] : memref<32x32xf32, #tpu.memory_space<vmem>>, vector<32x32xf32>
    %cst_182 = arith.constant dense<0.000000e+00> : vector<2x32xf32>
    %339 = tpu.matmul %337, %338, %cst_182 {dimension_numbers = #tpu.dot_dimension_numbers<[1], [0], [0], [1], [0, 0, 1, 1], [], []>} : vector<2x32xf32>, vector<32x32xf32>, vector<2x32xf32> -> vector<2x32xf32>
    %c0_183 = arith.constant 0 : index
    %c0_184 = arith.constant 0 : index
    %c0_185 = arith.constant 0 : index
    %340 = vector.load %arg2[%c0_183, %c0_184, %c0_185] : memref<2x128x32xf32, #tpu.memory_space<vmem>>, vector<2x128x32xf32>
    %341 = vector.shape_cast %339 : vector<2x32xf32> to vector<2x1x32xf32>
    %342 = vector.broadcast %341 : vector<2x1x32xf32> to vector<2x128x32xf32>
    %343 = arith.mulf %342, %340 : vector<2x128x32xf32>
    %cst_186 = arith.constant dense<0.000000e+00> : vector<2x128xf32>
    %344 = vector.multi_reduction <add>, %343, %cst_186 [2] : vector<2x128x32xf32> to vector<2x128xf32>
    %345 = tpu.iota {dimensions = array<i32: 1>} : vector<2x128xi32>
    %c8_i32_187 = arith.constant 8 : i32
    %346 = vector.broadcast %c8_i32_187 : i32 to vector<2x128xi32>
    %347 = arith.cmpi slt, %345, %346 : vector<2x128xi32>
    %cst_188 = arith.constant -1.000000e+30 : f32
    %348 = vector.broadcast %cst_188 : f32 to vector<2x128xf32>
    %349 = arith.select %347, %344, %348 : vector<2x128xi1>, vector<2x128xf32>
    %cst_189 = arith.constant dense<0xFF800000> : vector<2xf32>
    %350 = vector.multi_reduction <maximumf>, %349, %cst_189 [1] : vector<2x128xf32> to vector<2xf32>
    %351 = vector.shape_cast %350 : vector<2xf32> to vector<2x1xf32>
    %352 = vector.broadcast %351 : vector<2x1xf32> to vector<2x128xf32>
    %353 = arith.subf %349, %352 : vector<2x128xf32>
    %354 = math.exp %353 : vector<2x128xf32>
    %cst_190 = arith.constant dense<0.000000e+00> : vector<2xf32>
    %355 = vector.multi_reduction <add>, %354, %cst_190 [1] : vector<2x128xf32> to vector<2xf32>
    %356 = vector.shape_cast %355 : vector<2xf32> to vector<2x1xf32>
    %357 = tpu.reciprocal %356 : vector<2x1xf32> -> vector<2x1xf32>
    %358 = vector.broadcast %357 : vector<2x1xf32> to vector<2x128xf32>
    %359 = arith.mulf %354, %358 : vector<2x128xf32>
    %360 = vector.shape_cast %359 : vector<2x128xf32> to vector<2x128x1xf32>
    %361 = vector.broadcast %360 : vector<2x128x1xf32> to vector<2x128x32xf32>
    %362 = arith.mulf %361, %340 : vector<2x128x32xf32>
    %cst_191 = arith.constant dense<0.000000e+00> : vector<2x32xf32>
    %363 = vector.multi_reduction <add>, %362, %cst_191 [1] : vector<2x128x32xf32> to vector<2x32xf32>
    %c0_192 = arith.constant 0 : index
    %c0_193 = arith.constant 0 : index
    %364 = vector.load %arg12[%c0_192, %c0_193] : memref<32x32xf32, #tpu.memory_space<vmem>>, vector<32x32xf32>
    %cst_194 = arith.constant dense<0.000000e+00> : vector<2x32xf32>
    %365 = tpu.matmul %363, %364, %cst_194 {dimension_numbers = #tpu.dot_dimension_numbers<[1], [0], [0], [1], [0, 0, 1, 1], [], []>} : vector<2x32xf32>, vector<32x32xf32>, vector<2x32xf32> -> vector<2x32xf32>
    %c0_195 = arith.constant 0 : index
    %c0_196 = arith.constant 0 : index
    %366 = vector.load %arg13[%c0_195, %c0_196] : memref<32x32xf32, #tpu.memory_space<vmem>>, vector<32x32xf32>
    %cst_197 = arith.constant dense<0.000000e+00> : vector<2x32xf32>
    %367 = tpu.matmul %337, %366, %cst_197 {dimension_numbers = #tpu.dot_dimension_numbers<[1], [0], [0], [1], [0, 0, 1, 1], [], []>} : vector<2x32xf32>, vector<32x32xf32>, vector<2x32xf32> -> vector<2x32xf32>
    %368 = arith.addf %365, %367 : vector<2x32xf32>
    %369 = math.tanh %368 : vector<2x32xf32>
    %370 = arith.index_cast %c2_i32 : i32 to index
    %c0_198 = arith.constant 0 : index
    %c0_199 = arith.constant 0 : index
    %371 = vector.load %arg14[%370, %c0_198, %c0_199] : memref<4x2x32xf32, #tpu.memory_space<vmem>>, vector<1x2x32xf32>
    %372 = vector.shape_cast %371 : vector<1x2x32xf32> to vector<2x32xf32>
    %373 = vector.shape_cast %369 : vector<2x32xf32> to vector<1x2x32xf32>
    tpu.vector_store %arg14[%370, %c0_198, %c0_199], %373 {strides = array<i32>} : memref<4x2x32xf32, #tpu.memory_space<vmem>>, vector<1x2x32xf32>,
    %374 = arith.index_cast %c2_i32 : i32 to index
    %c0_200 = arith.constant 0 : index
    %c0_201 = arith.constant 0 : index
    %375 = vector.load %arg15[%374, %c0_200, %c0_201] : memref<4x2x128xf32, #tpu.memory_space<vmem>>, vector<1x2x128xf32>
    %376 = vector.shape_cast %375 : vector<1x2x128xf32> to vector<2x128xf32>
    %377 = vector.shape_cast %359 : vector<2x128xf32> to vector<1x2x128xf32>
    tpu.vector_store %arg15[%374, %c0_200, %c0_201], %377 {strides = array<i32>} : memref<4x2x128xf32, #tpu.memory_space<vmem>>, vector<1x2x128xf32>,
    %378 = arith.select %267, %307, %270 : vector<2x32xf32>
    %c0_202 = arith.constant 0 : index
    %c0_203 = arith.constant 0 : index
    %c0_204 = arith.constant 0 : index
    %379 = vector.load %arg18[%c0_202, %c0_203, %c0_204] : memref<2x2x32xf32, #tpu.memory_space<vmem>>, vector<1x2x32xf32>
    %380 = vector.shape_cast %379 : vector<1x2x32xf32> to vector<2x32xf32>
    %381 = vector.shape_cast %378 : vector<2x32xf32> to vector<1x2x32xf32>
    tpu.vector_store %arg18[%c0_202, %c0_203, %c0_204], %381 {strides = array<i32>} : memref<2x2x32xf32, #tpu.memory_space<vmem>>, vector<1x2x32xf32>,
    %382 = arith.select %267, %305, %272 : vector<2x32xf32>
    %c0_205 = arith.constant 0 : index
    %c0_206 = arith.constant 0 : index
    %c0_207 = arith.constant 0 : index
    %383 = vector.load %arg19[%c0_205, %c0_206, %c0_207] : memref<2x2x32xf32, #tpu.memory_space<vmem>>, vector<1x2x32xf32>
    %384 = vector.shape_cast %383 : vector<1x2x32xf32> to vector<2x32xf32>
    %385 = vector.shape_cast %382 : vector<2x32xf32> to vector<1x2x32xf32>
    tpu.vector_store %arg19[%c0_205, %c0_206, %c0_207], %385 {strides = array<i32>} : memref<2x2x32xf32, #tpu.memory_space<vmem>>, vector<1x2x32xf32>,
    %386 = arith.select %267, %337, %274 : vector<2x32xf32>
    %c1_208 = arith.constant 1 : index
    %c0_209 = arith.constant 0 : index
    %c0_210 = arith.constant 0 : index
    %387 = vector.load %arg18[%c1_208, %c0_209, %c0_210] : memref<2x2x32xf32, #tpu.memory_space<vmem>>, vector<1x2x32xf32>
    %388 = vector.shape_cast %387 : vector<1x2x32xf32> to vector<2x32xf32>
    %389 = vector.shape_cast %386 : vector<2x32xf32> to vector<1x2x32xf32>
    tpu.vector_store %arg18[%c1_208, %c0_209, %c0_210], %389 {strides = array<i32>} : memref<2x2x32xf32, #tpu.memory_space<vmem>>, vector<1x2x32xf32>,
    %390 = arith.select %267, %335, %276 : vector<2x32xf32>
    %c1_211 = arith.constant 1 : index
    %c0_212 = arith.constant 0 : index
    %c0_213 = arith.constant 0 : index
    %391 = vector.load %arg19[%c1_211, %c0_212, %c0_213] : memref<2x2x32xf32, #tpu.memory_space<vmem>>, vector<1x2x32xf32>
    %392 = vector.shape_cast %391 : vector<1x2x32xf32> to vector<2x32xf32>
    %393 = vector.shape_cast %390 : vector<2x32xf32> to vector<1x2x32xf32>
    tpu.vector_store %arg19[%c1_211, %c0_212, %c0_213], %393 {strides = array<i32>} : memref<2x2x32xf32, #tpu.memory_space<vmem>>, vector<1x2x32xf32>,
    %394 = arith.select %267, %369, %268 : vector<2x32xf32>
    %c0_214 = arith.constant 0 : index
    %c0_215 = arith.constant 0 : index
    %395 = vector.load %arg20[%c0_214, %c0_215] : memref<2x32xf32, #tpu.memory_space<vmem>>, vector<2x32xf32>
    tpu.vector_store %arg20[%c0_214, %c0_215], %394 {strides = array<i32>} : memref<2x32xf32, #tpu.memory_space<vmem>>, vector<2x32xf32>,
    %c3_i32 = arith.constant 3 : i32
    %c4_i32_216 = arith.constant 4 : i32
    %396 = arith.muli %arg0, %c4_i32_216 : i32
    %397 = arith.addi %396, %c3_i32 : i32
    %c6_i32_217 = arith.constant 6 : i32
    %398 = arith.cmpi slt, %397, %c6_i32_217 : i32
    %c0_218 = arith.constant 0 : index
    %c0_219 = arith.constant 0 : index
    %399 = vector.load %arg20[%c0_218, %c0_219] : memref<2x32xf32, #tpu.memory_space<vmem>>, vector<2x32xf32>
    %c0_220 = arith.constant 0 : index
    %c0_221 = arith.constant 0 : index
    %c0_222 = arith.constant 0 : index
    %400 = vector.load %arg18[%c0_220, %c0_221, %c0_222] : memref<2x2x32xf32, #tpu.memory_space<vmem>>, vector<1x2x32xf32>
    %401 = vector.shape_cast %400 : vector<1x2x32xf32> to vector<2x32xf32>
    %c0_223 = arith.constant 0 : index
    %c0_224 = arith.constant 0 : index
    %c0_225 = arith.constant 0 : index
    %402 = vector.load %arg19[%c0_223, %c0_224, %c0_225] : memref<2x2x32xf32, #tpu.memory_space<vmem>>, vector<1x2x32xf32>
    %403 = vector.shape_cast %402 : vector<1x2x32xf32> to vector<2x32xf32>
    %c1_226 = arith.constant 1 : index
    %c0_227 = arith.constant 0 : index
    %c0_228 = arith.constant 0 : index
    %404 = vector.load %arg18[%c1_226, %c0_227, %c0_228] : memref<2x2x32xf32, #tpu.memory_space<vmem>>, vector<1x2x32xf32>
    %405 = vector.shape_cast %404 : vector<1x2x32xf32> to vector<2x32xf32>
    %c1_229 = arith.constant 1 : index
    %c0_230 = arith.constant 0 : index
    %c0_231 = arith.constant 0 : index
    %406 = vector.load %arg19[%c1_229, %c0_230, %c0_231] : memref<2x2x32xf32, #tpu.memory_space<vmem>>, vector<1x2x32xf32>
    %407 = vector.shape_cast %406 : vector<1x2x32xf32> to vector<2x32xf32>
    %408 = arith.index_cast %c3_i32 : i32 to index
    %c0_232 = arith.constant 0 : index
    %c0_233 = arith.constant 0 : index
    %409 = vector.load %arg1[%408, %c0_232, %c0_233] : memref<4x2x128xf32, #tpu.memory_space<vmem>>, vector<1x2x128xf32>
    %410 = vector.shape_cast %409 : vector<1x2x128xf32> to vector<2x128xf32>
    %c0_234 = arith.constant 0 : index
    %c0_235 = arith.constant 0 : index
    %411 = vector.load %arg6[%c0_234, %c0_235] : memref<32x128xf32, #tpu.memory_space<vmem>>, vector<32x128xf32>
    %cst_236 = arith.constant dense<0.000000e+00> : vector<2x128xf32>
    %412 = tpu.matmul %399, %411, %cst_236 {dimension_numbers = #tpu.dot_dimension_numbers<[1], [0], [0], [1], [0, 0, 1, 1], [], []>} : vector<2x32xf32>, vector<32x128xf32>, vector<2x128xf32> -> vector<2x128xf32>
    %413 = arith.addf %410, %412 : vector<2x128xf32>
    %c0_237 = arith.constant 0 : index
    %c0_238 = arith.constant 0 : index
    %414 = vector.load %arg7[%c0_237, %c0_238] : memref<32x128xf32, #tpu.memory_space<vmem>>, vector<32x128xf32>
    %cst_239 = arith.constant dense<0.000000e+00> : vector<2x128xf32>
    %415 = tpu.matmul %401, %414, %cst_239 {dimension_numbers = #tpu.dot_dimension_numbers<[1], [0], [0], [1], [0, 0, 1, 1], [], []>} : vector<2x32xf32>, vector<32x128xf32>, vector<2x128xf32> -> vector<2x128xf32>
    %416 = arith.addf %413, %415 : vector<2x128xf32>
    %417 = tpu.iota {dimensions = array<i32: 1>} : vector<2x128xi32>
    %c64_i32_240 = arith.constant 64 : i32
    %418 = vector.broadcast %c64_i32_240 : i32 to vector<2x128xi32>
    %419 = arith.cmpi sge, %417, %418 : vector<2x128xi32>
    %c96_i32_241 = arith.constant 96 : i32
    %420 = vector.broadcast %c96_i32_241 : i32 to vector<2x128xi32>
    %421 = arith.cmpi slt, %417, %420 : vector<2x128xi32>
    %422 = arith.andi %419, %421 : vector<2x128xi1>
    %423 = math.tanh %416 : vector<2x128xf32>
    %424 = arith.negf %416 : vector<2x128xf32>
    %425 = math.exp %424 : vector<2x128xf32>
    %cst_242 = arith.constant 1.000000e+00 : f32
    %426 = vector.broadcast %cst_242 : f32 to vector<2x128xf32>
    %427 = arith.addf %426, %425 : vector<2x128xf32>
    %428 = arith.divf %426, %427 : vector<2x128xf32>
    %429 = arith.select %422, %423, %428 : vector<2x128xi1>, vector<2x128xf32>
    %430 = vector.extract_strided_slice %429 {offsets = [0, 0], sizes = [2, 32], strides = [1, 1]} : vector<2x128xf32> to vector<2x32xf32>
    %431 = vector.extract_strided_slice %429 {offsets = [0, 32], sizes = [2, 32], strides = [1, 1]} : vector<2x128xf32> to vector<2x32xf32>
    %432 = vector.extract_strided_slice %429 {offsets = [0, 64], sizes = [2, 32], strides = [1, 1]} : vector<2x128xf32> to vector<2x32xf32>
    %433 = vector.extract_strided_slice %429 {offsets = [0, 96], sizes = [2, 32], strides = [1, 1]} : vector<2x128xf32> to vector<2x32xf32>
    %434 = arith.mulf %431, %403 : vector<2x32xf32>
    %435 = arith.mulf %430, %432 : vector<2x32xf32>
    %436 = arith.addf %434, %435 : vector<2x32xf32>
    %437 = math.tanh %436 : vector<2x32xf32>
    %438 = arith.mulf %433, %437 : vector<2x32xf32>
    %c0_243 = arith.constant 0 : index
    %c0_244 = arith.constant 0 : index
    %439 = vector.load %arg10[%c0_243, %c0_244] : memref<1x128xf32, #tpu.memory_space<vmem>>, vector<1x128xf32>
    %c0_245 = arith.constant 0 : index
    %c0_246 = arith.constant 0 : index
    %440 = vector.load %arg8[%c0_245, %c0_246] : memref<32x128xf32, #tpu.memory_space<vmem>>, vector<32x128xf32>
    %cst_247 = arith.constant dense<0.000000e+00> : vector<2x128xf32>
    %441 = tpu.matmul %438, %440, %cst_247 {dimension_numbers = #tpu.dot_dimension_numbers<[1], [0], [0], [1], [0, 0, 1, 1], [], []>} : vector<2x32xf32>, vector<32x128xf32>, vector<2x128xf32> -> vector<2x128xf32>
    %442 = vector.broadcast %439 : vector<1x128xf32> to vector<2x128xf32>
    %443 = arith.addf %442, %441 : vector<2x128xf32>
    %c0_248 = arith.constant 0 : index
    %c0_249 = arith.constant 0 : index
    %444 = vector.load %arg9[%c0_248, %c0_249] : memref<32x128xf32, #tpu.memory_space<vmem>>, vector<32x128xf32>
    %cst_250 = arith.constant dense<0.000000e+00> : vector<2x128xf32>
    %445 = tpu.matmul %405, %444, %cst_250 {dimension_numbers = #tpu.dot_dimension_numbers<[1], [0], [0], [1], [0, 0, 1, 1], [], []>} : vector<2x32xf32>, vector<32x128xf32>, vector<2x128xf32> -> vector<2x128xf32>
    %446 = arith.addf %443, %445 : vector<2x128xf32>
    %447 = tpu.iota {dimensions = array<i32: 1>} : vector<2x128xi32>
    %c64_i32_251 = arith.constant 64 : i32
    %448 = vector.broadcast %c64_i32_251 : i32 to vector<2x128xi32>
    %449 = arith.cmpi sge, %447, %448 : vector<2x128xi32>
    %c96_i32_252 = arith.constant 96 : i32
    %450 = vector.broadcast %c96_i32_252 : i32 to vector<2x128xi32>
    %451 = arith.cmpi slt, %447, %450 : vector<2x128xi32>
    %452 = arith.andi %449, %451 : vector<2x128xi1>
    %453 = math.tanh %446 : vector<2x128xf32>
    %454 = arith.negf %446 : vector<2x128xf32>
    %455 = math.exp %454 : vector<2x128xf32>
    %cst_253 = arith.constant 1.000000e+00 : f32
    %456 = vector.broadcast %cst_253 : f32 to vector<2x128xf32>
    %457 = arith.addf %456, %455 : vector<2x128xf32>
    %458 = arith.divf %456, %457 : vector<2x128xf32>
    %459 = arith.select %452, %453, %458 : vector<2x128xi1>, vector<2x128xf32>
    %460 = vector.extract_strided_slice %459 {offsets = [0, 0], sizes = [2, 32], strides = [1, 1]} : vector<2x128xf32> to vector<2x32xf32>
    %461 = vector.extract_strided_slice %459 {offsets = [0, 32], sizes = [2, 32], strides = [1, 1]} : vector<2x128xf32> to vector<2x32xf32>
    %462 = vector.extract_strided_slice %459 {offsets = [0, 64], sizes = [2, 32], strides = [1, 1]} : vector<2x128xf32> to vector<2x32xf32>
    %463 = vector.extract_strided_slice %459 {offsets = [0, 96], sizes = [2, 32], strides = [1, 1]} : vector<2x128xf32> to vector<2x32xf32>
    %464 = arith.mulf %461, %407 : vector<2x32xf32>
    %465 = arith.mulf %460, %462 : vector<2x32xf32>
    %466 = arith.addf %464, %465 : vector<2x32xf32>
    %467 = math.tanh %466 : vector<2x32xf32>
    %468 = arith.mulf %463, %467 : vector<2x32xf32>
    %c0_254 = arith.constant 0 : index
    %c0_255 = arith.constant 0 : index
    %469 = vector.load %arg11[%c0_254, %c0_255] : memref<32x32xf32, #tpu.memory_space<vmem>>, vector<32x32xf32>
    %cst_256 = arith.constant dense<0.000000e+00> : vector<2x32xf32>
    %470 = tpu.matmul %468, %469, %cst_256 {dimension_numbers = #tpu.dot_dimension_numbers<[1], [0], [0], [1], [0, 0, 1, 1], [], []>} : vector<2x32xf32>, vector<32x32xf32>, vector<2x32xf32> -> vector<2x32xf32>
    %c0_257 = arith.constant 0 : index
    %c0_258 = arith.constant 0 : index
    %c0_259 = arith.constant 0 : index
    %471 = vector.load %arg2[%c0_257, %c0_258, %c0_259] : memref<2x128x32xf32, #tpu.memory_space<vmem>>, vector<2x128x32xf32>
    %472 = vector.shape_cast %470 : vector<2x32xf32> to vector<2x1x32xf32>
    %473 = vector.broadcast %472 : vector<2x1x32xf32> to vector<2x128x32xf32>
    %474 = arith.mulf %473, %471 : vector<2x128x32xf32>
    %cst_260 = arith.constant dense<0.000000e+00> : vector<2x128xf32>
    %475 = vector.multi_reduction <add>, %474, %cst_260 [2] : vector<2x128x32xf32> to vector<2x128xf32>
    %476 = tpu.iota {dimensions = array<i32: 1>} : vector<2x128xi32>
    %c8_i32_261 = arith.constant 8 : i32
    %477 = vector.broadcast %c8_i32_261 : i32 to vector<2x128xi32>
    %478 = arith.cmpi slt, %476, %477 : vector<2x128xi32>
    %cst_262 = arith.constant -1.000000e+30 : f32
    %479 = vector.broadcast %cst_262 : f32 to vector<2x128xf32>
    %480 = arith.select %478, %475, %479 : vector<2x128xi1>, vector<2x128xf32>
    %cst_263 = arith.constant dense<0xFF800000> : vector<2xf32>
    %481 = vector.multi_reduction <maximumf>, %480, %cst_263 [1] : vector<2x128xf32> to vector<2xf32>
    %482 = vector.shape_cast %481 : vector<2xf32> to vector<2x1xf32>
    %483 = vector.broadcast %482 : vector<2x1xf32> to vector<2x128xf32>
    %484 = arith.subf %480, %483 : vector<2x128xf32>
    %485 = math.exp %484 : vector<2x128xf32>
    %cst_264 = arith.constant dense<0.000000e+00> : vector<2xf32>
    %486 = vector.multi_reduction <add>, %485, %cst_264 [1] : vector<2x128xf32> to vector<2xf32>
    %487 = vector.shape_cast %486 : vector<2xf32> to vector<2x1xf32>
    %488 = tpu.reciprocal %487 : vector<2x1xf32> -> vector<2x1xf32>
    %489 = vector.broadcast %488 : vector<2x1xf32> to vector<2x128xf32>
    %490 = arith.mulf %485, %489 : vector<2x128xf32>
    %491 = vector.shape_cast %490 : vector<2x128xf32> to vector<2x128x1xf32>
    %492 = vector.broadcast %491 : vector<2x128x1xf32> to vector<2x128x32xf32>
    %493 = arith.mulf %492, %471 : vector<2x128x32xf32>
    %cst_265 = arith.constant dense<0.000000e+00> : vector<2x32xf32>
    %494 = vector.multi_reduction <add>, %493, %cst_265 [1] : vector<2x128x32xf32> to vector<2x32xf32>
    %c0_266 = arith.constant 0 : index
    %c0_267 = arith.constant 0 : index
    %495 = vector.load %arg12[%c0_266, %c0_267] : memref<32x32xf32, #tpu.memory_space<vmem>>, vector<32x32xf32>
    %cst_268 = arith.constant dense<0.000000e+00> : vector<2x32xf32>
    %496 = tpu.matmul %494, %495, %cst_268 {dimension_numbers = #tpu.dot_dimension_numbers<[1], [0], [0], [1], [0, 0, 1, 1], [], []>} : vector<2x32xf32>, vector<32x32xf32>, vector<2x32xf32> -> vector<2x32xf32>
    %c0_269 = arith.constant 0 : index
    %c0_270 = arith.constant 0 : index
    %497 = vector.load %arg13[%c0_269, %c0_270] : memref<32x32xf32, #tpu.memory_space<vmem>>, vector<32x32xf32>
    %cst_271 = arith.constant dense<0.000000e+00> : vector<2x32xf32>
    %498 = tpu.matmul %468, %497, %cst_271 {dimension_numbers = #tpu.dot_dimension_numbers<[1], [0], [0], [1], [0, 0, 1, 1], [], []>} : vector<2x32xf32>, vector<32x32xf32>, vector<2x32xf32> -> vector<2x32xf32>
    %499 = arith.addf %496, %498 : vector<2x32xf32>
    %500 = math.tanh %499 : vector<2x32xf32>
    %501 = arith.index_cast %c3_i32 : i32 to index
    %c0_272 = arith.constant 0 : index
    %c0_273 = arith.constant 0 : index
    %502 = vector.load %arg14[%501, %c0_272, %c0_273] : memref<4x2x32xf32, #tpu.memory_space<vmem>>, vector<1x2x32xf32>
    %503 = vector.shape_cast %502 : vector<1x2x32xf32> to vector<2x32xf32>
    %504 = vector.shape_cast %500 : vector<2x32xf32> to vector<1x2x32xf32>
    tpu.vector_store %arg14[%501, %c0_272, %c0_273], %504 {strides = array<i32>} : memref<4x2x32xf32, #tpu.memory_space<vmem>>, vector<1x2x32xf32>,
    %505 = arith.index_cast %c3_i32 : i32 to index
    %c0_274 = arith.constant 0 : index
    %c0_275 = arith.constant 0 : index
    %506 = vector.load %arg15[%505, %c0_274, %c0_275] : memref<4x2x128xf32, #tpu.memory_space<vmem>>, vector<1x2x128xf32>
    %507 = vector.shape_cast %506 : vector<1x2x128xf32> to vector<2x128xf32>
    %508 = vector.shape_cast %490 : vector<2x128xf32> to vector<1x2x128xf32>
    tpu.vector_store %arg15[%505, %c0_274, %c0_275], %508 {strides = array<i32>} : memref<4x2x128xf32, #tpu.memory_space<vmem>>, vector<1x2x128xf32>,
    %509 = arith.select %398, %438, %401 : vector<2x32xf32>
    %c0_276 = arith.constant 0 : index
    %c0_277 = arith.constant 0 : index
    %c0_278 = arith.constant 0 : index
    %510 = vector.load %arg18[%c0_276, %c0_277, %c0_278] : memref<2x2x32xf32, #tpu.memory_space<vmem>>, vector<1x2x32xf32>
    %511 = vector.shape_cast %510 : vector<1x2x32xf32> to vector<2x32xf32>
    %512 = vector.shape_cast %509 : vector<2x32xf32> to vector<1x2x32xf32>
    tpu.vector_store %arg18[%c0_276, %c0_277, %c0_278], %512 {strides = array<i32>} : memref<2x2x32xf32, #tpu.memory_space<vmem>>, vector<1x2x32xf32>,
    %513 = arith.select %398, %436, %403 : vector<2x32xf32>
    %c0_279 = arith.constant 0 : index
    %c0_280 = arith.constant 0 : index
    %c0_281 = arith.constant 0 : index
    %514 = vector.load %arg19[%c0_279, %c0_280, %c0_281] : memref<2x2x32xf32, #tpu.memory_space<vmem>>, vector<1x2x32xf32>
    %515 = vector.shape_cast %514 : vector<1x2x32xf32> to vector<2x32xf32>
    %516 = vector.shape_cast %513 : vector<2x32xf32> to vector<1x2x32xf32>
    tpu.vector_store %arg19[%c0_279, %c0_280, %c0_281], %516 {strides = array<i32>} : memref<2x2x32xf32, #tpu.memory_space<vmem>>, vector<1x2x32xf32>,
    %517 = arith.select %398, %468, %405 : vector<2x32xf32>
    %c1_282 = arith.constant 1 : index
    %c0_283 = arith.constant 0 : index
    %c0_284 = arith.constant 0 : index
    %518 = vector.load %arg18[%c1_282, %c0_283, %c0_284] : memref<2x2x32xf32, #tpu.memory_space<vmem>>, vector<1x2x32xf32>
    %519 = vector.shape_cast %518 : vector<1x2x32xf32> to vector<2x32xf32>
    %520 = vector.shape_cast %517 : vector<2x32xf32> to vector<1x2x32xf32>
    tpu.vector_store %arg18[%c1_282, %c0_283, %c0_284], %520 {strides = array<i32>} : memref<2x2x32xf32, #tpu.memory_space<vmem>>, vector<1x2x32xf32>,
    %521 = arith.select %398, %466, %407 : vector<2x32xf32>
    %c1_285 = arith.constant 1 : index
    %c0_286 = arith.constant 0 : index
    %c0_287 = arith.constant 0 : index
    %522 = vector.load %arg19[%c1_285, %c0_286, %c0_287] : memref<2x2x32xf32, #tpu.memory_space<vmem>>, vector<1x2x32xf32>
    %523 = vector.shape_cast %522 : vector<1x2x32xf32> to vector<2x32xf32>
    %524 = vector.shape_cast %521 : vector<2x32xf32> to vector<1x2x32xf32>
    tpu.vector_store %arg19[%c1_285, %c0_286, %c0_287], %524 {strides = array<i32>} : memref<2x2x32xf32, #tpu.memory_space<vmem>>, vector<1x2x32xf32>,
    %525 = arith.select %398, %500, %399 : vector<2x32xf32>
    %c0_288 = arith.constant 0 : index
    %c0_289 = arith.constant 0 : index
    %526 = vector.load %arg20[%c0_288, %c0_289] : memref<2x32xf32, #tpu.memory_space<vmem>>, vector<2x32xf32>
    tpu.vector_store %arg20[%c0_288, %c0_289], %525 {strides = array<i32>} : memref<2x32xf32, #tpu.memory_space<vmem>>, vector<2x32xf32>,
    %c4_i32_290 = arith.constant 4 : i32
    %c1_i32_291 = arith.constant 1 : i32
    %527 = arith.cmpi eq, %arg0, %c1_i32_291 : i32
    %528 = arith.extui %527 : i1 to i32
    %c0_i32_292 = arith.constant 0 : i32
    %529 = arith.cmpi ne, %528, %c0_i32_292 : i32
    scf.if %529 {
      %c0_293 = arith.constant 0 : index
      %c0_294 = arith.constant 0 : index
      %c0_295 = arith.constant 0 : index
      %530 = vector.load %arg18[%c0_293, %c0_294, %c0_295] : memref<2x2x32xf32, #tpu.memory_space<vmem>>, vector<2x2x32xf32>
      %c0_296 = arith.constant 0 : index
      %c0_297 = arith.constant 0 : index
      %c0_298 = arith.constant 0 : index
      %531 = vector.load %arg16[%c0_296, %c0_297, %c0_298] : memref<2x2x32xf32, #tpu.memory_space<vmem>>, vector<2x2x32xf32>
      tpu.vector_store %arg16[%c0_296, %c0_297, %c0_298], %530 {strides = array<i32>} : memref<2x2x32xf32, #tpu.memory_space<vmem>>, vector<2x2x32xf32>,
      %c0_299 = arith.constant 0 : index
      %c0_300 = arith.constant 0 : index
      %c0_301 = arith.constant 0 : index
      %532 = vector.load %arg19[%c0_299, %c0_300, %c0_301] : memref<2x2x32xf32, #tpu.memory_space<vmem>>, vector<2x2x32xf32>
      %c0_302 = arith.constant 0 : index
      %c0_303 = arith.constant 0 : index
      %c0_304 = arith.constant 0 : index
      %533 = vector.load %arg17[%c0_302, %c0_303, %c0_304] : memref<2x2x32xf32, #tpu.memory_space<vmem>>, vector<2x2x32xf32>
      tpu.vector_store %arg17[%c0_302, %c0_303, %c0_304], %532 {strides = array<i32>} : memref<2x2x32xf32, #tpu.memory_space<vmem>>, vector<2x2x32xf32>,
    } else {
    }
    return
  }
  func.func @transform_0(%arg0: i32) -> (i32, i32, i32) {
    %c0_i32 = arith.constant 0 : i32
    %c0_i32_0 = arith.constant 0 : i32
    %c0_i32_1 = arith.constant 0 : i32
    return %arg0, %c0_i32, %c0_i32_0 : i32, i32, i32
  }
  func.func @transform_1(%arg0: i32) -> (i32, i32, i32) {
    %c0_i32 = arith.constant 0 : i32
    %c0_i32_0 = arith.constant 0 : i32
    %c0_i32_1 = arith.constant 0 : i32
    %c0_i32_2 = arith.constant 0 : i32
    return %c0_i32, %c0_i32_0, %c0_i32_1 : i32, i32, i32
  }
  func.func @transform_2(%arg0: i32) -> (i32, i32, i32) {
    %c0_i32 = arith.constant 0 : i32
    %c0_i32_0 = arith.constant 0 : i32
    %c0_i32_1 = arith.constant 0 : i32
    %c0_i32_2 = arith.constant 0 : i32
    return %c0_i32, %c0_i32_0, %c0_i32_1 : i32, i32, i32
  }
  func.func @transform_3(%arg0: i32) -> (i32, i32, i32) {
    %c0_i32 = arith.constant 0 : i32
    %c0_i32_0 = arith.constant 0 : i32
    %c0_i32_1 = arith.constant 0 : i32
    %c0_i32_2 = arith.constant 0 : i32
    return %c0_i32, %c0_i32_0, %c0_i32_1 : i32, i32, i32
  }
  func.func @transform_4(%arg0: i32) -> (i32, i32) {
    %c0_i32 = arith.constant 0 : i32
    %c0_i32_0 = arith.constant 0 : i32
    %c0_i32_1 = arith.constant 0 : i32
    return %c0_i32, %c0_i32_0 : i32, i32
  }
  func.func @transform_5(%arg0: i32) -> (i32, i32) {
    %c0_i32 = arith.constant 0 : i32
    %c0_i32_0 = arith.constant 0 : i32
    %c0_i32_1 = arith.constant 0 : i32
    return %c0_i32, %c0_i32_0 : i32, i32
  }
  func.func @transform_6(%arg0: i32) -> (i32, i32) {
    %c0_i32 = arith.constant 0 : i32
    %c0_i32_0 = arith.constant 0 : i32
    %c0_i32_1 = arith.constant 0 : i32
    return %c0_i32, %c0_i32_0 : i32, i32
  }
  func.func @transform_7(%arg0: i32) -> (i32, i32) {
    %c0_i32 = arith.constant 0 : i32
    %c0_i32_0 = arith.constant 0 : i32
    %c0_i32_1 = arith.constant 0 : i32
    return %c0_i32, %c0_i32_0 : i32, i32
  }
  func.func @transform_8(%arg0: i32) -> (i32, i32) {
    %c0_i32 = arith.constant 0 : i32
    %c0_i32_0 = arith.constant 0 : i32
    %c0_i32_1 = arith.constant 0 : i32
    return %c0_i32, %c0_i32_0 : i32, i32
  }
  func.func @transform_9(%arg0: i32) -> (i32, i32) {
    %c0_i32 = arith.constant 0 : i32
    %c0_i32_0 = arith.constant 0 : i32
    %c0_i32_1 = arith.constant 0 : i32
    return %c0_i32, %c0_i32_0 : i32, i32
  }
  func.func @transform_10(%arg0: i32) -> (i32, i32) {
    %c0_i32 = arith.constant 0 : i32
    %c0_i32_0 = arith.constant 0 : i32
    %c0_i32_1 = arith.constant 0 : i32
    return %c0_i32, %c0_i32_0 : i32, i32
  }
  func.func @transform_11(%arg0: i32) -> (i32, i32) {
    %c0_i32 = arith.constant 0 : i32
    %c0_i32_0 = arith.constant 0 : i32
    %c0_i32_1 = arith.constant 0 : i32
    return %c0_i32, %c0_i32_0 : i32, i32
  }
  func.func @transform_12(%arg0: i32) -> (i32, i32) {
    %c0_i32 = arith.constant 0 : i32
    %c0_i32_0 = arith.constant 0 : i32
    %c0_i32_1 = arith.constant 0 : i32
    return %c0_i32, %c0_i32_0 : i32, i32
  }
  func.func @transform_13(%arg0: i32) -> (i32, i32, i32) {
    %c0_i32 = arith.constant 0 : i32
    %c0_i32_0 = arith.constant 0 : i32
    %c0_i32_1 = arith.constant 0 : i32
    return %arg0, %c0_i32, %c0_i32_0 : i32, i32, i32
  }
  func.func @transform_14(%arg0: i32) -> (i32, i32, i32) {
    %c0_i32 = arith.constant 0 : i32
    %c0_i32_0 = arith.constant 0 : i32
    %c0_i32_1 = arith.constant 0 : i32
    return %arg0, %c0_i32, %c0_i32_0 : i32, i32, i32
  }
  func.func @transform_15(%arg0: i32) -> (i32, i32, i32) {
    %c0_i32 = arith.constant 0 : i32
    %c0_i32_0 = arith.constant 0 : i32
    %c0_i32_1 = arith.constant 0 : i32
    %c0_i32_2 = arith.constant 0 : i32
    return %c0_i32, %c0_i32_0, %c0_i32_1 : i32, i32, i32
  }
  func.func @transform_16(%arg0: i32) -> (i32, i32, i32) {
    %c0_i32 = arith.constant 0 : i32
    %c0_i32_0 = arith.constant 0 : i32
    %c0_i32_1 = arith.constant 0 : i32
    %c0_i32_2 = arith.constant 0 : i32
    return %c0_i32, %c0_i32_0, %c0_i32_1 : i32, i32, i32
  }
}

</mosaic_0001>

<bundles_post_ra>
// kernel: tpu_custom_call.1
= control target key start
LH: loop header
LB: loop body
LE: loop exit
PB: predicated region body
PF: predicated region fallthrough
CT: control target
= control target key end

     0   :  { %s9728_s0 = inlined_call_operand.vmem [shape: f32[8,2,128], index: 0, kind: input, shape index: {}]   ;;  %s9729_s1 = inlined_call_operand.vmem [shape: f32[2,128,32], index: 1, kind: input, shape index: {}]   ;;  %s9730_s2 = inlined_call_operand.vmem [shape: f32[2,2,32], index: 2, kind: input, shape index: {}]   ;;  %s9731_s3 = inlined_call_operand.vmem [shape: f32[2,2,32], index: 3, kind: input, shape index: {}]   ;;  %s9732_s4 = inlined_call_operand.vmem [shape: f32[2,32], index: 4, kind: input, shape index: {}]   ;;  %s9733_s5 = inlined_call_operand.vmem [shape: f32[32,128], index: 5, kind: input, shape index: {}]   ;;  %s9734_s6 = inlined_call_operand.vmem [shape: f32[32,128], index: 6, kind: input, shape index: {}]   ;;  %s9735_s7 = inlined_call_operand.vmem [shape: f32[32,128], index: 7, kind: input, shape index: {}]   ;;  %s9736_s8 = inlined_call_operand.vmem [shape: f32[32,128], index: 8, kind: input, shape index: {}]   ;;  %s9737_s9 = inlined_call_operand.vmem [shape: f32[1,128], index: 9, kind: input, shape index: {}]   ;;  %s9738_s10 = inlined_call_operand.vmem [shape: f32[32,32], index: 10, kind: input, shape index: {}]   ;;  %s9739_s11 = inlined_call_operand.vmem [shape: f32[32,32], index: 11, kind: input, shape index: {}]   ;;  %s9740_s12 = inlined_call_operand.vmem [shape: f32[32,32], index: 12, kind: input, shape index: {}]   ;;  %s9741_s13 = inlined_call_operand.hbm [shape: f32[8,2,32], index: 13, kind: output, shape index: {0}]   ;;  %s9742_s14 = inlined_call_operand.hbm [shape: f32[8,2,128], index: 14, kind: output, shape index: {1}]   ;;  %s9743_s15 = inlined_call_operand.hbm [shape: f32[2,2,32], index: 15, kind: output, shape index: {2}]   ;;  %s9744_s16 = inlined_call_operand.hbm [shape: f32[2,2,32], index: 16, kind: output, shape index: {3}]  }
   0x1   :  { %9913 = sst [smem:[#allocation59_spill]] %s9728_s0 }
   0x2   :  { %9914 = sst [smem:[#allocation60_spill]] %s9730_s2 }
   0x3   :  { %9915 = sst [smem:[#allocation61_spill]] %s9743_s15 }
   0x4   :  { %9916 = sst [smem:[#allocation62_spill]] %s9744_s16 }
   0x5   :  { %22 = vsyncpa [#allocation6], 0 }
   0x6   :  { %24 = vsyncpa [#allocation6 + $0x1], 0 }
   0x7   :  { %25 = vsyncpa [#allocation8], 0 }
   0x8   :  { %27 = vsyncpa [#allocation8 + $0x1], 0 }
   0x9   :  { %28 = vsyncpa [#allocation11], 0  ;;  %s6886_s21 = smov 0   ;;  %s6888_s22 = smov 0  }
   0xa   :  { %s6890_s23 = smov 0   ;;  %s6892_s24 = smov 0  }
   0xb LB: > { %9917 = sst [smem:[#allocation16_spill]] %s6776_s21  ;;  %s6907_s25 = sadd.s32 4294967295, %s6788_s24   ;;  %s6788_s24 = sphi %s6892_s24, %s10272_s24   ;;  %s6784_s23 = sphi %s6890_s23, %s10274_s23   ;;  %s6780_s22 = sphi %s6888_s22, %s10276_s22   ;;  %s6776_s21 = sphi %s6886_s21, %s10275_s21  }
   0xc   : > { %9918 = sst [smem:[#allocation17_spill]] %s6784_s23  ;;  %s9745_s26 = sadd.s32 4294967294, %s6788_s24  }
   0xd   : > { %9919 = sst [smem:[#allocation18_spill]] %s6788_s24  ;;  %s6911_s27 = sadd.s32 1, %s6788_s24  }
   0xe   : > { %9920 = sst [smem:[#allocation19_spill]] %s6911_s27  ;;  %s319_s28 = sadd.s32 1, %s6784_s23 }
   0xf   : > { %s316_s29 = ssub.s32 %s6788_s24, %s6911_s27  ;;  %p329_p0 = scmp.ne.s32.totalorder %s6784_s23, %s6780_s22 }
  0x10   : > { %p317_p1 = scmp.eq.s32.totalorder %s316_s29, 0  ;;  %p330_p2 = scmp.eq.s32.totalorder %s6907_s25, 1 }
  0x11   : > { %p335_p3 = scmp.ne.s32.totalorder %s6780_s22, %s6776_s21  ;;  %p336_p4 = scmp.eq.s32.totalorder %s9745_s26, 1 }
  0x12   : > { %s6924_s30 = scalar_select %p317_p1, %s6784_s23, %s319_s28  }
  0x13   : > { %p6928_p5 = por %p330_p2, %p329_p0  ;;  %p6932_p6 = por %p336_p4, %p335_p3 }
  0x14   : > { %9921 = sst [smem:[#allocation20_spill]] %s6924_s30  ;;  %p5963_p7 = scmp.ge.s32.totalorder %s6788_s24, 1 }
  0x15   : > { %s9923_s17 = scalar_select %p6932_p6, 1, 0 }
  0x16   : > { %p467_p8 = scmp.lt.s32.totalorder %s6788_s24, 3 }
  0x17   : > { %9924 = sst [smem:[#allocation21_spill]] %s9923_s17 }
  0x18   : > { %p468_p9 = pnand %p5963_p7, %p467_p8 }
  0x1a   : > { %471 = sbr.rel (%p468_p9) target bundleno = 10366 (0x287e), region = 72 }
  0x1f   : > { %s9753_s18 = sand.u32 1, %s6780_s22   ;;  %s6940_s19 = sshll.u32 %s6907_s25, 2 }
  0x20   : > { %s5964_s20 = sshll.u32 %s9753_s18, 3  ;;  %p523_p10 = scmp.lt.s32.totalorder %s6940_s19, 7 }
  0x21   : > { %s9925_s23 = sld [smem:[#allocation59_spill]]  ;;  %s6951_s17 = scalar_lea.vmem [#allocation5], %s5964_s20 }
  0x22   : > { %s524_s28 = scalar_select %p523_p10, %s6940_s19, 7 }
  0x23   : > { %s6953_s21 = scalar_lea.vmem [#allocation7], %s5964_s20  ;;  %p5968_p11 = scmp.ne.s32.totalorder %s6907_s25, 0 }
  0x24   : > { %s5967_s29 = sshll.u32 %s524_s28, 1  ;;  %s9926_s2 = sld [smem:[#allocation60_spill]] (!%p5968_p11) }
  0x25   : > { %533 = sbr.rel (%p5968_p11) target bundleno = 46 (0x2e), region = 76 }
  0x27   : > { %s6949_s27 = scalar_lea.vmem %s9925_s23, %s5967_s29 }
  0x2a   : > { %v534_v0 = vld [vmem:[%s9926_s2] sm:$0x3]  ;;  %vm536_vm0 = vcmask 254976   ;;  %v535_v1 = vld [vmem:[%s9926_s2 + $0x2] sm:$0x3] }
  0x2b   : > { %537 = vst.msk [vmem:[#allocation2] sm:$0x3] %vm536_vm0, %v534_v0  ;;  %538 = vst.msk [vmem:[#allocation2 + $0x2] sm:$0x3] %vm536_vm0, %v535_v1  ;;  %v539_v2 = vld [vmem:[%s9731_s3] sm:$0x3] }
  0x2c   : > { %v540_v3 = vld [vmem:[%s9731_s3 + $0x2] sm:$0x3]  ;;  %v543_v4 = vld [vmem:[%s9732_s4] sm:$0x3]  ;;  %541 = vst.msk [vmem:[#allocation3] sm:$0x3] %vm536_vm0, %v539_v2 }
  0x2d   : > { %542 = vst.msk [vmem:[#allocation3 + $0x2] sm:$0x3] %vm536_vm0, %v540_v3  ;;  %544 = vst.msk [vmem:[#allocation4] sm:$0x3] %vm536_vm0, %v543_v4 }
  0x2e PF: > { %v558_v5 = vld [vmem:[%s9733_s5 + $0x18] sm:$0xff]  ;;  %v9754_v7 = vmov 0.0   ;;  %v557_v8 = vld [vmem:[%s9733_s5 + $0x10] sm:$0xff]  ;;  %v556_v10 = vld [vmem:[%s9733_s5 + $0x8] sm:$0xff]  ;;  %vm559_vm1 = vcmask 261120   ;;  %vm6791_vm2 = vmmov 0   ;;  %v712_v26 = vlaneseq }
  0x2f   : > { %v637_v6 = vld [vmem:[%s9734_s6 + $0x18] sm:$0xff]  ;;  %6174 = vmatprep.subr.mxu0 %v9754_v7  ;;  %6185 = vmatprep.subr.mxu1 %v9754_v7  ;;  %v636_v9 = vld [vmem:[%s9734_s6 + $0x10] sm:$0xff]  ;;  %v635_v11 = vld [vmem:[%s9734_s6 + $0x8] sm:$0xff]  ;;  %v9927_v28 = vmov 0  ;;  %s9797_s30 = smov 64   ;;  %s9842_s20 = smov 32  }
  0x30   : > { %6175 = vmatpush3.msra.mxu0 %v558_v5  ;;  %6186 = vmatpush3.msra.mxu1 %v637_v6  ;;  %v555_v12 = vld [vmem:[%s9733_s5] sm:$0xff]  ;;  %v7020_v27 = vand.u32 127, %v712_v26  ;;  %v750_v39 = vld [vmem:[%s9735_s7 + $0x18] sm:$0xff]  ;;  %v749_v41 = vld [vmem:[%s9735_s7 + $0x10] sm:$0xff]  ;;  %vm1254_vm6 = vcmask 130112   ;;  %vm1261_vm7 = vcmask 195712  }
  0x31   : > { %6176 = vmatprep.subr.mxu0 %v9754_v7  ;;  %6187 = vmatprep.subr.mxu1 %v9754_v7  ;;  %v634_v13 = vld [vmem:[%s9734_s6] sm:$0xff]  ;;  %v836_v40 = vld [vmem:[%s9736_s8 + $0x18] sm:$0xff]  ;;  %v835_v42 = vld [vmem:[%s9736_s8 + $0x10] sm:$0xff]  ;;  %vm9841_vm8 = vcmask 261312   ;;  %vm9839_vm9 = vcmask 326912   ;;  %vm9837_vm10 = vcmask 392512  }
  0x32   : > { %6177 = vmatpush3.msra.mxu0 %v557_v8  ;;  %6188 = vmatpush3.msra.mxu1 %v636_v9  ;;  %v7003_v15 = vld [vmem:[#allocation2] sm:$0x3]  ;;  %vm714_vm3 = vcmp.ge.s32.totalorder %v7020_v27, 64  ;;  %vm715_vm4 = vcmp.lt.s32.totalorder %v7020_v27, 96  ;;  %v748_v43 = vld [vmem:[%s9735_s7 + $0x8] sm:$0xff]  ;;  %v943_v9 = vld [vmem:[%s9738_s10 + $0x18] sm:$0xff] }
  0x33   : > { %6178 = vmatprep.subr.mxu0 %v9754_v7  ;;  %6189 = vmatprep.subr.mxu1 %v9754_v7  ;;  %v554_v16 = vld [vmem:[%s6949_s27] sm:$0x3]  ;;  %vm7024_vm5 = vmand %vm714_vm3, %vm715_vm4  ;;  %v549_v32 = vld [vmem:[#allocation3] sm:$0x3]  ;;  %vm9838_vm11 = vcmask 458112   ;;  %vm9840_vm12 = vcmask 523712  }
  0x34   : > { %6179 = vmatpush3.msra.mxu0 %v556_v10  ;;  %6190 = vmatpush3.msra.mxu1 %v635_v11  ;;  %v547_v14 = vld [vmem:[#allocation4] sm:$0x3]  ;;  %v9928_v28 = vsel %vm7024_vm5, 4294967295, %v9927_v28  ;;  %v747_v45 = vld [vmem:[%s9735_s7] sm:$0xff]  ;;  %v1696_v10 = vld [vmem:[%s9740_s12 + $0x18] sm:$0xff]  ;;  %vm9791_vm13 = vcmask 589312  }
  0x35   : > { %6180 = vmatprep.subr.mxu0 %v9754_v7  ;;  %6191 = vmatprep.subr.mxu1 %v9754_v7  ;;  %9929 = vst [vmem:[#allocation22_spill] sm:$0xff] %v9928_v28  ;;  %v834_v44 = vld [vmem:[%s9736_s8 + $0x8] sm:$0xff]  ;;  %v833_v46 = vld [vmem:[%s9736_s8] sm:$0xff]  ;;  %v942_v11 = vld [vmem:[%s9738_s10 + $0x10] sm:$0xff]  ;;  %v1249_v28 = vadd.s32 4294967288, %v7020_v27  ;;  %vm9792_vm14 = vcmask 654912  }
  0x36   : > { %6181 = vmatpush3.msra.mxu0 %v555_v12  ;;  %6182 = vmatprep.mubr.msk.f32.mxu0 %vm6791_vm2, %v9754_v7  ;;  %v551_v48 = vld [vmem:[#allocation2 + $0x2] sm:$0x3]  ;;  %v553_v51 = vld [vmem:[#allocation3 + $0x2] sm:$0x3]  ;;  %v5974_v55 = vld [vmem:[%s9737_s9] ss:$0 sm:$0xff] }
  0x37   : > { %6192 = vmatpush3.msra.mxu1 %v634_v13  ;;  %6193 = vmatprep.mubr.msk.f32.mxu1 %vm6791_vm2, %v9754_v7  ;;  %v1695_v12 = vld [vmem:[%s9740_s12 + $0x10] sm:$0xff]  ;;  %v941_v13 = vld [vmem:[%s9738_s10 + $0x8] sm:$0xff]  ;;  %vm9793_vm15 = vcmask 720512   ;;  %vm9794_vm0 = vcmask 786112   ;;  %vm9795_vm3 = vcmask 851712   ;;  %vm1338_vm4 = vcmask 917312  }
  0x38   : > { %6183 = vmatmul.mubr.msk.f32.vlgmr.msra.gmra.mxu0 %vm559_vm1, %v547_v14  ;;  %6194 = vmatmul.mubr.msk.f32.vlgmr.msra.gmra.mxu1 %vm559_vm1, %v7003_v15  ;;  %v1694_v14 = vld [vmem:[%s9740_s12 + $0x8] sm:$0xff]  ;;  %p546_p12 = scmp.lt.s32.totalorder %s6940_s19, 6  ;;  %s9800_s16 = smov 96  }
  0x39   : > { %6196 = vmatprep.subr.mxu0 %v9754_v7  ;;  %6207 = vmatprep.subr.mxu1 %v9754_v7  ;;  %s1881_s18 = sadd.s32 1, %s6940_s19  ;;  %s10043_s26 = smov 96  }
  0x3a   : > { %6204 = vmatprep.mubr.msk.f32.mxu0 %vm6791_vm2, %v9754_v7  ;;  %6215 = vmatprep.mubr.msk.f32.mxu1 %vm6791_vm2, %v9754_v7  ;;  %s1846_s15 = scalar_select %p546_p12, 1, 0 }
  0x3b   : > { %6197 = vmatpush3.msra.mxu0 %v750_v39  ;;  %6208 = vmatpush3.msra.mxu1 %v836_v40  ;;  %v7160_v40 = vld [vmem:[%s9729_s1] sm:$0xff]  ;;  %p1882_p13 = scmp.lt.s32.totalorder %s1881_s18, 6  ;;  %s3178_s2 = sadd.s32 2, %s6940_s19 }
  0x3c   : > { %6198 = vmatprep.subr.mxu0 %v9754_v7  ;;  %6209 = vmatprep.subr.mxu1 %v9754_v7  ;;  %p3179_p0 = scmp.lt.s32.totalorder %s3178_s2, 6  ;;  %s4475_s18 = sadd.s32 3, %s6940_s19 }
  0x3d   : > { %6199 = vmatpush3.msra.mxu0 %v749_v41  ;;  %6210 = vmatpush3.msra.mxu1 %v835_v42  ;;  %s3143_s23 = scalar_select %p1882_p13, 1, 0 }
  0x3e   : > { %6200 = vmatprep.subr.mxu0 %v9754_v7  ;;  %6211 = vmatprep.subr.mxu1 %v9754_v7  ;;  %p4476_p1 = scmp.lt.s32.totalorder %s4475_s18, 6  ;;  %p6019_p3 = scmp.ne.s32.totalorder %s6907_s25, 1 }
  0x3f   : > { %6201 = vmatpush3.msra.mxu0 %v748_v43  ;;  %6212 = vmatpush3.msra.mxu1 %v834_v44  ;;  %v7169_v43 = vld [vmem:[%s9729_s1 + $0x10] sm:$0xff]  ;;  %v7174_v44 = vld [vmem:[%s9729_s1 + $0x80] sm:$0xff] }
  0x40   : > { %6202 = vmatprep.subr.mxu0 %v9754_v7  ;;  %6213 = vmatprep.subr.mxu1 %v9754_v7 }
  0x41   : > { %6203 = vmatpush3.msra.mxu0 %v747_v45  ;;  %6214 = vmatpush3.msra.mxu1 %v833_v46 }
  0x42   : > { %6218 = vmatprep.subr.mxu0 %v9754_v7  ;;  %6229 = vmatprep.subr.mxu1 %v9754_v7 }
  0x43   : > { %6216 = vmatmul.mubr.msk.f32.vlgmr.msra.gmra.mxu1 %vm559_vm1, %v551_v48 }
  0x44   : > { %6237 = vmatprep.mubr.msk.f32.mxu1 %vm6791_vm2, %v9754_v7  ;;  %6230 = vmatpush3.msra.mxu1 %v1696_v10  ;;  %v7240_v10 = vld [vmem:[%s9729_s1 + $0x30] sm:$0xff] }
  0x45   : > { %6231 = vmatprep.subr.mxu1 %v9754_v7  ;;  %9937 = vst [vmem:[#allocation30_spill] sm:$0xff] %v7240_v10 }
  0x46   : > { %6232 = vmatpush3.msra.mxu1 %v1695_v12 }
  0x47   : > { %6233 = vmatprep.subr.mxu1 %v9754_v7 }
  0x48   : > { %6234 = vmatpush3.msra.mxu1 %v1694_v14 }
  0x49   : > { %6235 = vmatprep.subr.mxu1 %v9754_v7 }
  0xf8   : > { %v629_v17 = vpop.f32.mrf.mxu0  ;;  %v707_v18 = vpop.f32.mrf.mxu1 }
  0xf9   : > { %v633_v19 = vadd.f32 %v629_v17, %v554_v16  ;;  %v940_v16 = vld [vmem:[%s9738_s10] sm:$0xff] }
  0xfa   : > { %v6184_v20 = vpop.f32.mrf.mxu0  ;;  %v6195_v21 = vpop.f32.mrf.mxu1  ;;  %v1693_v17 = vld [vmem:[%s9740_s12] sm:$0xff] }
  0xfb   : > { %v711_v22 = vadd.f32 %v707_v18, %v633_v19  ;;  %6236 = vmatpush3.msra.mxu1 %v1693_v17  ;;  %v7256_v17 = vld [vmem:[%s9729_s1 + $0x38] sm:$0xff] }
  0xfc   : > { %6251 = vmatprep.subr.mxu1 %v9754_v7  ;;  %9939 = vst [vmem:[#allocation32_spill] sm:$0xff] %v7256_v17 }
  0xfd   : > { %v5972_v23 = vmul.f32 -1.442695, %v711_v22 }
  0xff   : > { %6547 = vpow2.f32 %v5972_v23 }
 0x100   : > { %6549 = vtanh.f32 %v711_v22  ;;  %v6794_v22 = vmov 1966171168  }
 0x101   : > { %v1053_v23 = vunpack.c.l.s4 %v6794_v22 }
 0x103   : > { %v906_v53 = vpop.f32.mrf.mxu1 }
 0x105   : > { %v6217_v54 = vpop.f32.mrf.mxu1 }
 0x106   : > { %v7197_v54 = vld [vmem:[%s9729_s1 + $0x88] sm:$0xff] }
 0x10c   : > { %v6548_v24 = vpop.eup %6547 }
 0x10d   : > { %v721_v25 = vadd.f32 1.0, %v6548_v24  ;;  %v6550_v29 = vpop.eup %6549  ;;  %v7140_v24 = vshrl.u32 %v712_v26, 7  ;;  %v7155_v26 = vld [vmem:[%s9729_s1 + $0x8] sm:$0xff] }
 0x10f   : > { %6551 = vrcp.f32 %v721_v25  ;;  %v1054_v25 = vunpack.c.0.s8 %v1053_v23 }
 0x11c   : > { %v6552_v30 = vpop.eup %6551 }
 0x11d   : > { %v724_v31 = vsel %vm7024_vm5, %v6550_v29, %v6552_v30  ;;  %v7143_v29 = vsub.s32 %v1054_v25, %v7140_v24  ;;  %v7272_v25 = vld [vmem:[%s9729_s1 + $0x40] sm:$0xff] }
 0x11e   : > { %731 = vrot.lane.b32.xlu0 %v724_v31, %s9797_s30  ;;  %9941 = vst [vmem:[#allocation34_spill] sm:$0xff] %v7272_v25 }
 0x11f   : > { %9934 = vst [vmem:[#allocation27_spill] sm:$0xff] %v7143_v29 }
 0x122   : > { %726 = vrot.lane.b32.xlu0 %v549_v32, %s9842_s20 }
 0x190   : > { %v732_v33 = vpop.permute.xlu0 %731 }
 0x191   : > { %v734_v34 = vmul.f32 %v732_v33, %v724_v31  ;;  %v7149_v33 = vsub.s32 0, %v7140_v24 }
 0x193   : > { %736 = vrot.lane.b32.xlu1 %v734_v34, %s9842_s20 }
 0x194   : > { %v7033_v35 = vpop.permute.xlu0 %726 }
 0x195   : > { %v729_v36 = vmul.f32 %v7033_v35, %v724_v31 }
 0x205   : > { %v737_v37 = vpop.permute.xlu1 %736 }
 0x206   : > { %v7036_v38 = vadd.f32 %v737_v37, %v729_v36 }
 0x208   : > { %6553 = vtanh.f32 %v7036_v38 }
 0x215   : > { %v6554_v47 = vpop.eup %6553 }
 0x216   : > { %742 = vrot.lane.b32.xlu1 %v6554_v47, %s9797_s30 }
 0x288   : > { %v743_v49 = vpop.permute.xlu1 %742 }
 0x289   : > { %v7075_v50 = vmul.f32 %v743_v49, %v724_v31 }
 0x28b   : > { %9930 = vst [vmem:[#allocation23_spill] sm:$0xff] %v7075_v50  ;;  %752 = vrot.lane.b32.xlu0 %v7075_v50, %s9842_s20  ;;  %v7464_v50 = vsub.s32 %v1249_v28, %v7140_v24  ;;  %v1305_v28 = vadd.s32 4294967224, %v7020_v27 }
 0x28f   : > { %920 = vrot.lane.b32.xlu0 %v553_v51, %s9842_s20 }
 0x2fd   : > { %v753_v52 = vpop.permute.xlu0 %752 }
 0x2fe   : > { %6205 = vmatmul.mubr.msk.f32.vlgmr.msra.gmra.mxu0 %vm559_vm1, %v753_v52 }
 0x2ff   : > { %6226 = vmatprep.mubr.msk.f32.mxu0 %vm6791_vm2, %v9754_v7  ;;  %6219 = vmatpush3.msra.mxu0 %v943_v9 }
 0x300   : > { %6220 = vmatprep.subr.mxu0 %v9754_v7 }
 0x301   : > { %v7090_v4 = vpop.permute.xlu0 %920  ;;  %6221 = vmatpush3.msra.mxu0 %v942_v11  ;;  %v7245_v11 = vld [vmem:[%s9729_s1 + $0xa0] sm:$0xff] }
 0x302   : > { %9931 = vst [vmem:[#allocation24_spill] sm:$0xff] %v7090_v4  ;;  %6222 = vmatprep.subr.mxu0 %v9754_v7  ;;  %9938 = vst [vmem:[#allocation31_spill] sm:$0xff] %v7245_v11 }
 0x303   : > { %6223 = vmatpush3.msra.mxu0 %v941_v13 }
 0x304   : > { %6224 = vmatprep.subr.mxu0 %v9754_v7 }
 0x305   : > { %6225 = vmatpush3.msra.mxu0 %v940_v16 }
 0x306   : > { %6240 = vmatprep.subr.mxu0 %v9754_v7 }
 0x3be   : > { %v822_v56 = vpop.f32.mrf.mxu0 }
 0x3bf   : > { %v832_v57 = vadd.f32 %v5974_v55, %v822_v56 }
 0x3c0   : > { %v6206_v58 = vpop.f32.mrf.mxu0 }
 0x3c1   : > { %v910_v59 = vadd.f32 %v906_v53, %v832_v57  ;;  %v7192_v53 = vld [vmem:[%s9729_s1 + $0x18] sm:$0xff] }
 0x3c3   : > { %v5976_v60 = vmul.f32 -1.442695, %v910_v59 }
 0x3c5   : > { %6555 = vpow2.f32 %v5976_v60  ;;  %v7213_v60 = vld [vmem:[%s9729_s1 + $0x90] sm:$0xff] }
 0x3c6   : > { %6557 = vtanh.f32 %v910_v59  ;;  %v7208_v59 = vld [vmem:[%s9729_s1 + $0x20] sm:$0xff] }
 0x3d2   : > { %v6556_v61 = vpop.eup %6555 }
 0x3d3   : > { %v915_v62 = vadd.f32 1.0, %v6556_v61  ;;  %v6558_v63 = vpop.eup %6557 }
 0x3d5   : > { %6559 = vrcp.f32 %v915_v62 }
 0x3e2   : > { %v6560_v0 = vpop.eup %6559 }
 0x3e3   : > { %v918_v1 = vsel %vm7024_vm5, %v6558_v63, %v6560_v0 }
 0x3e4   : > { %925 = vrot.lane.b32.xlu1 %v918_v1, %s9797_s30  ;;  %v923_v5 = vmul.f32 %v7090_v4, %v918_v1 }
 0x456   : > { %v926_v2 = vpop.permute.xlu1 %925 }
 0x457   : > { %v928_v3 = vmul.f32 %v926_v2, %v918_v1  ;;  %v7229_v2 = vld [vmem:[%s9729_s1 + $0x98] sm:$0xff] }
 0x458   : > { %9936 = vst [vmem:[#allocation29_spill] sm:$0xff] %v7229_v2 }
 0x459   : > { %930 = vrot.lane.b32.xlu1 %v928_v3, %s9842_s20 }
 0x4cb   : > { %v931_v6 = vpop.permute.xlu1 %930 }
 0x4cc   : > { %v7093_v8 = vadd.f32 %v931_v6, %v923_v5 }
 0x4ce   : > { %9932 = vst [vmem:[#allocation25_spill] sm:$0xff] %v7093_v8  ;;  %6561 = vtanh.f32 %v7093_v8 }
 0x4db   : > { %v6562_v18 = vpop.eup %6561 }
 0x4dc   : > { %936 = vrot.lane.b32.xlu0 %v6562_v18, %s9797_s30  ;;  %v7261_v18 = vld [vmem:[%s9729_s1 + $0xa8] sm:$0xff]  ;;  %s9993_s30 = smov 64  }
 0x4dd   : > { %9940 = vst [vmem:[#allocation33_spill] sm:$0xff] %v7261_v18 }
 0x54e   : > { %v937_v19 = vpop.permute.xlu0 %936 }
 0x54f   : > { %v7129_v20 = vmul.f32 %v937_v19, %v918_v1  ;;  %v7224_v1 = vld [vmem:[%s9729_s1 + $0x28] sm:$0xff] }
 0x551   : > { %9933 = vst [vmem:[#allocation26_spill] sm:$0xff] %v7129_v20  ;;  %945 = vrot.lane.b32.xlu1 %v7129_v20, %s9842_s20  ;;  %v1263_v20 = vadd.s32 4294967272, %v7020_v27 }
 0x5c3   : > { %v946_v21 = vpop.permute.xlu1 %945 }
 0x5c4   : > { %6227 = vmatmul.mubr.msk.f32.vlgmr.msra.gmra.mxu0 %vm559_vm1, %v946_v21  ;;  %6238 = vmatmul.mubr.msk.f32.vlgmr.msra.gmra.mxu1 %vm559_vm1, %v946_v21 }
 0x5c5   : > { %6248 = vmatprep.mubr.msk.f32.mxu0 %vm6791_vm2, %v9754_v7  ;;  %6259 = vmatprep.mubr.msk.f32.mxu1 %vm6791_vm2, %v9754_v7 }
 0x684   : > { %v1015_v30 = vpop.f32.mrf.mxu0  ;;  %v7145_v31 = vpop.f32.mrf.mxu1 }
 0x685   : > { %9935 = vst [vmem:[#allocation28_spill] sm:$0xff] %v7145_v31  ;;  %v1058_v32 = vrot.slane %v1015_v30, %v7143_v29  ;;  %v7277_v30 = vld [vmem:[%s9729_s1 + $0xb0] sm:$0xff]  ;;  %v1256_v31 = vadd.s32 4294967280, %v7020_v27 }
 0x686   : > { %v6228_v34 = vpop.f32.mrf.mxu0  ;;  %v6239_v36 = vpop.f32.mrf.mxu1  ;;  %9942 = vst [vmem:[#allocation35_spill] sm:$0xff] %v7277_v30 }
 0x687   : > { %v1059_v37 = vcombine.high %v1058_v32, %v1058_v32  ;;  %v1066_v39 = vrot.slane %v1058_v32, %v7143_v29 }
 0x689   : > { %v1073_v41 = vrot.slane %v1059_v37, %v7143_v29  ;;  %v7164_v42 = vrot.slane %v1066_v39, %v7149_v33  ;;  %v7288_v39 = vld [vmem:[%s9729_s1 + $0x48] sm:$0xff] }
 0x68a   : > { %9943 = vst [vmem:[#allocation36_spill] sm:$0xff] %v7288_v39 }
 0x68b   : > { %v7177_v45 = vrot.slane %v1073_v41, %v7149_v33  ;;  %v1085_v46 = vmul.f32 %v7164_v42, %v7155_v26  ;;  %v1084_v47 = vmul.f32 %v7164_v42, %v7160_v40  ;;  %v1086_v51 = vmul.f32 %v7164_v42, %v7169_v43  ;;  %v7293_v41 = vld [vmem:[%s9729_s1 + $0xb8] sm:$0xff] }
 0x68c   : > { %v1087_v57 = vmul.f32 %v7164_v42, %v7192_v53  ;;  %v1088_v63 = vmul.f32 %v7164_v42, %v7208_v59  ;;  %v1089_v6 = vmul.f32 %v7164_v42, %v7224_v1  ;;  %v1090_v14 = vmul.f32 %v7164_v42, %v7240_v10  ;;  %9944 = vst [vmem:[#allocation37_spill] sm:$0xff] %v7293_v41 }
 0x68d   : > { %v1119_v48 = vsel %vm559_vm1, %v1085_v46, 0.0  ;;  %v1116_v49 = vsel %vm559_vm1, %v1084_v47, 0.0  ;;  %v1100_v52 = vmul.f32 %v7177_v45, %v7174_v44  ;;  %v1122_v55 = vsel %vm559_vm1, %v1086_v51, 0.0  ;;  %v7304_v51 = vld [vmem:[%s9729_s1 + $0x50] sm:$0xff] }
 0x68e   : > { %1120 = vadd.xlane.f32.xlu1 %v1119_v48  ;;  %1117 = vadd.xlane.f32.xlu0 %v1116_v49  ;;  %v1101_v58 = vmul.f32 %v7177_v45, %v7197_v54  ;;  %v1125_v61 = vsel %vm559_vm1, %v1087_v57, 0.0  ;;  %v1102_v0 = vmul.f32 %v7177_v45, %v7213_v60  ;;  %v1128_v3 = vsel %vm559_vm1, %v1088_v63, 0.0  ;;  %9945 = vst [vmem:[#allocation38_spill] sm:$0xff] %v7304_v51 }
 0x68f   : > { %v1164_v56 = vsel %vm559_vm1, %v1100_v52, 0.0  ;;  %v1103_v9 = vmul.f32 %v7177_v45, %v7229_v2  ;;  %v1131_v12 = vsel %vm559_vm1, %v1089_v6, 0.0  ;;  %v1104_v16 = vmul.f32 %v7177_v45, %v7245_v11  ;;  %v7309_v52 = vld [vmem:[%s9729_s1 + $0xc0] sm:$0xff] }
 0x690   : > { %v1167_v62 = vsel %vm559_vm1, %v1101_v58, 0.0  ;;  %v1170_v5 = vsel %vm559_vm1, %v1102_v0, 0.0  ;;  %v1134_v19 = vsel %vm559_vm1, %v1090_v14, 0.0  ;;  %v1091_v22 = vmul.f32 %v7164_v42, %v7256_v17  ;;  %9946 = vst [vmem:[#allocation39_spill] sm:$0xff] %v7309_v52  ;;  %v7336_v6 = vld [vmem:[%s9729_s1 + $0x60] sm:$0xff] }
 0x691   : > { %v1173_v13 = vsel %vm559_vm1, %v1103_v9, 0.0  ;;  %v1176_v21 = vsel %vm559_vm1, %v1104_v16, 0.0  ;;  %v1105_v23 = vmul.f32 %v7177_v45, %v7261_v18  ;;  %v1092_v36 = vmul.f32 %v7164_v42, %v7272_v25  ;;  %9949 = vst [vmem:[#allocation42_spill] sm:$0xff] %v7336_v6  ;;  %v7341_v9 = vld [vmem:[%s9729_s1 + $0xd0] sm:$0xff] }
 0x692   : > { %1123 = vadd.xlane.f32.xlu1 %v1122_v55  ;;  %1165 = vadd.xlane.f32.xlu0 %v1164_v56  ;;  %v1137_v32 = vsel %vm559_vm1, %v1091_v22, 0.0  ;;  %v1106_v37 = vmul.f32 %v7177_v45, %v7277_v30  ;;  %v1093_v48 = vmul.f32 %v7164_v42, %v7288_v39  ;;  %v1107_v49 = vmul.f32 %v7177_v45, %v7293_v41 }
 0x693   : > { %v1179_v34 = vsel %vm559_vm1, %v1105_v23, 0.0  ;;  %v1140_v46 = vsel %vm559_vm1, %v1092_v36, 0.0  ;;  %v1094_v57 = vmul.f32 %v7164_v42, %v7304_v51  ;;  %v1108_v58 = vmul.f32 %v7177_v45, %v7309_v52  ;;  %9950 = vst [vmem:[#allocation43_spill] sm:$0xff] %v7341_v9  ;;  %v7368_v36 = vld [vmem:[%s9729_s1 + $0x70] sm:$0xff] }
 0x694   : > { %v1182_v47 = vsel %vm559_vm1, %v1106_v37, 0.0  ;;  %v1143_v55 = vsel %vm559_vm1, %v1093_v48, 0.0  ;;  %v1185_v56 = vsel %vm559_vm1, %v1107_v49, 0.0  ;;  %v1096_v14 = vmul.f32 %v7164_v42, %v7336_v6  ;;  %9953 = vst [vmem:[#allocation46_spill] sm:$0xff] %v7368_v36  ;;  %v7373_v37 = vld [vmem:[%s9729_s1 + $0xe0] sm:$0xff] }
 0x695   : > { %v1146_v63 = vsel %vm559_vm1, %v1094_v57, 0.0  ;;  %v1188_v0 = vsel %vm559_vm1, %v1108_v58, 0.0  ;;  %v1110_v16 = vmul.f32 %v7177_v45, %v7341_v9  ;;  %9954 = vst [vmem:[#allocation47_spill] sm:$0xff] %v7373_v37  ;;  %v1098_v48 = vmul.f32 %v7164_v42, %v7368_v36 }
 0x696   : > { %1126 = vadd.xlane.f32.xlu1 %v1125_v61  ;;  %1168 = vadd.xlane.f32.xlu0 %v1167_v62  ;;  %v7320_v61 = vld [vmem:[%s9729_s1 + $0x58] sm:$0xff]  ;;  %v7325_v62 = vld [vmem:[%s9729_s1 + $0xc8] sm:$0xff]  ;;  %v1152_v22 = vsel %vm559_vm1, %v1096_v14, 0.0  ;;  %v1112_v49 = vmul.f32 %v7177_v45, %v7373_v37  ;;  %v1291_v37 = vadd.s32 4294967240, %v7020_v27  ;;  %v7474_v36 = vsub.s32 %v1256_v31, %v7140_v24 }
 0x697   : > { %9947 = vst [vmem:[#allocation40_spill] sm:$0xff] %v7320_v61  ;;  %9948 = vst [vmem:[#allocation41_spill] sm:$0xff] %v7325_v62  ;;  %v1194_v23 = vsel %vm559_vm1, %v1110_v16, 0.0  ;;  %v1158_v57 = vsel %vm559_vm1, %v1098_v48, 0.0  ;;  %v1312_v52 = vadd.s32 4294967216, %v7020_v27  ;;  %v1326_v41 = vadd.s32 4294967200, %v7020_v27 }
 0x698   : > { %v1200_v58 = vsel %vm559_vm1, %v1112_v49, 0.0  ;;  %v1347_v25 = vadd.s32 4294967176, %v7020_v27 }
 0x69a   : > { %1129 = vadd.xlane.f32.xlu1 %v1128_v3  ;;  %1171 = vadd.xlane.f32.xlu0 %v1170_v5  ;;  %v1095_v3 = vmul.f32 %v7164_v42, %v7320_v61  ;;  %v1109_v5 = vmul.f32 %v7177_v45, %v7325_v62  ;;  %v7483_v62 = vsub.s32 %v1263_v20, %v7140_v24  ;;  %v1319_v61 = vadd.s32 4294967208, %v7020_v27 }
 0x69b   : > { %v7498_v20 = vsub.s32 %v1291_v37, %v7140_v24 }
 0x69c   : > { %9959 = vst [vmem:[#allocation52_spill] sm:$0xff] %v7483_v62  ;;  %v7527_v10 = vsub.s32 %v1319_v61, %v7140_v24 }
 0x69e   : > { %1132 = vadd.xlane.f32.xlu1 %v1131_v12  ;;  %1174 = vadd.xlane.f32.xlu0 %v1173_v13  ;;  %v1149_v12 = vsel %vm559_vm1, %v1095_v3, 0.0  ;;  %v1191_v13 = vsel %vm559_vm1, %v1109_v5, 0.0  ;;  %v7400_v3 = vld [vmem:[%s9729_s1 + $0xf0] sm:$0xff] }
 0x69f   : > { %9957 = vst [vmem:[#allocation50_spill] sm:$0xff] %v7400_v3 }
 0x6a2   : > { %1135 = vadd.xlane.f32.xlu1 %v1134_v19  ;;  %1177 = vadd.xlane.f32.xlu0 %v1176_v21  ;;  %v7352_v19 = vld [vmem:[%s9729_s1 + $0x68] sm:$0xff]  ;;  %v7357_v21 = vld [vmem:[%s9729_s1 + $0xd8] sm:$0xff] }
 0x6a3   : > { %9951 = vst [vmem:[#allocation44_spill] sm:$0xff] %v7352_v19  ;;  %9952 = vst [vmem:[#allocation45_spill] sm:$0xff] %v7357_v21 }
 0x6a6   : > { %1138 = vadd.xlane.f32.xlu1 %v1137_v32  ;;  %1180 = vadd.xlane.f32.xlu0 %v1179_v34  ;;  %v1097_v32 = vmul.f32 %v7164_v42, %v7352_v19  ;;  %v1111_v34 = vmul.f32 %v7177_v45, %v7357_v21  ;;  %v1298_v21 = vadd.s32 4294967232, %v7020_v27 }
 0x6a8   : > { %v7502_v30 = vsub.s32 %v1298_v21, %v7140_v24 }
 0x6aa   : > { %1141 = vadd.xlane.f32.xlu1 %v1140_v46  ;;  %1183 = vadd.xlane.f32.xlu0 %v1182_v47  ;;  %v1155_v46 = vsel %vm559_vm1, %v1097_v32, 0.0  ;;  %v1197_v47 = vsel %vm559_vm1, %v1111_v34, 0.0 }
 0x6ae   : > { %1144 = vadd.xlane.f32.xlu1 %v1143_v55  ;;  %1186 = vadd.xlane.f32.xlu0 %v1185_v56  ;;  %v7384_v55 = vld [vmem:[%s9729_s1 + $0x78] sm:$0xff]  ;;  %v7389_v56 = vld [vmem:[%s9729_s1 + $0xe8] sm:$0xff] }
 0x6af   : > { %9955 = vst [vmem:[#allocation48_spill] sm:$0xff] %v7384_v55  ;;  %9956 = vst [vmem:[#allocation49_spill] sm:$0xff] %v7389_v56 }
 0x6b2   : > { %1147 = vadd.xlane.f32.xlu1 %v1146_v63  ;;  %1189 = vadd.xlane.f32.xlu0 %v1188_v0  ;;  %v1099_v63 = vmul.f32 %v7164_v42, %v7384_v55  ;;  %v1113_v0 = vmul.f32 %v7177_v45, %v7389_v56  ;;  %v7409_v42 = vld [vmem:[%s9729_s1 + $0xf8] sm:$0xff]  ;;  %v1277_v56 = vadd.s32 4294967256, %v7020_v27  ;;  %v1284_v55 = vadd.s32 4294967248, %v7020_v27 }
 0x6b3   : > { %9958 = vst [vmem:[#allocation51_spill] sm:$0xff] %v7409_v42  ;;  %v1115_v16 = vmul.f32 %v7177_v45, %v7409_v42  ;;  %v1270_v42 = vadd.s32 4294967264, %v7020_v27 }
 0x6b4   : > { %v1161_v5 = vsel %vm559_vm1, %v1099_v63, 0.0  ;;  %v7490_v31 = vsub.s32 %v1277_v56, %v7140_v24  ;;  %v7495_v51 = vsub.s32 %v1284_v55, %v7140_v24  ;;  %v7505_v56 = vsub.s32 %v1305_v28, %v7140_v24 }
 0x6b5   : > { %v7486_v6 = vsub.s32 %v1270_v42, %v7140_v24  ;;  %v1333_v42 = vadd.s32 4294967192, %v7020_v27  ;;  %v1340_v55 = vadd.s32 4294967184, %v7020_v27  ;;  %v7520_v28 = vsub.s32 %v1312_v52, %v7140_v24 }
 0x6b6   : > { %1150 = vadd.xlane.f32.xlu1 %v1149_v12  ;;  %1192 = vadd.xlane.f32.xlu0 %v1191_v13  ;;  %v1203_v12 = vsel %vm559_vm1, %v1113_v0, 0.0  ;;  %v1114_v13 = vmul.f32 %v7177_v45, %v7400_v3  ;;  %v7468_v3 = vsub.s32 %v7020_v27, %v7140_v24 }
 0x6b7   : > { %9960 = vst [vmem:[#allocation53_spill] sm:$0xff] %v7486_v6 }
 0x6b8   : > { %v1206_v14 = vsel %vm559_vm1, %v1114_v13, 0.0 }
 0x6ba   : > { %1153 = vadd.xlane.f32.xlu1 %v1152_v22  ;;  %1195 = vadd.xlane.f32.xlu0 %v1194_v23  ;;  %v1209_v22 = vsel %vm559_vm1, %v1115_v16, 0.0 }
 0x6be   : > { %1156 = vadd.xlane.f32.xlu1 %v1155_v46  ;;  %1198 = vadd.xlane.f32.xlu0 %v1197_v47 }
 0x6c2   : > { %1159 = vadd.xlane.f32.xlu1 %v1158_v57  ;;  %1201 = vadd.xlane.f32.xlu0 %v1200_v58 }
 0x6c6   : > { %1162 = vadd.xlane.f32.xlu1 %v1161_v5  ;;  %1204 = vadd.xlane.f32.xlu0 %v1203_v12 }
 0x6ca   : > { %1207 = vadd.xlane.f32.xlu0 %v1206_v14 }
 0x6ce   : > { %1210 = vadd.xlane.f32.xlu0 %v1209_v22 }
 0x717   : > { %v7415_v23 = vpop.xlane.xlu1 %1120  ;;  %v7417_v32 = vpop.xlane.xlu0 %1117 }
 0x718   : > { %v1253_v37 = vrot.slane %v7415_v23, %v7464_v50  ;;  %v1248_v11 = vrot.slane %v7417_v32, %v7468_v3  ;;  %v7530_v23 = vsub.s32 %v1326_v41, %v7140_v24 }
 0x71b   : > { %v7419_v34 = vpop.xlane.xlu1 %1123  ;;  %v7421_v46 = vpop.xlane.xlu0 %1165 }
 0x71c   : > { %v1260_v17 = vrot.slane %v7419_v34, %v7474_v36  ;;  %v1357_v32 = vrot.slane %v7421_v46, %v7468_v3  ;;  %v7539_v34 = vsub.s32 %v1333_v42, %v7140_v24 }
 0x71f   : > { %v7423_v47 = vpop.xlane.xlu1 %1126  ;;  %v7425_v48 = vpop.xlane.xlu0 %1168 }
 0x720   : > { %v1361_v21 = vrot.slane %v7425_v48, %v7464_v50  ;;  %v1267_v52 = vrot.slane %v7423_v47, %v7483_v62  ;;  %v7549_v47 = vsub.s32 %v1347_v25, %v7140_v24 }
 0x723   : > { %v7427_v49 = vpop.xlane.xlu1 %1129  ;;  %v7429_v57 = vpop.xlane.xlu0 %1171 }
 0x724   : > { %v1366_v2 = vrot.slane %v7429_v57, %v7474_v36  ;;  %v1274_v61 = vrot.slane %v7427_v49, %v7486_v6  ;;  %v7546_v57 = vsub.s32 %v1340_v55, %v7140_v24 }
 0x727   : > { %v7431_v45 = vpop.xlane.xlu1 %1132  ;;  %v7433_v58 = vpop.xlane.xlu0 %1174 }
 0x728   : > { %v1371_v48 = vrot.slane %v7433_v58, %v7483_v62  ;;  %v1255_v58 = vsel %vm1254_vm6, %v1253_v37, %v1248_v11  ;;  %v1362_v62 = vsel %vm1254_vm6, %v1361_v21, %v1357_v32  ;;  %v1281_v42 = vrot.slane %v7431_v45, %v7490_v31 }
 0x729   : > { %v1367_v55 = vsel %vm1261_vm7, %v1366_v2, %v1362_v62 }
 0x72a   : > { %v1372_v45 = vsel %vm9841_vm8, %v1371_v48, %v1367_v55 }
 0x72b   : > { %v7435_v63 = vpop.xlane.xlu1 %1135  ;;  %v7437_v0 = vpop.xlane.xlu0 %1177 }
 0x72c   : > { %v1376_v41 = vrot.slane %v7437_v0, %v7486_v6  ;;  %v1262_v0 = vsel %vm1261_vm7, %v1260_v17, %v1255_v58  ;;  %v1288_v6 = vrot.slane %v7435_v63, %v7495_v51 }
 0x72d   : > { %v1269_v37 = vsel %vm9841_vm8, %v1267_v52, %v1262_v0 }
 0x72e   : > { %v1276_v2 = vsel %vm9839_vm9, %v1274_v61, %v1269_v37  ;;  %v1377_v62 = vsel %vm9839_vm9, %v1376_v41, %v1372_v45 }
 0x72f   : > { %v7439_v5 = vpop.xlane.xlu1 %1138  ;;  %v7441_v12 = vpop.xlane.xlu0 %1180  ;;  %v1283_v32 = vsel %vm9837_vm10, %v1281_v42, %v1276_v2 }
 0x730   : > { %v1381_v49 = vrot.slane %v7441_v12, %v7490_v31  ;;  %v1295_v12 = vrot.slane %v7439_v5, %v7498_v20  ;;  %v1290_v48 = vsel %vm9838_vm11, %v1288_v6, %v1283_v32 }
 0x732   : > { %v1382_v52 = vsel %vm9837_vm10, %v1381_v49, %v1377_v62  ;;  %v1297_v41 = vsel %vm9840_vm12, %v1295_v12, %v1290_v48 }
 0x733   : > { %v7443_v13 = vpop.xlane.xlu1 %1141  ;;  %v7445_v14 = vpop.xlane.xlu0 %1183 }
 0x734   : > { %v1386_v25 = vrot.slane %v7445_v14, %v7495_v51  ;;  %v1302_v63 = vrot.slane %v7443_v13, %v7502_v30 }
 0x736   : > { %v1387_v61 = vsel %vm9838_vm11, %v1386_v25, %v1382_v52  ;;  %v1304_v6 = vsel %vm9791_vm13, %v1302_v63, %v1297_v41 }
 0x737   : > { %v7447_v16 = vpop.xlane.xlu1 %1144  ;;  %v7449_v22 = vpop.xlane.xlu0 %1186 }
 0x738   : > { %v1391_v17 = vrot.slane %v7449_v22, %v7498_v20  ;;  %v1309_v5 = vrot.slane %v7447_v16, %v7505_v56 }
 0x73a   : > { %v1392_v58 = vsel %vm9840_vm12, %v1391_v17, %v1387_v61  ;;  %v1311_v55 = vsel %vm9792_vm14, %v1309_v5, %v1304_v6 }
 0x73b   : > { %v7451_v7 = vpop.xlane.xlu1 %1147  ;;  %v7453_v29 = vpop.xlane.xlu0 %1189 }
 0x73c   : > { %v1396_v14 = vrot.slane %v7453_v29, %v7502_v30  ;;  %v1316_v13 = vrot.slane %v7451_v7, %v7520_v28 }
 0x73e   : > { %v1397_v42 = vsel %vm9791_vm13, %v1396_v14, %v1392_v58  ;;  %v1318_v37 = vsel %vm9793_vm15, %v1316_v13, %v1311_v55  ;;  %vm1345_vm13 = vcmask 982912  }
 0x73f   : > { %v7457_v8 = vpop.xlane.xlu1 %1150  ;;  %v7459_v4 = vpop.xlane.xlu0 %1192 }
 0x740   : > { %v1401_v22 = vrot.slane %v7459_v4, %v7505_v56  ;;  %v1323_v16 = vrot.slane %v7457_v8, %v7527_v10 }
 0x742   : > { %v1402_v25 = vsel %vm9792_vm14, %v1401_v22, %v1397_v42  ;;  %vm1352_vm14 = vcmask 1048512  }
 0x743   : > { %v7478_v9 = vpop.xlane.xlu1 %1153  ;;  %v7480_v19 = vpop.xlane.xlu0 %1195 }
 0x744   : > { %v1406_v29 = vrot.slane %v7480_v19, %v7520_v28  ;;  %v1330_v7 = vrot.slane %v7478_v9, %v7530_v23 }
 0x746   : > { %v1407_v45 = vsel %vm9793_vm15, %v1406_v29, %v1402_v25  ;;  %vm1433_vm15 = vcmask 1041409  }
 0x747   : > { %v7507_v39 = vpop.xlane.xlu1 %1156  ;;  %v7509_v18 = vpop.xlane.xlu0 %1198 }
 0x748   : > { %v1411_v4 = vrot.slane %v7509_v18, %v7527_v10  ;;  %v1337_v8 = vrot.slane %v7507_v39, %v7539_v34 }
 0x74a   : > { %v1412_v17 = vsel %vm9794_vm0, %v1411_v4, %v1407_v45 }
 0x74b   : > { %v1202_v46 = vpop.xlane.xlu0 %1201  ;;  %v1160_v11 = vpop.xlane.xlu1 %1159 }
 0x74c   : > { %v1416_v49 = vrot.slane %v1202_v46, %v7530_v23  ;;  %v1344_v12 = vrot.slane %v1160_v11, %v7546_v57  ;;  %v1325_v46 = vsel %vm9794_vm0, %v1323_v16, %v1318_v37  ;;  %vm9799_vm0 = vcmp.lt.s32.totalorder %v7020_v27, 8  ;;  %v1690_v37 = vld [vmem:[%s9739_s11 + $0x8] sm:$0xff] }
 0x74d   : > { %v1332_v62 = vsel %vm9795_vm3, %v1330_v7, %v1325_v46 }
 0x74e   : > { %v1417_v39 = vsel %vm9795_vm3, %v1416_v49, %v1412_v17  ;;  %v1339_v14 = vsel %vm1338_vm4, %v1337_v8, %v1332_v62  ;;  %vm9796_vm3 = vcmask 1041408   ;;  %v7626_v49 = vsub.s32 1, %v7140_v24  ;;  %v1692_v8 = vld [vmem:[%s9739_s11 + $0x18] sm:$0xff] }
 0x74f   : > { %v1205_v21 = vpop.xlane.xlu0 %1204  ;;  %v1163_v19 = vpop.xlane.xlu1 %1162  ;;  %v1346_v32 = vsel %vm1345_vm13, %v1344_v12, %v1339_v14  ;;  %v1847_v24 = vstv %s1846_s15  ;;  %6241 = vmatpush3.msra.mxu0 %v1692_v8 }
 0x750   : > { %v1421_v18 = vrot.slane %v1205_v21, %v7539_v34  ;;  %v1351_v2 = vrot.slane %v1163_v19, %v7549_v47 }
 0x752   : > { %v1422_v21 = vsel %vm1338_vm4, %v1421_v18, %v1417_v39  ;;  %v1353_v5 = vsel %vm1352_vm14, %v1351_v2, %v1346_v32  ;;  %v9963_v18 = vmov 0.0  }
 0x753   : > { %v1208_v0 = vpop.xlane.xlu0 %1207  ;;  %6242 = vmatprep.subr.mxu0 %v9963_v18 }
 0x754   : > { %v1426_v9 = vrot.slane %v1208_v0, %v7546_v57 }
 0x756   : > { %v1427_v52 = vsel %vm1345_vm13, %v1426_v9, %v1422_v21 }
 0x757   : > { %v1211_v63 = vpop.xlane.xlu0 %1210 }
 0x758   : > { %v1431_v11 = vrot.slane %v1211_v63, %v7549_v47 }
 0x75a   : > { %v1432_v22 = vsel %vm1352_vm14, %v1431_v11, %v1427_v52 }
 0x75b   : > { %v1434_v48 = vsel %vm1433_vm15, %v1432_v22, %v1353_v5 }
 0x75c   : > { %v1436_v61 = vsel %vm9799_vm0, %v1434_v48, -1e+30  ;;  %vm1843_vm0 = vcmask 254976  }
 0x75d   : > { %v1438_v13 = vsel %vm9796_vm3, %v1436_v61, -inf }
 0x75e   : > { %1439 = vmax.xlane.f32.xlu1 %v1438_v13 }
 0x7e7   : > { %v1440_v29 = vpop.xlane.xlu1 %1439 }
 0x7e8   : > { %v1441_v41 = vsub.f32 %v1436_v61, %v1440_v29 }
 0x7ea   : > { %v1442_v58 = vmul.f32 1.442695, %v1441_v41 }
 0x7ec   : > { %6563 = vpow2.f32 %v1442_v58 }
 0x7f9   : > { %v6564_v16 = vpop.eup %6563 }
 0x7fa   : > { %v1444_v4 = vsel %vm9796_vm3, %v6564_v16, 0.0  ;;  %vm7634_vm3 = vcmp.eq.s32.totalorder %v1847_v24, 1  ;;  %v9964_v24 = vld [vmem:[#allocation30_spill] sm:$0xff] }
 0x7fb   : > { %1445 = vadd.xlane.f32.xlu0 %v1444_v4  ;;  %v1858_v25 = vsel %vm7634_vm3, %v7036_v38, %v7033_v35  ;;  %v1689_v35 = vld [vmem:[%s9739_s11] sm:$0xff] }
 0x884   : > { %v1446_v6 = vpop.xlane.xlu0 %1445 }
 0x885   : > { %6565 = vrcp.f32 %v1446_v6 }
 0x892   : > { %v6566_v42 = vpop.eup %6565 }
 0x893   : > { %v1448_v7 = vmul.f32 %v6566_v42, %v6564_v16 }
 0x895   : > { %v1452_v19 = vrot.slane %v1448_v7, %v7149_v33  ;;  %1845 = vst [vmem:[%s6953_s21] sm:$0x3] %v1448_v7  ;;  %v1519_v0 = vrot.slane %v1448_v7, %v7626_v49 }
 0x897   : > { %1458 = vbcast.lane.b32.xlu0 %v1452_v19, 264  ;;  %1454 = vbcast.lane.b32.xlu1 %v1452_v19, 256 }
 0x89b   : > { %1462 = vbcast.lane.b32.xlu0 %v1452_v19, 272  ;;  %1521 = vbcast.lane.b32.xlu1 %v1519_v0, 256 }
 0x89f   : > { %1466 = vbcast.lane.b32.xlu0 %v1452_v19, 280  ;;  %1525 = vbcast.lane.b32.xlu1 %v1519_v0, 264 }
 0x8a3   : > { %1470 = vbcast.lane.b32.xlu0 %v1452_v19, 288  ;;  %1529 = vbcast.lane.b32.xlu1 %v1519_v0, 272 }
 0x8a7   : > { %1474 = vbcast.lane.b32.xlu0 %v1452_v19, 296  ;;  %1533 = vbcast.lane.b32.xlu1 %v1519_v0, 280 }
 0x8ab   : > { %1478 = vbcast.lane.b32.xlu0 %v1452_v19, 304  ;;  %1537 = vbcast.lane.b32.xlu1 %v1519_v0, 288 }
 0x8af   : > { %1482 = vbcast.lane.b32.xlu0 %v1452_v19, 312  ;;  %1541 = vbcast.lane.b32.xlu1 %v1519_v0, 296 }
 0x8b3   : > { %1486 = vbcast.lane.b32.xlu0 %v1452_v19, 320  ;;  %1545 = vbcast.lane.b32.xlu1 %v1519_v0, 304 }
 0x8b7   : > { %1490 = vbcast.lane.b32.xlu0 %v1452_v19, 328  ;;  %1549 = vbcast.lane.b32.xlu1 %v1519_v0, 312 }
 0x8bb   : > { %1494 = vbcast.lane.b32.xlu0 %v1452_v19, 336  ;;  %1553 = vbcast.lane.b32.xlu1 %v1519_v0, 320 }
 0x8bf   : > { %1498 = vbcast.lane.b32.xlu0 %v1452_v19, 344  ;;  %1557 = vbcast.lane.b32.xlu1 %v1519_v0, 328 }
 0x8c3   : > { %1502 = vbcast.lane.b32.xlu0 %v1452_v19, 352  ;;  %1561 = vbcast.lane.b32.xlu1 %v1519_v0, 336 }
 0x8c7   : > { %1506 = vbcast.lane.b32.xlu0 %v1452_v19, 360  ;;  %1565 = vbcast.lane.b32.xlu1 %v1519_v0, 344 }
 0x8cb   : > { %1510 = vbcast.lane.b32.xlu0 %v1452_v19, 368  ;;  %1569 = vbcast.lane.b32.xlu1 %v1519_v0, 352 }
 0x8cf   : > { %1514 = vbcast.lane.b32.xlu0 %v1452_v19, 376  ;;  %1573 = vbcast.lane.b32.xlu1 %v1519_v0, 360 }
 0x8d3   : > { %1849 = vrot.lane.b32.xlu0 %v7003_v15, %s9800_s16  ;;  %1577 = vbcast.lane.b32.xlu1 %v1519_v0, 368  ;;  %v1691_v15 = vld [vmem:[%s9739_s11 + $0x10] sm:$0xff] }
 0x8d4   : > { %6243 = vmatpush3.msra.mxu0 %v1691_v15 }
 0x8d5   : > { %6244 = vmatprep.subr.mxu0 %v9963_v18 }
 0x8d6   : > { %6245 = vmatpush3.msra.mxu0 %v1690_v37 }
 0x8d7   : > { %1581 = vbcast.lane.b32.xlu1 %v1519_v0, 376  ;;  %1860 = vrot.lane.b32.xlu0 %v1858_v25, %s9800_s16 }
 0x8d8   : > { %6246 = vmatprep.subr.mxu0 %v9963_v18 }
 0x8d9   : > { %6247 = vmatpush3.msra.mxu0 %v1689_v35 }
 0x8da   : > { %6262 = vmatprep.subr.mxu0 %v9963_v18 }
 0x909   : > { %v1459_v38 = vpop.permute.xlu0 %1458  ;;  %v1455_v45 = vpop.permute.xlu1 %1454 }
 0x90a   : > { %v1584_v52 = vmul.f32 %v1459_v38, %v7155_v26  ;;  %v1583_v5 = vmul.f32 %v1455_v45, %v7160_v40  ;;  %v9965_v38 = vld [vmem:[#allocation29_spill] sm:$0xff]  ;;  %v9966_v45 = vld [vmem:[#allocation32_spill] sm:$0xff] }
 0x90c   : > { %v1616_v13 = vsel %vm559_vm1, %v1584_v52, 0.0  ;;  %v1615_v29 = vsel %vm559_vm1, %v1583_v5, 0.0 }
 0x90d   : > { %v1463_v12 = vpop.permute.xlu0 %1462  ;;  %v1522_v9 = vpop.permute.xlu1 %1521  ;;  %v1617_v4 = vadd.f32 %v1616_v13, %v1615_v29  ;;  %v9970_v29 = vld [vmem:[#allocation36_spill] sm:$0xff] }
 0x90e   : > { %v1585_v22 = vmul.f32 %v1463_v12, %v7169_v43  ;;  %v1599_v19 = vmul.f32 %v1522_v9, %v7174_v44 }
 0x910   : > { %v1618_v58 = vsel %vm559_vm1, %v1585_v22, 0.0  ;;  %v1652_v12 = vsel %vm559_vm1, %v1599_v19, 0.0 }
 0x911   : > { %v1467_v46 = vpop.permute.xlu0 %1466  ;;  %v1526_v17 = vpop.permute.xlu1 %1525  ;;  %v1619_v7 = vadd.f32 %v1618_v58, %v1617_v4 }
 0x912   : > { %v1586_v41 = vmul.f32 %v1467_v46, %v7192_v53  ;;  %v1600_v40 = vmul.f32 %v1526_v17, %v7197_v54  ;;  %v9967_v46 = vld [vmem:[#allocation31_spill] sm:$0xff] }
 0x914   : > { %v1620_v26 = vsel %vm559_vm1, %v1586_v41, 0.0  ;;  %v1653_v37 = vsel %vm559_vm1, %v1600_v40, 0.0  ;;  %v9972_v40 = vld [vmem:[#allocation38_spill] sm:$0xff] }
 0x915   : > { %v1471_v2 = vpop.permute.xlu0 %1470  ;;  %v1530_v62 = vpop.permute.xlu1 %1529  ;;  %v1621_v8 = vadd.f32 %v1620_v26, %v1619_v7  ;;  %v9971_v26 = vld [vmem:[#allocation35_spill] sm:$0xff] }
 0x916   : > { %v1587_v16 = vmul.f32 %v1471_v2, %v7208_v59  ;;  %v1601_v53 = vmul.f32 %v1530_v62, %v7213_v60  ;;  %v9968_v2 = vld [vmem:[#allocation34_spill] sm:$0xff] }
 0x918   : > { %v1622_v0 = vsel %vm559_vm1, %v1587_v16, 0.0  ;;  %v1655_v9 = vsel %vm559_vm1, %v1601_v53, 0.0 }
 0x919   : > { %v1475_v39 = vpop.permute.xlu0 %1474  ;;  %v1534_v63 = vpop.permute.xlu1 %1533  ;;  %v1623_v44 = vadd.f32 %v1622_v0, %v1621_v8  ;;  %v9974_v8 = vld [vmem:[#allocation40_spill] sm:$0xff] }
 0x91a   : > { %v1588_v43 = vmul.f32 %v1475_v39, %v7224_v1  ;;  %v1602_v54 = vmul.f32 %v1534_v63, %v9965_v38  ;;  %v1654_v39 = vadd.f32 %v1653_v37, %v1652_v12 }
 0x91c   : > { %v1624_v35 = vsel %vm559_vm1, %v1588_v43, 0.0  ;;  %v1657_v22 = vsel %vm559_vm1, %v1602_v54, 0.0  ;;  %v1656_v58 = vadd.f32 %v1655_v9, %v1654_v39  ;;  %v9978_v39 = vld [vmem:[#allocation44_spill] sm:$0xff] }
 0x91d   : > { %v1479_v14 = vpop.permute.xlu0 %1478  ;;  %v1538_v21 = vpop.permute.xlu1 %1537 }
 0x91e   : > { %v1589_v25 = vmul.f32 %v1479_v14, %v9964_v24  ;;  %v1603_v17 = vmul.f32 %v1538_v21, %v9967_v46  ;;  %v1625_v14 = vadd.f32 %v1624_v35, %v1623_v44  ;;  %v1658_v7 = vadd.f32 %v1657_v22, %v1656_v58 }
 0x920   : > { %v1626_v60 = vsel %vm559_vm1, %v1589_v25, 0.0  ;;  %v1659_v4 = vsel %vm559_vm1, %v1603_v17, 0.0  ;;  %v9973_v25 = vld [vmem:[#allocation37_spill] sm:$0xff] }
 0x921   : > { %v1483_v11 = vpop.permute.xlu0 %1482  ;;  %v1542_v32 = vpop.permute.xlu1 %1541  ;;  %v1627_v16 = vadd.f32 %v1626_v60, %v1625_v14  ;;  %v1660_v35 = vadd.f32 %v1659_v4, %v1658_v7 }
 0x922   : > { %v1590_v1 = vmul.f32 %v1483_v11, %v9966_v45  ;;  %v9969_v11 = vld [vmem:[#allocation33_spill] sm:$0xff]  ;;  %v9975_v45 = vld [vmem:[#allocation39_spill] sm:$0xff] }
 0x923   : > { %v1604_v13 = vmul.f32 %v1542_v32, %v9969_v11  ;;  %v9979_v11 = vld [vmem:[#allocation43_spill] sm:$0xff] }
 0x924   : > { %v1628_v63 = vsel %vm559_vm1, %v1590_v1, 0.0  ;;  %v9976_v1 = vld [vmem:[#allocation42_spill] sm:$0xff] }
 0x925   : > { %v1487_v48 = vpop.permute.xlu0 %1486  ;;  %v1546_v61 = vpop.permute.xlu1 %1545  ;;  %v1629_v19 = vadd.f32 %v1628_v63, %v1627_v16  ;;  %v1661_v24 = vsel %vm559_vm1, %v1604_v13, 0.0 }
 0x926   : > { %v1591_v62 = vmul.f32 %v1487_v48, %v9968_v2  ;;  %v1605_v48 = vmul.f32 %v1546_v61, %v9971_v26  ;;  %v1662_v44 = vadd.f32 %v1661_v24, %v1660_v35  ;;  %v9977_v2 = vld [vmem:[#allocation41_spill] sm:$0xff]  ;;  %v9982_v24 = vld [vmem:[#allocation47_spill] sm:$0xff]  ;;  %v9983_v35 = vld [vmem:[#allocation48_spill] sm:$0xff] }
 0x927   : > { %v9980_v26 = vld [vmem:[#allocation45_spill] sm:$0xff] }
 0x928   : > { %v1630_v21 = vsel %vm559_vm1, %v1591_v62, 0.0  ;;  %v1663_v54 = vsel %vm559_vm1, %v1605_v48, 0.0  ;;  %v9981_v48 = vld [vmem:[#allocation46_spill] sm:$0xff] }
 0x929   : > { %v1491_v6 = vpop.permute.xlu0 %1490  ;;  %v1550_v42 = vpop.permute.xlu1 %1549  ;;  %v1631_v38 = vadd.f32 %v1630_v21, %v1629_v19 }
 0x92a   : > { %v1592_v41 = vmul.f32 %v1491_v6, %v9970_v29  ;;  %v1606_v6 = vmul.f32 %v1550_v42, %v9973_v25 }
 0x92c   : > { %v1632_v32 = vsel %vm559_vm1, %v1592_v41, 0.0  ;;  %v1665_v17 = vsel %vm559_vm1, %v1606_v6, 0.0 }
 0x92d   : > { %v1495_v59 = vpop.permute.xlu0 %1494  ;;  %v1554_v15 = vpop.permute.xlu1 %1553  ;;  %v1633_v9 = vadd.f32 %v1632_v32, %v1631_v38 }
 0x92e   : > { %v1593_v43 = vmul.f32 %v1495_v59, %v9972_v40  ;;  %v1607_v59 = vmul.f32 %v1554_v15, %v9975_v45 }
 0x930   : > { %v1634_v61 = vsel %vm559_vm1, %v1593_v43, 0.0  ;;  %v1667_v63 = vsel %vm559_vm1, %v1607_v59, 0.0 }
 0x931   : > { %v1499_v52 = vpop.permute.xlu0 %1498  ;;  %v1558_v5 = vpop.permute.xlu1 %1557  ;;  %v1635_v22 = vadd.f32 %v1634_v61, %v1633_v9 }
 0x932   : > { %v1594_v37 = vmul.f32 %v1499_v52, %v9974_v8  ;;  %v1608_v62 = vmul.f32 %v1558_v5, %v9977_v2  ;;  %v1664_v52 = vadd.f32 %v1663_v54, %v1662_v44  ;;  %v9984_v54 = vld [vmem:[#allocation49_spill] sm:$0xff] }
 0x934   : > { %v1636_v42 = vsel %vm559_vm1, %v1594_v37, 0.0  ;;  %v1666_v29 = vadd.f32 %v1665_v17, %v1664_v52  ;;  %v1669_v4 = vsel %vm559_vm1, %v1608_v62, 0.0  ;;  %v9986_v62 = vld [vmem:[#allocation23_spill] sm:$0xff] }
 0x935   : > { %v1503_v0 = vpop.permute.xlu0 %1502  ;;  %v1562_v53 = vpop.permute.xlu1 %1561  ;;  %v1637_v41 = vadd.f32 %v1636_v42, %v1635_v22  ;;  %v9985_v42 = vld [vmem:[#allocation50_spill] sm:$0xff] }
 0x936   : > { %v1595_v12 = vmul.f32 %v1503_v0, %v9976_v1  ;;  %v1609_v13 = vmul.f32 %v1562_v53, %v9979_v11  ;;  %v1668_v43 = vadd.f32 %v1667_v63, %v1666_v29  ;;  %v9987_v29 = vld [vmem:[#allocation51_spill] sm:$0xff] }
 0x938   : > { %v1638_v15 = vsel %vm559_vm1, %v1595_v12, 0.0  ;;  %v1671_v19 = vsel %vm559_vm1, %v1609_v13, 0.0  ;;  %v1670_v32 = vadd.f32 %v1669_v4, %v1668_v43 }
 0x939   : > { %v1507_v60 = vpop.permute.xlu0 %1506  ;;  %v1566_v46 = vpop.permute.xlu1 %1565  ;;  %v1639_v7 = vadd.f32 %v1638_v15, %v1637_v41 }
 0x93a   : > { %v1596_v14 = vmul.f32 %v1507_v60, %v9978_v39  ;;  %v1610_v5 = vmul.f32 %v1566_v46, %v9980_v26  ;;  %v1672_v45 = vadd.f32 %v1671_v19, %v1670_v32 }
 0x93c   : > { %v1640_v21 = vsel %vm559_vm1, %v1596_v14, 0.0  ;;  %v1673_v37 = vsel %vm559_vm1, %v1610_v5, 0.0 }
 0x93d   : > { %v1511_v58 = vpop.permute.xlu0 %1510  ;;  %v1570_v16 = vpop.permute.xlu1 %1569  ;;  %v1641_v25 = vadd.f32 %v1640_v21, %v1639_v7  ;;  %v1674_v44 = vadd.f32 %v1673_v37, %v1672_v45  ;;  %v1969_v37 = vld [vmem:[%s9734_s6 + $0x8] sm:$0xff]  ;;  %v1890_v45 = vld [vmem:[%s9733_s5] sm:$0xff] }
 0x93e   : > { %v1597_v40 = vmul.f32 %v1511_v58, %v9981_v48  ;;  %v1611_v53 = vmul.f32 %v1570_v16, %v9982_v24 }
 0x940   : > { %v1642_v0 = vsel %vm559_vm1, %v1597_v40, 0.0  ;;  %v1675_v1 = vsel %vm559_vm1, %v1611_v53, 0.0 }
 0x941   : > { %v1515_v6 = vpop.permute.xlu0 %1514  ;;  %v1574_v8 = vpop.permute.xlu1 %1573  ;;  %v1643_v59 = vadd.f32 %v1642_v0, %v1641_v25  ;;  %v1676_v14 = vadd.f32 %v1675_v1, %v1674_v44  ;;  %v6635_v0 = vld [vmem:[#allocation2 + $0x2] sm:$0x3]  ;;  %v1971_v25 = vld [vmem:[%s9734_s6 + $0x18] sm:$0xff]  ;;  %v2164_v44 = vld [vmem:[%s9736_s8 + $0x10] sm:$0xff] }
 0x942   : > { %v1598_v38 = vmul.f32 %v1515_v6, %v9983_v35  ;;  %v1612_v61 = vmul.f32 %v1574_v8, %v9984_v54  ;;  %v1970_v8 = vld [vmem:[%s9734_s6 + $0x10] sm:$0xff]  ;;  %v1968_v35 = vld [vmem:[%s9734_s6] sm:$0xff]  ;;  %v2165_v1 = vld [vmem:[%s9736_s8 + $0x18] sm:$0xff] }
 0x943   : > { %v1892_v54 = vld [vmem:[%s9733_s5 + $0x10] sm:$0xff] }
 0x944   : > { %v1644_v12 = vsel %vm559_vm1, %v1598_v38, 0.0  ;;  %v1677_v17 = vsel %vm559_vm1, %v1612_v61, 0.0  ;;  %v1893_v38 = vld [vmem:[%s9733_s5 + $0x18] sm:$0xff]  ;;  %v1891_v61 = vld [vmem:[%s9733_s5 + $0x8] sm:$0xff] }
 0x945   : > { %v1645_v9 = vadd.f32 %v1644_v12, %v1643_v59  ;;  %v1850_v60 = vpop.permute.xlu0 %1849  ;;  %v1578_v46 = vpop.permute.xlu1 %1577  ;;  %v1678_v15 = vadd.f32 %v1677_v17, %v1676_v14  ;;  %6252 = vmatpush3.msra.mxu1 %v1893_v38 }
 0x946   : > { %v1613_v2 = vmul.f32 %v1578_v46, %v9985_v42  ;;  %v1852_v39 = vsel %vm7634_vm3, %v9986_v62, %v1850_v60  ;;  %6253 = vmatprep.subr.mxu1 %v9963_v18  ;;  %v2163_v60 = vld [vmem:[%s9736_s8 + $0x8] sm:$0xff]  ;;  %v2162_v46 = vld [vmem:[%s9736_s8] sm:$0xff]  ;;  %v9988_v42 = vld [vmem:[#allocation26_spill] sm:$0xff] }
 0x947   : > { %v1646_v52 = vrot.slane %v1645_v9, 4  ;;  %1854 = vrot.lane.b32.xlu1 %v1852_v39, %s9842_s20  ;;  %6254 = vmatpush3.msra.mxu1 %v1892_v54  ;;  %v9989_v62 = vld [vmem:[#allocation24_spill] sm:$0xff]  ;;  %v9990_v39 = vld [vmem:[#allocation25_spill] sm:$0xff] }
 0x948   : > { %v1679_v22 = vsel %vm559_vm1, %v1613_v2, 0.0  ;;  %6255 = vmatprep.subr.mxu1 %v9963_v18  ;;  %v1873_v14 = vsel %vm7634_vm3, %v9990_v39, %v9989_v62  ;;  %v5985_v62 = vld [vmem:[%s9737_s9] ss:$0 sm:$0xff] }
 0x949   : > { %v1647_v63 = vadd.f32 %v1646_v52, %v1645_v9  ;;  %v1582_v11 = vpop.permute.xlu1 %1581  ;;  %v1861_v13 = vpop.permute.xlu0 %1860  ;;  %v1680_v58 = vadd.f32 %v1679_v22, %v1678_v15  ;;  %6256 = vmatpush3.msra.mxu1 %v1891_v61  ;;  %v9991_v22 = vld [vmem:[#allocation28_spill] sm:$0xff] }
 0x94a   : > { %v1614_v41 = vmul.f32 %v1582_v11, %v9987_v29  ;;  %1863 = vst.msk [vmem:[#allocation3] sm:$0x3] %vm1843_vm0, %v1861_v13  ;;  %6257 = vmatprep.subr.mxu1 %v9963_v18  ;;  %v6636_v13 = vld [vmem:[#allocation4] sm:$0x3] }
 0x94b   : > { %v1648_v4 = vrot.slane %v1647_v63, 2  ;;  %6258 = vmatpush3.msra.mxu1 %v1890_v45 }
 0x94c   : > { %v1681_v16 = vsel %vm559_vm1, %v1614_v41, 0.0  ;;  %6273 = vmatprep.subr.mxu1 %v9963_v18 }
 0x94d   : > { %v1682_v21 = vadd.f32 %v1681_v16, %v1680_v58  ;;  %v1649_v5 = vadd.f32 %v1648_v4, %v1647_v63 }
 0x94f   : > { %v1683_v26 = vrot.slane %v1682_v21, 4  ;;  %v1650_v7 = vrot.slane %v1649_v5, 1 }
 0x951   : > { %v1684_v48 = vadd.f32 %v1683_v26, %v1682_v21  ;;  %v1885_v40 = vld [vmem:[#allocation3] sm:$0x3]  ;;  %v1651_v53 = vadd.f32 %v1650_v7, %v1649_v5  ;;  %v5980_v5 = vld [vmem:[%s6949_s27 + $0x2] sm:$0x3] }
 0x952   : > { %2055 = vrot.lane.b32.xlu0 %v1885_v40, %s9842_s20 }
 0x953   : > { %v1685_v43 = vrot.slane %v1684_v48, 2 }
 0x955   : > { %v1686_v19 = vadd.f32 %v1685_v43, %v1684_v48 }
 0x956   : > { %1864 = vrot.lane.b32.xlu0 %v6635_v0, %s9800_s16 }
 0x957   : > { %v1687_v24 = vrot.slane %v1686_v19, 1 }
 0x959   : > { %v1688_v32 = vadd.f32 %v1687_v24, %v1686_v19 }
 0x95b   : > { %v1769_v6 = vsel %vm1433_vm15, %v1688_v32, %v1651_v53 }
 0x95c   : > { %6249 = vmatmul.mubr.msk.f32.vlgmr.msra.gmra.mxu0 %vm559_vm1, %v1769_v6 }
 0x95d   : > { %6263 = vmatpush3.msra.mxu0 %v1971_v25  ;;  %6270 = vmatprep.mubr.msk.f32.mxu0 %vm6791_vm2, %v9963_v18 }
 0x95e   : > { %6264 = vmatprep.subr.mxu0 %v9963_v18 }
 0x95f   : > { %6265 = vmatpush3.msra.mxu0 %v1970_v8  ;;  %v8145_v8 = vld [vmem:[%s9729_s1 + $0xe8] sm:$0xff] }
 0x960   : > { %6266 = vmatprep.subr.mxu0 %v9963_v18  ;;  %10025 = vst [vmem:[#allocation56_spill] sm:$0xff] %v8145_v8 }
 0x961   : > { %6267 = vmatpush3.msra.mxu0 %v1969_v37 }
 0x962   : > { %6268 = vmatprep.subr.mxu0 %v9963_v18 }
 0x963   : > { %6269 = vmatpush3.msra.mxu0 %v1968_v35 }
 0x964   : > { %6284 = vmatprep.subr.mxu0 %v9963_v18 }
 0x9b9   : > { %v1855_v59 = vpop.permute.xlu1 %1854 }
 0x9ba   : > { %1857 = vst.msk [vmem:[#allocation2] sm:$0x3] %vm1843_vm0, %v1855_v59  ;;  %v2079_v59 = vld [vmem:[%s9735_s7 + $0x18] sm:$0xff] }
 0x9c1   : > { %v7770_v12 = vld [vmem:[#allocation2] sm:$0x3] }
 0x9c2   : > { %6271 = vmatmul.mubr.msk.f32.vlgmr.msra.gmra.mxu0 %vm559_vm1, %v7770_v12 }
 0x9c3   : > { %6285 = vmatpush3.msra.mxu0 %v2165_v1  ;;  %6292 = vmatprep.mubr.msk.f32.mxu0 %vm6791_vm2, %v9963_v18  ;;  %v2078_v1 = vld [vmem:[%s9735_s7 + $0x10] sm:$0xff] }
 0x9c4   : > { %v7779_v9 = vpop.permute.xlu0 %2055  ;;  %6286 = vmatprep.subr.mxu0 %v9963_v18 }
 0x9c5   : > { %6287 = vmatpush3.msra.mxu0 %v2164_v44  ;;  %v2077_v44 = vld [vmem:[%s9735_s7 + $0x8] sm:$0xff] }
 0x9c6   : > { %6288 = vmatprep.subr.mxu0 %v9963_v18 }
 0x9c7   : > { %6289 = vmatpush3.msra.mxu0 %v2163_v60  ;;  %v2076_v60 = vld [vmem:[%s9735_s7] sm:$0xff] }
 0x9c8   : > { %v1865_v17 = vpop.permute.xlu0 %1864  ;;  %6290 = vmatprep.subr.mxu0 %v9963_v18 }
 0x9c9   : > { %v1867_v2 = vsel %vm7634_vm3, %v9988_v42, %v1865_v17  ;;  %6291 = vmatpush3.msra.mxu0 %v2162_v46 }
 0x9ca   : > { %1869 = vrot.lane.b32.xlu0 %v1867_v2, %s9842_s20  ;;  %6306 = vmatprep.subr.mxu0 %v9963_v18 }
 0x9ce   : > { %1875 = vrot.lane.b32.xlu0 %v1873_v14, %s9800_s16  ;;  %s4440_s16 = scalar_select %p3179_p0, 1, 0 }
 0xa1c   : > { %v1838_v52 = vpop.f32.mrf.mxu0 }
 0xa1d   : > { %v1839_v63 = vadd.f32 %v1838_v52, %v9991_v22 }
 0xa1e   : > { %v6250_v15 = vpop.f32.mrf.mxu0 }
 0xa1f   : > { %6567 = vtanh.f32 %v1839_v63 }
 0xa2c   : > { %v6568_v11 = vpop.eup %6567 }
 0xa2d   : > { %1844 = vst.msk [vmem:[%s6951_s17] sm:$0x3] %vm1843_vm0, %v6568_v11  ;;  %v1879_v29 = vsel %vm7634_vm3, %v6568_v11, %v6636_v13  ;;  %vm10030_vm3 = vcmask 589312  }
 0xa2e   : > { %1880 = vst.msk [vmem:[#allocation4] sm:$0x3] %vm1843_vm0, %v1879_v29 }
 0xa35   : > { %v1883_v41 = vld [vmem:[#allocation4] sm:$0x3] }
 0xa36   : > { %6260 = vmatmul.mubr.msk.f32.vlgmr.msra.gmra.mxu1 %vm559_vm1, %v1883_v41 }
 0xa37   : > { %6281 = vmatprep.mubr.msk.f32.mxu1 %vm6791_vm2, %v9963_v18  ;;  %6274 = vmatpush3.msra.mxu1 %v2079_v59 }
 0xa38   : > { %6275 = vmatprep.subr.mxu1 %v9963_v18 }
 0xa39   : > { %6276 = vmatpush3.msra.mxu1 %v2078_v1 }
 0xa3a   : > { %6277 = vmatprep.subr.mxu1 %v9963_v18 }
 0xa3b   : > { %6278 = vmatpush3.msra.mxu1 %v2077_v44 }
 0xa3c   : > { %v1870_v58 = vpop.permute.xlu0 %1869  ;;  %6279 = vmatprep.subr.mxu1 %v9963_v18 }
 0xa3d   : > { %1872 = vst.msk [vmem:[#allocation2 + $0x2] sm:$0x3] %vm1843_vm0, %v1870_v58  ;;  %6280 = vmatpush3.msra.mxu1 %v2076_v60  ;;  %v7911_v60 = vld [vmem:[%s9729_s1 + $0x8] sm:$0xff] }
 0xa3e   : > { %6295 = vmatprep.subr.mxu1 %v9963_v18 }
 0xa40   : > { %v1876_v16 = vpop.permute.xlu0 %1875 }
 0xa41   : > { %1878 = vst.msk [vmem:[#allocation3 + $0x2] sm:$0x3] %vm1843_vm0, %v1876_v16 }
 0xa44   : > { %v1886_v4 = vld [vmem:[#allocation2 + $0x2] sm:$0x3] }
 0xa45   : > { %6293 = vmatmul.mubr.msk.f32.vlgmr.msra.gmra.mxu0 %vm559_vm1, %v1886_v4 }
 0xa46   : > { %6314 = vmatprep.mubr.msk.f32.mxu0 %vm6791_vm2, %v9963_v18 }
 0xa48   : > { %v1887_v55 = vld [vmem:[#allocation3 + $0x2] sm:$0x3] }
 0xa49   : > { %2249 = vrot.lane.b32.xlu0 %v1887_v55, %s9842_s20 }
 0xa82   : > { %v2041_v21 = vpop.f32.mrf.mxu0 }
 0xa84   : > { %v6272_v26 = vpop.f32.mrf.mxu0 }
 0xabb   : > { %v7855_v4 = vpop.permute.xlu0 %2249 }
 0xabc   : > { %9995 = vst [vmem:[#allocation29_spill] sm:$0xff] %v7855_v4 }
 0xaf6   : > { %v1963_v48 = vpop.f32.mrf.mxu1 }
 0xaf7   : > { %v1967_v40 = vadd.f32 %v5980_v5, %v1963_v48  ;;  %v2272_v5 = vld [vmem:[%s9738_s10 + $0x18] sm:$0xff] }
 0xaf8   : > { %v6261_v43 = vpop.f32.mrf.mxu1  ;;  %v2992_v48 = vld [vmem:[%s9740_s12 + $0x18] sm:$0xff] }
 0xaf9   : > { %v2045_v7 = vadd.f32 %v2041_v21, %v1967_v40  ;;  %v2271_v40 = vld [vmem:[%s9738_s10 + $0x10] sm:$0xff]  ;;  %6307 = vmatpush3.msra.mxu0 %v2992_v48 }
 0xafa   : > { %v2991_v43 = vld [vmem:[%s9740_s12 + $0x10] sm:$0xff]  ;;  %6308 = vmatprep.subr.mxu0 %v9963_v18 }
 0xafb   : > { %v5983_v19 = vmul.f32 -1.442695, %v2045_v7  ;;  %6309 = vmatpush3.msra.mxu0 %v2991_v43  ;;  %v7969_v48 = vld [vmem:[%s9729_s1 + $0x90] sm:$0xff] }
 0xafc   : > { %6310 = vmatprep.subr.mxu0 %v9963_v18  ;;  %10003 = vst [vmem:[#allocation38_spill] sm:$0xff] %v7969_v48 }
 0xafd   : > { %6569 = vpow2.f32 %v5983_v19  ;;  %v2990_v19 = vld [vmem:[%s9740_s12 + $0x8] sm:$0xff] }
 0xafe   : > { %6571 = vtanh.f32 %v2045_v7  ;;  %v2270_v7 = vld [vmem:[%s9738_s10 + $0x8] sm:$0xff]  ;;  %6311 = vmatpush3.msra.mxu0 %v2990_v19 }
 0xaff   : > { %6312 = vmatprep.subr.mxu0 %v9963_v18 }
 0xb05   : > { %v2235_v0 = vpop.f32.mrf.mxu0 }
 0xb07   : > { %v6294_v24 = vpop.f32.mrf.mxu0 }
 0xb08   : > { %v2989_v24 = vld [vmem:[%s9740_s12] sm:$0xff] }
 0xb09   : > { %6313 = vmatpush3.msra.mxu0 %v2989_v24  ;;  %v7985_v24 = vld [vmem:[%s9729_s1 + $0x98] sm:$0xff] }
 0xb0a   : > { %v6570_v53 = vpop.eup %6569  ;;  %6328 = vmatprep.subr.mxu0 %v9963_v18  ;;  %10005 = vst [vmem:[#allocation40_spill] sm:$0xff] %v7985_v24 }
 0xb0b   : > { %v2050_v32 = vadd.f32 1.0, %v6570_v53  ;;  %v6572_v25 = vpop.eup %6571 }
 0xb0d   : > { %6573 = vrcp.f32 %v2050_v32 }
 0xb1a   : > { %v6574_v6 = vpop.eup %6573 }
 0xb1b   : > { %v2053_v37 = vsel %vm7024_vm5, %v6572_v25, %v6574_v6 }
 0xb1c   : > { %2060 = vrot.lane.b32.xlu1 %v2053_v37, %s9993_s30  ;;  %v2058_v54 = vmul.f32 %v7779_v9, %v2053_v37 }
 0xb8e   : > { %v2061_v35 = vpop.permute.xlu1 %2060 }
 0xb8f   : > { %v2063_v38 = vmul.f32 %v2061_v35, %v2053_v37 }
 0xb91   : > { %2065 = vrot.lane.b32.xlu1 %v2063_v38, %s9842_s20  ;;  %v9999_v38 = vld [vmem:[#allocation27_spill] sm:$0xff] }
 0xc03   : > { %v2066_v61 = vpop.permute.xlu1 %2065 }
 0xc04   : > { %v7821_v45 = vadd.f32 %v2066_v61, %v2058_v54 }
 0xc06   : > { %6575 = vtanh.f32 %v7821_v45 }
 0xc13   : > { %v6576_v46 = vpop.eup %6575 }
 0xc14   : > { %2071 = vrot.lane.b32.xlu1 %v6576_v46, %s9993_s30  ;;  %v7916_v46 = vld [vmem:[%s9729_s1] sm:$0xff] }
 0xc86   : > { %v2072_v17 = vpop.permute.xlu1 %2071 }
 0xc87   : > { %v7841_v42 = vmul.f32 %v2072_v17, %v2053_v37 }
 0xc89   : > { %9994 = vst [vmem:[#allocation30_spill] sm:$0xff] %v7841_v42  ;;  %2081 = vrot.lane.b32.xlu1 %v7841_v42, %s9842_s20 }
 0xcfb   : > { %v2082_v2 = vpop.permute.xlu1 %2081 }
 0xcfc   : > { %6282 = vmatmul.mubr.msk.f32.vlgmr.msra.gmra.mxu1 %vm559_vm1, %v2082_v2 }
 0xcfd   : > { %6303 = vmatprep.mubr.msk.f32.mxu1 %vm6791_vm2, %v9963_v18  ;;  %6296 = vmatpush3.msra.mxu1 %v2272_v5  ;;  %v7964_v5 = vld [vmem:[%s9729_s1 + $0x20] sm:$0xff] }
 0xcfe   : > { %6297 = vmatprep.subr.mxu1 %v9963_v18  ;;  %10002 = vst [vmem:[#allocation35_spill] sm:$0xff] %v7964_v5 }
 0xcff   : > { %6298 = vmatpush3.msra.mxu1 %v2271_v40 }
 0xd00   : > { %6299 = vmatprep.subr.mxu1 %v9963_v18 }
 0xd01   : > { %6300 = vmatpush3.msra.mxu1 %v2270_v7 }
 0xd02   : > { %6301 = vmatprep.subr.mxu1 %v9963_v18 }
 0xdbc   : > { %v2151_v39 = vpop.f32.mrf.mxu1 }
 0xdbd   : > { %v2161_v14 = vadd.f32 %v5985_v62, %v2151_v39  ;;  %v7925_v62 = vld [vmem:[%s9729_s1 + $0x10] sm:$0xff]  ;;  %v7930_v39 = vld [vmem:[%s9729_s1 + $0x80] sm:$0xff] }
 0xdbe   : > { %v6283_v52 = vpop.f32.mrf.mxu1  ;;  %10000 = vst [vmem:[#allocation33_spill] sm:$0xff] %v7930_v39 }
 0xdbf   : > { %v2239_v22 = vadd.f32 %v2235_v0, %v2161_v14  ;;  %v2269_v0 = vld [vmem:[%s9738_s10] sm:$0xff] }
 0xdc0   : > { %6302 = vmatpush3.msra.mxu1 %v2269_v0  ;;  %v7980_v0 = vld [vmem:[%s9729_s1 + $0x28] sm:$0xff] }
 0xdc1   : > { %v5987_v63 = vmul.f32 -1.442695, %v2239_v22  ;;  %6317 = vmatprep.subr.mxu1 %v9963_v18  ;;  %10004 = vst [vmem:[#allocation37_spill] sm:$0xff] %v7980_v0 }
 0xdc3   : > { %6577 = vpow2.f32 %v5987_v63 }
 0xdc4   : > { %6579 = vtanh.f32 %v2239_v22 }
 0xdd0   : > { %v6578_v15 = vpop.eup %6577 }
 0xdd1   : > { %v2244_v11 = vadd.f32 1.0, %v6578_v15  ;;  %v6580_v13 = vpop.eup %6579 }
 0xdd3   : > { %6581 = vrcp.f32 %v2244_v11 }
 0xde0   : > { %v6582_v29 = vpop.eup %6581 }
 0xde1   : > { %v2247_v41 = vsel %vm7024_vm5, %v6580_v13, %v6582_v29  ;;  %v7948_v29 = vld [vmem:[%s9729_s1 + $0x18] sm:$0xff] }
 0xde2   : > { %2254 = vrot.lane.b32.xlu1 %v2247_v41, %s9993_s30  ;;  %v2252_v55 = vmul.f32 %v7855_v4, %v2247_v41 }
 0xe54   : > { %v2255_v58 = vpop.permute.xlu1 %2254 }
 0xe55   : > { %v2257_v16 = vmul.f32 %v2255_v58, %v2247_v41 }
 0xe57   : > { %2259 = vrot.lane.b32.xlu1 %v2257_v16, %s9842_s20 }
 0xec9   : > { %v2260_v21 = vpop.permute.xlu1 %2259 }
 0xeca   : > { %v7858_v26 = vadd.f32 %v2260_v21, %v2252_v55 }
 0xecc   : > { %9996 = vst [vmem:[#allocation32_spill] sm:$0xff] %v7858_v26  ;;  %6583 = vtanh.f32 %v7858_v26 }
 0xed9   : > { %v6584_v53 = vpop.eup %6583 }
 0xeda   : > { %2265 = vrot.lane.b32.xlu0 %v6584_v53, %s9993_s30 }
 0xf4c   : > { %v2266_v32 = vpop.permute.xlu0 %2265 }
 0xf4d   : > { %v7894_v25 = vmul.f32 %v2266_v32, %v2247_v41  ;;  %v7953_v41 = vld [vmem:[%s9729_s1 + $0x88] sm:$0xff] }
 0xf4e   : > { %10001 = vst [vmem:[#allocation36_spill] sm:$0xff] %v7953_v41 }
 0xf4f   : > { %9997 = vst [vmem:[#allocation31_spill] sm:$0xff] %v7894_v25  ;;  %2274 = vrot.lane.b32.xlu1 %v7894_v25, %s9842_s20  ;;  %s10072_s20 = smov 32  }
 0xfc1   : > { %v2275_v6 = vpop.permute.xlu1 %2274 }
 0xfc2   : > { %6304 = vmatmul.mubr.msk.f32.vlgmr.msra.gmra.mxu1 %vm559_vm1, %v2275_v6  ;;  %6315 = vmatmul.mubr.msk.f32.vlgmr.msra.gmra.mxu0 %vm559_vm1, %v2275_v6 }
 0xfc3   : > { %6325 = vmatprep.mubr.msk.f32.mxu1 %vm6791_vm2, %v9963_v18  ;;  %6336 = vmatprep.mubr.msk.f32.mxu0 %vm6791_vm2, %v9963_v18 }
0x1082   : > { %v2344_v37 = vpop.f32.mrf.mxu1  ;;  %v7904_v35 = vpop.f32.mrf.mxu0 }
0x1083   : > { %9998 = vst [vmem:[#allocation34_spill] sm:$0xff] %v7904_v35  ;;  %v2387_v54 = vrot.slane %v2344_v37, %v9999_v38 }
0x1084   : > { %v6305_v61 = vpop.f32.mrf.mxu1  ;;  %v6316_v59 = vpop.f32.mrf.mxu0 }
0x1085   : > { %v2388_v1 = vcombine.high %v2387_v54, %v2387_v54  ;;  %v2395_v44 = vrot.slane %v2387_v54, %v9999_v38  ;;  %v7996_v54 = vld [vmem:[%s9729_s1 + $0x30] sm:$0xff]  ;;  %v8001_v61 = vld [vmem:[%s9729_s1 + $0xa0] sm:$0xff] }
0x1086   : > { %10006 = vst [vmem:[#allocation39_spill] sm:$0xff] %v7996_v54  ;;  %10007 = vst [vmem:[#allocation42_spill] sm:$0xff] %v8001_v61 }
0x1087   : > { %v2402_v17 = vrot.slane %v2388_v1, %v9999_v38  ;;  %v7920_v2 = vrot.slane %v2395_v44, %v7149_v33 }
0x1089   : > { %v7933_v14 = vrot.slane %v2402_v17, %v7149_v33  ;;  %v2414_v52 = vmul.f32 %v7920_v2, %v7911_v60  ;;  %v2413_v22 = vmul.f32 %v7920_v2, %v7916_v46  ;;  %v2415_v11 = vmul.f32 %v7920_v2, %v7925_v62 }
0x108a   : > { %v2416_v55 = vmul.f32 %v7920_v2, %v7948_v29  ;;  %v2417_v7 = vmul.f32 %v7920_v2, %v7964_v5  ;;  %v2418_v6 = vmul.f32 %v7920_v2, %v7980_v0  ;;  %v2419_v44 = vmul.f32 %v7920_v2, %v7996_v54 }
0x108b   : > { %v2448_v63 = vsel %vm559_vm1, %v2414_v52, 0.0  ;;  %v2445_v15 = vsel %vm559_vm1, %v2413_v22, 0.0  ;;  %v2429_v13 = vmul.f32 %v7933_v14, %v7930_v39  ;;  %v2451_v58 = vsel %vm559_vm1, %v2415_v11, 0.0  ;;  %v8012_v52 = vld [vmem:[%s9729_s1 + $0x38] sm:$0xff]  ;;  %v8017_v22 = vld [vmem:[%s9729_s1 + $0xa8] sm:$0xff] }
0x108c   : > { %2449 = vadd.xlane.f32.xlu1 %v2448_v63  ;;  %2446 = vadd.xlane.f32.xlu0 %v2445_v15  ;;  %v2430_v21 = vmul.f32 %v7933_v14, %v7953_v41  ;;  %v2454_v40 = vsel %vm559_vm1, %v2416_v55, 0.0  ;;  %v2431_v19 = vmul.f32 %v7933_v14, %v7969_v48  ;;  %v2457_v53 = vsel %vm559_vm1, %v2417_v7, 0.0  ;;  %10008 = vst [vmem:[#allocation41_spill] sm:$0xff] %v8012_v52  ;;  %v8044_v7 = vld [vmem:[%s9729_s1 + $0x48] sm:$0xff] }
0x108d   : > { %v2493_v16 = vsel %vm559_vm1, %v2429_v13, 0.0  ;;  %v2432_v37 = vmul.f32 %v7933_v14, %v7985_v24  ;;  %v2460_v59 = vsel %vm559_vm1, %v2418_v6, 0.0  ;;  %v2433_v17 = vmul.f32 %v7933_v14, %v8001_v61  ;;  %10009 = vst [vmem:[#allocation44_spill] sm:$0xff] %v8017_v22  ;;  %10012 = vst [vmem:[#allocation46_spill] sm:$0xff] %v8044_v7  ;;  %v10028_v24 = vld [vmem:[#allocation52_spill] sm:$0xff]  ;;  %v10029_v39 = vld [vmem:[#allocation53_spill] sm:$0xff] }
0x108e   : > { %v2496_v43 = vsel %vm559_vm1, %v2430_v21, 0.0  ;;  %v2499_v32 = vsel %vm559_vm1, %v2431_v19, 0.0  ;;  %v2463_v63 = vsel %vm559_vm1, %v2419_v44, 0.0  ;;  %v2420_v11 = vmul.f32 %v7920_v2, %v8012_v52  ;;  %v8049_v19 = vld [vmem:[%s9729_s1 + $0xb8] sm:$0xff] }
0x108f   : > { %v2502_v1 = vsel %vm559_vm1, %v2432_v37, 0.0  ;;  %v2505_v15 = vsel %vm559_vm1, %v2433_v17, 0.0  ;;  %v2434_v13 = vmul.f32 %v7933_v14, %v8017_v22  ;;  %10013 = vst [vmem:[#allocation47_spill] sm:$0xff] %v8049_v19  ;;  %v2422_v6 = vmul.f32 %v7920_v2, %v8044_v7 }
0x1090   : > { %2452 = vadd.xlane.f32.xlu1 %v2451_v58  ;;  %2494 = vadd.xlane.f32.xlu0 %v2493_v16  ;;  %v8028_v58 = vld [vmem:[%s9729_s1 + $0x40] sm:$0xff]  ;;  %v8033_v16 = vld [vmem:[%s9729_s1 + $0xb0] sm:$0xff]  ;;  %v2466_v55 = vsel %vm559_vm1, %v2420_v11, 0.0  ;;  %v2436_v37 = vmul.f32 %v7933_v14, %v8049_v19  ;;  %v8076_v11 = vld [vmem:[%s9729_s1 + $0x58] sm:$0xff] }
0x1091   : > { %10010 = vst [vmem:[#allocation43_spill] sm:$0xff] %v8028_v58  ;;  %10011 = vst [vmem:[#allocation45_spill] sm:$0xff] %v8033_v16  ;;  %v2508_v21 = vsel %vm559_vm1, %v2434_v13, 0.0  ;;  %v2472_v44 = vsel %vm559_vm1, %v2422_v6, 0.0  ;;  %v8081_v13 = vld [vmem:[%s9729_s1 + $0xc8] sm:$0xff] }
0x1092   : > { %v2514_v17 = vsel %vm559_vm1, %v2436_v37, 0.0  ;;  %10016 = vst [vmem:[#allocation50_spill] sm:$0xff] %v8076_v11  ;;  %10017 = vst [vmem:[#allocation23_spill] sm:$0xff] %v8081_v13 }
0x1094   : > { %2455 = vadd.xlane.f32.xlu1 %v2454_v40  ;;  %2497 = vadd.xlane.f32.xlu0 %v2496_v43  ;;  %v2421_v40 = vmul.f32 %v7920_v2, %v8028_v58  ;;  %v2435_v43 = vmul.f32 %v7933_v14, %v8033_v16 }
0x1098   : > { %2458 = vadd.xlane.f32.xlu1 %v2457_v53  ;;  %2500 = vadd.xlane.f32.xlu0 %v2499_v32  ;;  %v2469_v53 = vsel %vm559_vm1, %v2421_v40, 0.0  ;;  %v2511_v32 = vsel %vm559_vm1, %v2435_v43, 0.0  ;;  %v2424_v40 = vmul.f32 %v7920_v2, %v8076_v11  ;;  %v2438_v43 = vmul.f32 %v7933_v14, %v8081_v13 }
0x109a   : > { %v2478_v6 = vsel %vm559_vm1, %v2424_v40, 0.0  ;;  %v2520_v37 = vsel %vm559_vm1, %v2438_v43, 0.0 }
0x109c   : > { %2461 = vadd.xlane.f32.xlu1 %v2460_v59  ;;  %2503 = vadd.xlane.f32.xlu0 %v2502_v1  ;;  %v8060_v59 = vld [vmem:[%s9729_s1 + $0x50] sm:$0xff]  ;;  %v8065_v1 = vld [vmem:[%s9729_s1 + $0xc0] sm:$0xff] }
0x109d   : > { %10014 = vst [vmem:[#allocation48_spill] sm:$0xff] %v8060_v59  ;;  %10015 = vst [vmem:[#allocation49_spill] sm:$0xff] %v8065_v1 }
0x10a0   : > { %2464 = vadd.xlane.f32.xlu1 %v2463_v63  ;;  %2506 = vadd.xlane.f32.xlu0 %v2505_v15  ;;  %v2423_v63 = vmul.f32 %v7920_v2, %v8060_v59  ;;  %v2437_v15 = vmul.f32 %v7933_v14, %v8065_v1 }
0x10a4   : > { %2467 = vadd.xlane.f32.xlu1 %v2466_v55  ;;  %2509 = vadd.xlane.f32.xlu0 %v2508_v21  ;;  %v2475_v55 = vsel %vm559_vm1, %v2423_v63, 0.0  ;;  %v2517_v21 = vsel %vm559_vm1, %v2437_v15, 0.0  ;;  %v8108_v63 = vld [vmem:[%s9729_s1 + $0x68] sm:$0xff]  ;;  %v8113_v15 = vld [vmem:[%s9729_s1 + $0xd8] sm:$0xff] }
0x10a5   : > { %10020 = vst [vmem:[#allocation24_spill] sm:$0xff] %v8108_v63  ;;  %10021 = vst [vmem:[#allocation25_spill] sm:$0xff] %v8113_v15  ;;  %v2426_v40 = vmul.f32 %v7920_v2, %v8108_v63  ;;  %v2440_v43 = vmul.f32 %v7933_v14, %v8113_v15 }
0x10a8   : > { %2470 = vadd.xlane.f32.xlu1 %v2469_v53  ;;  %2512 = vadd.xlane.f32.xlu0 %v2511_v32  ;;  %v8092_v53 = vld [vmem:[%s9729_s1 + $0x60] sm:$0xff]  ;;  %v8097_v32 = vld [vmem:[%s9729_s1 + $0xd0] sm:$0xff] }
0x10a9   : > { %10018 = vst [vmem:[#allocation51_spill] sm:$0xff] %v8092_v53  ;;  %10019 = vst [vmem:[#allocation26_spill] sm:$0xff] %v8097_v32 }
0x10ac   : > { %2473 = vadd.xlane.f32.xlu1 %v2472_v44  ;;  %2515 = vadd.xlane.f32.xlu0 %v2514_v17  ;;  %v2425_v44 = vmul.f32 %v7920_v2, %v8092_v53  ;;  %v2439_v17 = vmul.f32 %v7933_v14, %v8097_v32 }
0x10b0   : > { %2476 = vadd.xlane.f32.xlu1 %v2475_v55  ;;  %2518 = vadd.xlane.f32.xlu0 %v2517_v21  ;;  %v2481_v55 = vsel %vm559_vm1, %v2425_v44, 0.0  ;;  %v2523_v21 = vsel %vm559_vm1, %v2439_v17, 0.0  ;;  %v2484_v44 = vsel %vm559_vm1, %v2426_v40, 0.0  ;;  %v2526_v17 = vsel %vm559_vm1, %v2440_v43, 0.0 }
0x10b4   : > { %2479 = vadd.xlane.f32.xlu1 %v2478_v6  ;;  %2521 = vadd.xlane.f32.xlu0 %v2520_v37  ;;  %v8124_v6 = vld [vmem:[%s9729_s1 + $0x70] sm:$0xff]  ;;  %v8129_v37 = vld [vmem:[%s9729_s1 + $0xe0] sm:$0xff] }
0x10b5   : > { %10022 = vst [vmem:[#allocation28_spill] sm:$0xff] %v8124_v6  ;;  %10023 = vst [vmem:[#allocation54_spill] sm:$0xff] %v8129_v37  ;;  %v2427_v38 = vmul.f32 %v7920_v2, %v8124_v6 }
0x10b7   : > { %v2487_v40 = vsel %vm559_vm1, %v2427_v38, 0.0 }
0x10b8   : > { %2482 = vadd.xlane.f32.xlu1 %v2481_v55  ;;  %2524 = vadd.xlane.f32.xlu0 %v2523_v21  ;;  %v2441_v55 = vmul.f32 %v7933_v14, %v8129_v37  ;;  %v8140_v21 = vld [vmem:[%s9729_s1 + $0x78] sm:$0xff] }
0x10b9   : > { %10024 = vst [vmem:[#allocation55_spill] sm:$0xff] %v8140_v21  ;;  %v2428_v35 = vmul.f32 %v7920_v2, %v8140_v21  ;;  %v8165_v2 = vld [vmem:[%s9729_s1 + $0xf8] sm:$0xff] }
0x10ba   : > { %v2529_v43 = vsel %vm559_vm1, %v2441_v55, 0.0  ;;  %10027 = vst [vmem:[#allocation58_spill] sm:$0xff] %v8165_v2 }
0x10bb   : > { %v2490_v26 = vsel %vm559_vm1, %v2428_v35, 0.0 }
0x10bc   : > { %2485 = vadd.xlane.f32.xlu1 %v2484_v44  ;;  %2527 = vadd.xlane.f32.xlu0 %v2526_v17  ;;  %v2442_v44 = vmul.f32 %v7933_v14, %v8145_v8  ;;  %v8156_v17 = vld [vmem:[%s9729_s1 + $0xf0] sm:$0xff] }
0x10bd   : > { %10026 = vst [vmem:[#allocation57_spill] sm:$0xff] %v8156_v17  ;;  %v2443_v38 = vmul.f32 %v7933_v14, %v8156_v17 }
0x10be   : > { %v2532_v4 = vsel %vm559_vm1, %v2442_v44, 0.0 }
0x10bf   : > { %v2535_v55 = vsel %vm559_vm1, %v2443_v38, 0.0 }
0x10c0   : > { %2488 = vadd.xlane.f32.xlu1 %v2487_v40  ;;  %2530 = vadd.xlane.f32.xlu0 %v2529_v43  ;;  %v2444_v40 = vmul.f32 %v7933_v14, %v8165_v2 }
0x10c2   : > { %v2538_v35 = vsel %vm559_vm1, %v2444_v40, 0.0 }
0x10c4   : > { %2491 = vadd.xlane.f32.xlu1 %v2490_v26  ;;  %2533 = vadd.xlane.f32.xlu0 %v2532_v4 }
0x10c8   : > { %2536 = vadd.xlane.f32.xlu0 %v2535_v55 }
0x10cc   : > { %2539 = vadd.xlane.f32.xlu0 %v2538_v35 }
0x1115   : > { %v2450_v43 = vpop.xlane.xlu1 %2449  ;;  %v2447_v44 = vpop.xlane.xlu0 %2446 }
0x1116   : > { %v2580_v16 = vrot.slane %v2450_v43, %v7464_v50  ;;  %v2576_v7 = vrot.slane %v2447_v44, %v7468_v3 }
0x1118   : > { %v2581_v43 = vsel %vm1254_vm6, %v2580_v16, %v2576_v7 }
0x1119   : > { %v2453_v25 = vpop.xlane.xlu1 %2452  ;;  %v2495_v17 = vpop.xlane.xlu0 %2494 }
0x111a   : > { %v2585_v58 = vrot.slane %v2453_v25, %v7474_v36  ;;  %v2655_v52 = vrot.slane %v2495_v17, %v7468_v3 }
0x111d   : > { %v2456_v26 = vpop.xlane.xlu1 %2455  ;;  %v2498_v4 = vpop.xlane.xlu0 %2497 }
0x111e   : > { %v2659_v22 = vrot.slane %v2498_v4, %v7464_v50  ;;  %v2590_v54 = vrot.slane %v2456_v26, %v10028_v24 }
0x1120   : > { %v2660_v44 = vsel %vm1254_vm6, %v2659_v22, %v2655_v52 }
0x1121   : > { %v2459_v42 = vpop.xlane.xlu1 %2458  ;;  %v2501_v8 = vpop.xlane.xlu0 %2500 }
0x1122   : > { %v2664_v61 = vrot.slane %v2501_v8, %v7474_v36  ;;  %v2595_v0 = vrot.slane %v2459_v42, %v10029_v39  ;;  %v2586_v8 = vsel %vm1261_vm7, %v2585_v58, %v2581_v43 }
0x1124   : > { %v2665_v17 = vsel %vm1261_vm7, %v2664_v61, %v2660_v44 }
0x1125   : > { %v2462_v21 = vpop.xlane.xlu1 %2461  ;;  %v2504_v37 = vpop.xlane.xlu0 %2503 }
0x1126   : > { %v2669_v48 = vrot.slane %v2504_v37, %v10028_v24  ;;  %v2600_v4 = vrot.slane %v2462_v21, %v7490_v31 }
0x1129   : > { %v2465_v6 = vpop.xlane.xlu1 %2464  ;;  %v2507_v15 = vpop.xlane.xlu0 %2506 }
0x112a   : > { %v2674_v41 = vrot.slane %v2507_v15, %v10029_v39  ;;  %v2605_v26 = vrot.slane %v2465_v6, %v7495_v51  ;;  %v2591_v15 = vsel %vm9841_vm8, %v2590_v54, %v2586_v8  ;;  %v2670_v39 = vsel %vm9841_vm8, %v2669_v48, %v2665_v17 }
0x112b   : > { %v2596_v22 = vsel %vm9839_vm9, %v2595_v0, %v2591_v15 }
0x112c   : > { %v2675_v7 = vsel %vm9839_vm9, %v2674_v41, %v2670_v39  ;;  %v2601_v6 = vsel %vm9837_vm10, %v2600_v4, %v2596_v22 }
0x112d   : > { %v2468_v38 = vpop.xlane.xlu1 %2467  ;;  %v2510_v32 = vpop.xlane.xlu0 %2509 }
0x112e   : > { %v2679_v25 = vrot.slane %v2510_v32, %v7490_v31  ;;  %v2610_v16 = vrot.slane %v2468_v38, %v7498_v20  ;;  %v2606_v38 = vsel %vm9838_vm11, %v2605_v26, %v2601_v6 }
0x1130   : > { %v2680_v21 = vsel %vm9837_vm10, %v2679_v25, %v2675_v7  ;;  %v2611_v41 = vsel %vm9840_vm12, %v2610_v16, %v2606_v38  ;;  %vm10031_vm10 = vmmov %vm10030_vm3 }
0x1131   : > { %v2471_v63 = vpop.xlane.xlu1 %2470  ;;  %v2513_v14 = vpop.xlane.xlu0 %2512 }
0x1132   : > { %v2684_v37 = vrot.slane %v2513_v14, %v7495_v51  ;;  %v2615_v58 = vrot.slane %v2471_v63, %v7502_v30 }
0x1135   : > { %v2474_v55 = vpop.xlane.xlu1 %2473  ;;  %v2516_v2 = vpop.xlane.xlu0 %2515 }
0x1136   : > { %v2689_v52 = vrot.slane %v2516_v2, %v7498_v20  ;;  %v2620_v54 = vrot.slane %v2474_v55, %v7505_v56  ;;  %v2685_v2 = vsel %vm9838_vm11, %v2684_v37, %v2680_v21  ;;  %v2616_v55 = vsel %vm10030_vm3, %v2615_v58, %v2611_v41 }
0x1137   : > { %vm10032_vm11 = vcmask 654912  }
0x1138   : > { %v2690_v63 = vsel %vm9840_vm12, %v2689_v52, %v2685_v2  ;;  %v2621_v4 = vsel %vm10032_vm11, %v2620_v54, %v2616_v55  ;;  %vm10033_vm9 = vmmov %vm10032_vm11  ;;  %vm10034_vm12 = vcmask 720512  }
0x1139   : > { %v2477_v40 = vpop.xlane.xlu1 %2476  ;;  %v2519_v35 = vpop.xlane.xlu0 %2518  ;;  %vm10035_vm3 = vmmov %vm10034_vm12 }
0x113a   : > { %v2694_v61 = vrot.slane %v2519_v35, %v7502_v30  ;;  %v2625_v0 = vrot.slane %v2477_v40, %v7520_v28 }
0x113c   : > { %v2626_v8 = vsel %vm10034_vm12, %v2625_v0, %v2621_v4  ;;  %vm10041_vm12 = vcmask 1041408  }
0x113d   : > { %v8171_v13 = vpop.xlane.xlu1 %2479  ;;  %v2522_v53 = vpop.xlane.xlu0 %2521 }
0x113e   : > { %v2699_v48 = vrot.slane %v2522_v53, %v7505_v56  ;;  %v2630_v14 = vrot.slane %v8171_v13, %v7527_v10  ;;  %v2695_v53 = vsel %vm10031_vm10, %v2694_v61, %v2690_v63  ;;  %vm10036_vm10 = vcmask 786112  }
0x113f   : > { %vm10037_vm8 = vmmov %vm10036_vm10 }
0x1140   : > { %v2700_v25 = vsel %vm10033_vm9, %v2699_v48, %v2695_v53  ;;  %vm10038_vm9 = vcmask 851712  }
0x1141   : > { %v8173_v1 = vpop.xlane.xlu1 %2482  ;;  %v2525_v11 = vpop.xlane.xlu0 %2524  ;;  %vm10039_vm11 = vmmov %vm10038_vm9 }
0x1142   : > { %v2704_v39 = vrot.slane %v2525_v11, %v7520_v28  ;;  %v2635_v43 = vrot.slane %v8173_v1, %v7530_v23 }
0x1144   : > { %v2705_v17 = vsel %vm10035_vm3, %v2704_v39, %v2700_v25  ;;  %vm10042_vm3 = vmmov %vm10041_vm12 }
0x1145   : > { %v8175_v19 = vpop.xlane.xlu1 %2485  ;;  %v2528_v59 = vpop.xlane.xlu0 %2527 }
0x1146   : > { %v2709_v35 = vrot.slane %v2528_v59, %v7527_v10  ;;  %v2640_v13 = vrot.slane %v8175_v19, %v7539_v34 }
0x1148   : > { %v2710_v37 = vsel %vm10037_vm8, %v2709_v35, %v2705_v17  ;;  %vm10040_vm8 = vcmp.lt.s32.totalorder %v7020_v27, 8 }
0x1149   : > { %v2531_v5 = vpop.xlane.xlu0 %2530  ;;  %v2489_v42 = vpop.xlane.xlu1 %2488 }
0x114a   : > { %v2714_v40 = vrot.slane %v2531_v5, %v7530_v23  ;;  %v2645_v26 = vrot.slane %v2489_v42, %v7546_v57  ;;  %v2631_v5 = vsel %vm10036_vm10, %v2630_v14, %v2626_v8 }
0x114b   : > { %v2636_v16 = vsel %vm10038_vm9, %v2635_v43, %v2631_v5  ;;  %v8251_v43 = vstv %s3143_s23  ;;  %vm10114_vm9 = vcmask 261312   ;;  %s5737_s23 = scalar_select %p4476_p1, 1, 0 }
0x114c   : > { %v2715_v19 = vsel %vm10039_vm11, %v2714_v40, %v2710_v37  ;;  %v2641_v22 = vsel %vm1338_vm4, %v2640_v13, %v2636_v16  ;;  %vm3145_vm10 = vcmp.eq.s32.totalorder %v8251_v43, 1  ;;  %vm10115_vm11 = vmmov %vm10114_vm9 }
0x114d   : > { %v2534_v32 = vpop.xlane.xlu0 %2533  ;;  %v2492_v44 = vpop.xlane.xlu1 %2491  ;;  %v2646_v42 = vsel %vm1345_vm13, %v2645_v26, %v2641_v22  ;;  %v3155_v40 = vsel %vm3145_vm10, %v7821_v45, %v7779_v9  ;;  %v2985_v9 = vld [vmem:[%s9739_s11] sm:$0xff] }
0x114e   : > { %v2719_v59 = vrot.slane %v2534_v32, %v7539_v34  ;;  %v2650_v15 = vrot.slane %v2492_v44, %v7549_v47  ;;  %v2988_v44 = vld [vmem:[%s9739_s11 + $0x18] sm:$0xff] }
0x114f   : > { %6318 = vmatpush3.msra.mxu1 %v2988_v44 }
0x1150   : > { %v2720_v7 = vsel %vm1338_vm4, %v2719_v59, %v2715_v19  ;;  %v2651_v32 = vsel %vm1352_vm14, %v2650_v15, %v2646_v42  ;;  %6319 = vmatprep.subr.mxu1 %v9963_v18 }
0x1151   : > { %v2537_v11 = vpop.xlane.xlu0 %2536 }
0x1152   : > { %v2724_v1 = vrot.slane %v2537_v11, %v7546_v57  ;;  %v2987_v11 = vld [vmem:[%s9739_s11 + $0x10] sm:$0xff] }
0x1153   : > { %6320 = vmatpush3.msra.mxu1 %v2987_v11 }
0x1154   : > { %v2725_v61 = vsel %vm1345_vm13, %v2724_v1, %v2720_v7  ;;  %6321 = vmatprep.subr.mxu1 %v9963_v18 }
0x1155   : > { %v2540_v52 = vpop.xlane.xlu0 %2539 }
0x1156   : > { %v2729_v58 = vrot.slane %v2540_v52, %v7549_v47 }
0x1158   : > { %v2730_v6 = vsel %vm1352_vm14, %v2729_v58, %v2725_v61 }
0x1159   : > { %v2731_v21 = vsel %vm1433_vm15, %v2730_v6, %v2651_v32 }
0x115a   : > { %v2733_v54 = vsel %vm10040_vm8, %v2731_v21, -1e+30  ;;  %vm10116_vm8 = vcmask 326912  }
0x115b   : > { %v2734_v48 = vsel %vm10041_vm12, %v2733_v54, -inf  ;;  %vm10117_vm12 = vmmov %vm10116_vm8 }
0x115c   : > { %2735 = vmax.xlane.f32.xlu1 %v2734_v48 }
0x11e5   : > { %v2736_v38 = vpop.xlane.xlu1 %2735 }
0x11e6   : > { %v2737_v2 = vsub.f32 %v2733_v54, %v2736_v38  ;;  %v10044_v54 = vld [vmem:[#allocation35_spill] sm:$0xff] }
0x11e8   : > { %v2738_v0 = vmul.f32 1.442695, %v2737_v2 }
0x11ea   : > { %6585 = vpow2.f32 %v2738_v0 }
0x11f7   : > { %v6586_v39 = vpop.eup %6585 }
0x11f8   : > { %v2740_v41 = vsel %vm10042_vm3, %v6586_v39, 0.0  ;;  %vm10118_vm3 = vcmask 392512  }
0x11f9   : > { %2741 = vadd.xlane.f32.xlu0 %v2740_v41 }
0x1282   : > { %v2742_v63 = vpop.xlane.xlu0 %2741 }
0x1283   : > { %6587 = vrcp.f32 %v2742_v63 }
0x1290   : > { %v6588_v14 = vpop.eup %6587 }
0x1291   : > { %v2744_v35 = vmul.f32 %v6588_v14, %v6586_v39  ;;  %v10047_v14 = vld [vmem:[#allocation33_spill] sm:$0xff] }
0x1293   : > { %v2748_v55 = vrot.slane %v2744_v35, %v7149_v33  ;;  %5992 = vst [vmem:[%s6953_s21 + $0x2] sm:$0x3] %v2744_v35  ;;  %v2815_v53 = vrot.slane %v2744_v35, %v7626_v49 }
0x1295   : > { %2754 = vbcast.lane.b32.xlu0 %v2748_v55, 264  ;;  %2750 = vbcast.lane.b32.xlu1 %v2748_v55, 256 }
0x1299   : > { %2758 = vbcast.lane.b32.xlu0 %v2748_v55, 272  ;;  %2817 = vbcast.lane.b32.xlu1 %v2815_v53, 256 }
0x129d   : > { %2762 = vbcast.lane.b32.xlu0 %v2748_v55, 280  ;;  %2821 = vbcast.lane.b32.xlu1 %v2815_v53, 264 }
0x12a1   : > { %2766 = vbcast.lane.b32.xlu0 %v2748_v55, 288  ;;  %2825 = vbcast.lane.b32.xlu1 %v2815_v53, 272 }
0x12a5   : > { %2770 = vbcast.lane.b32.xlu0 %v2748_v55, 296  ;;  %2829 = vbcast.lane.b32.xlu1 %v2815_v53, 280 }
0x12a9   : > { %2774 = vbcast.lane.b32.xlu0 %v2748_v55, 304  ;;  %2833 = vbcast.lane.b32.xlu1 %v2815_v53, 288 }
0x12ad   : > { %2778 = vbcast.lane.b32.xlu0 %v2748_v55, 312  ;;  %2837 = vbcast.lane.b32.xlu1 %v2815_v53, 296 }
0x12b1   : > { %2782 = vbcast.lane.b32.xlu0 %v2748_v55, 320  ;;  %2841 = vbcast.lane.b32.xlu1 %v2815_v53, 304 }
0x12b5   : > { %2786 = vbcast.lane.b32.xlu0 %v2748_v55, 328  ;;  %2845 = vbcast.lane.b32.xlu1 %v2815_v53, 312 }
0x12b9   : > { %2790 = vbcast.lane.b32.xlu0 %v2748_v55, 336  ;;  %2849 = vbcast.lane.b32.xlu1 %v2815_v53, 320 }
0x12bd   : > { %2794 = vbcast.lane.b32.xlu0 %v2748_v55, 344  ;;  %2853 = vbcast.lane.b32.xlu1 %v2815_v53, 328 }
0x12c1   : > { %2798 = vbcast.lane.b32.xlu0 %v2748_v55, 352  ;;  %2857 = vbcast.lane.b32.xlu1 %v2815_v53, 336 }
0x12c5   : > { %2802 = vbcast.lane.b32.xlu0 %v2748_v55, 360  ;;  %2861 = vbcast.lane.b32.xlu1 %v2815_v53, 344 }
0x12c9   : > { %2806 = vbcast.lane.b32.xlu0 %v2748_v55, 368  ;;  %2865 = vbcast.lane.b32.xlu1 %v2815_v53, 352 }
0x12cd   : > { %2810 = vbcast.lane.b32.xlu0 %v2748_v55, 376  ;;  %2869 = vbcast.lane.b32.xlu1 %v2815_v53, 360 }
0x12d1   : > { %3146 = vrot.lane.b32.xlu0 %v7770_v12, %s10043_s26  ;;  %2873 = vbcast.lane.b32.xlu1 %v2815_v53, 368  ;;  %v2986_v12 = vld [vmem:[%s9739_s11 + $0x8] sm:$0xff] }
0x12d2   : > { %6322 = vmatpush3.msra.mxu1 %v2986_v12 }
0x12d3   : > { %6323 = vmatprep.subr.mxu1 %v9963_v18 }
0x12d4   : > { %6324 = vmatpush3.msra.mxu1 %v2985_v9 }
0x12d5   : > { %3157 = vrot.lane.b32.xlu0 %v3155_v40, %s10043_s26  ;;  %2877 = vbcast.lane.b32.xlu1 %v2815_v53, 376  ;;  %v10048_v53 = vld [vmem:[#allocation38_spill] sm:$0xff]  ;;  %v10049_v40 = vld [vmem:[#allocation39_spill] sm:$0xff] }
0x12d6   : > { %6339 = vmatprep.subr.mxu1 %v9963_v18 }
0x1307   : > { %v2755_v45 = vpop.permute.xlu0 %2754  ;;  %v2751_v4 = vpop.permute.xlu1 %2750 }
0x1308   : > { %v2880_v52 = vmul.f32 %v2755_v45, %v7911_v60  ;;  %v2879_v22 = vmul.f32 %v2751_v4, %v7916_v46  ;;  %v10045_v46 = vld [vmem:[#allocation36_spill] sm:$0xff] }
0x130a   : > { %v2912_v61 = vsel %vm559_vm1, %v2880_v52, 0.0  ;;  %v2911_v32 = vsel %vm559_vm1, %v2879_v22, 0.0  ;;  %v10052_v22 = vld [vmem:[#allocation42_spill] sm:$0xff] }
0x130b   : > { %v2759_v25 = vpop.permute.xlu0 %2758  ;;  %v2818_v13 = vpop.permute.xlu1 %2817  ;;  %v2913_v38 = vadd.f32 %v2912_v61, %v2911_v32 }
0x130c   : > { %v2881_v7 = vmul.f32 %v2759_v25, %v7925_v62  ;;  %v10046_v62 = vld [vmem:[#allocation37_spill] sm:$0xff]  ;;  %v2895_v35 = vmul.f32 %v2818_v13, %v10047_v14  ;;  %v10050_v25 = vld [vmem:[#allocation40_spill] sm:$0xff] }
0x130d   : > { %v10057_v14 = vld [vmem:[#allocation48_spill] sm:$0xff] }
0x130e   : > { %v2914_v21 = vsel %vm559_vm1, %v2881_v7, 0.0  ;;  %v10053_v7 = vld [vmem:[#allocation43_spill] sm:$0xff] }
0x130f   : > { %v2763_v59 = vpop.permute.xlu0 %2762  ;;  %v2822_v8 = vpop.permute.xlu1 %2821  ;;  %v2915_v63 = vadd.f32 %v2914_v21, %v2913_v38 }
0x1310   : > { %v2882_v6 = vmul.f32 %v2763_v59, %v7948_v29  ;;  %v2896_v39 = vmul.f32 %v2822_v8, %v10045_v46  ;;  %v10051_v8 = vld [vmem:[#allocation41_spill] sm:$0xff] }
0x1312   : > { %v2916_v60 = vsel %vm559_vm1, %v2882_v6, 0.0  ;;  %v2949_v45 = vsel %vm559_vm1, %v2896_v39, 0.0 }
0x1313   : > { %v2767_v17 = vpop.permute.xlu0 %2766  ;;  %v2826_v26 = vpop.permute.xlu1 %2825  ;;  %v2917_v11 = vadd.f32 %v2916_v60, %v2915_v63  ;;  %v10055_v60 = vld [vmem:[#allocation46_spill] sm:$0xff]  ;;  %v10056_v63 = vld [vmem:[#allocation45_spill] sm:$0xff] }
0x1314   : > { %v2883_v48 = vmul.f32 %v2767_v17, %v10044_v54  ;;  %v2897_v29 = vmul.f32 %v2826_v26, %v10048_v53 }
0x1316   : > { %v2918_v55 = vsel %vm559_vm1, %v2883_v48, 0.0  ;;  %v2951_v52 = vsel %vm559_vm1, %v2897_v29, 0.0 }
0x1317   : > { %v2771_v1 = vpop.permute.xlu0 %2770  ;;  %v2830_v5 = vpop.permute.xlu1 %2829  ;;  %v2919_v13 = vadd.f32 %v2918_v55, %v2917_v11  ;;  %v10058_v11 = vld [vmem:[#allocation47_spill] sm:$0xff] }
0x1318   : > { %v2884_v41 = vmul.f32 %v2771_v1, %v10046_v62  ;;  %v2898_v59 = vmul.f32 %v2830_v5, %v10050_v25  ;;  %v2948_v1 = vsel %vm559_vm1, %v2895_v35, 0.0 }
0x1319   : > { %v2950_v32 = vadd.f32 %v2949_v45, %v2948_v1  ;;  %v10059_v45 = vld [vmem:[#allocation50_spill] sm:$0xff]  ;;  %v10061_v1 = vld [vmem:[#allocation51_spill] sm:$0xff] }
0x131a   : > { %v2920_v4 = vsel %vm559_vm1, %v2884_v41, 0.0  ;;  %v2953_v48 = vsel %vm559_vm1, %v2898_v59, 0.0 }
0x131b   : > { %v2775_v37 = vpop.permute.xlu0 %2774  ;;  %v2834_v15 = vpop.permute.xlu1 %2833  ;;  %v2921_v6 = vadd.f32 %v2920_v4, %v2919_v13  ;;  %v2952_v39 = vadd.f32 %v2951_v52, %v2950_v32 }
0x131c   : > { %v2885_v44 = vmul.f32 %v2775_v37, %v10049_v40  ;;  %v2899_v37 = vmul.f32 %v2834_v15, %v10052_v22 }
0x131d   : > { %v2954_v55 = vadd.f32 %v2953_v48, %v2952_v39 }
0x131e   : > { %v2922_v26 = vsel %vm559_vm1, %v2885_v44, 0.0  ;;  %v2955_v41 = vsel %vm559_vm1, %v2899_v37, 0.0 }
0x131f   : > { %v2779_v16 = vpop.permute.xlu0 %2778  ;;  %v2838_v19 = vpop.permute.xlu1 %2837  ;;  %v2923_v62 = vadd.f32 %v2922_v26, %v2921_v6  ;;  %v2956_v25 = vadd.f32 %v2955_v41, %v2954_v55  ;;  %v10063_v6 = vld [vmem:[#allocation24_spill] sm:$0xff] }
0x1320   : > { %v2886_v17 = vmul.f32 %v2779_v16, %v10051_v8  ;;  %v10054_v16 = vld [vmem:[#allocation44_spill] sm:$0xff] }
0x1321   : > { %v2900_v38 = vmul.f32 %v2838_v19, %v10054_v16 }
0x1322   : > { %v2924_v5 = vsel %vm559_vm1, %v2886_v17, 0.0  ;;  %v10060_v17 = vld [vmem:[#allocation49_spill] sm:$0xff] }
0x1323   : > { %v2783_v58 = vpop.permute.xlu0 %2782  ;;  %v2842_v42 = vpop.permute.xlu1 %2841  ;;  %v2925_v53 = vadd.f32 %v2924_v5, %v2923_v62  ;;  %v2957_v44 = vsel %vm559_vm1, %v2900_v38, 0.0  ;;  %v10064_v38 = vld [vmem:[#allocation26_spill] sm:$0xff] }
0x1324   : > { %v2887_v61 = vmul.f32 %v2783_v58, %v10053_v7  ;;  %v2901_v58 = vmul.f32 %v2842_v42, %v10056_v63  ;;  %v2958_v52 = vadd.f32 %v2957_v44, %v2956_v25 }
0x1326   : > { %v2926_v15 = vsel %vm559_vm1, %v2887_v61, 0.0  ;;  %v2959_v8 = vsel %vm559_vm1, %v2901_v58, 0.0  ;;  %v10062_v61 = vld [vmem:[#allocation23_spill] sm:$0xff]  ;;  %v10065_v58 = vld [vmem:[#allocation25_spill] sm:$0xff] }
0x1327   : > { %v2787_v2 = vpop.permute.xlu0 %2786  ;;  %v2846_v0 = vpop.permute.xlu1 %2845  ;;  %v2927_v59 = vadd.f32 %v2926_v15, %v2925_v53  ;;  %v2960_v48 = vadd.f32 %v2959_v8, %v2958_v52 }
0x1328   : > { %v2888_v46 = vmul.f32 %v2787_v2, %v10055_v60  ;;  %v2902_v2 = vmul.f32 %v2846_v0, %v10058_v11 }
0x132a   : > { %v2928_v19 = vsel %vm559_vm1, %v2888_v46, 0.0  ;;  %v2961_v7 = vsel %vm559_vm1, %v2902_v2, 0.0 }
0x132b   : > { %v2791_v12 = vpop.permute.xlu0 %2790  ;;  %v2850_v9 = vpop.permute.xlu1 %2849  ;;  %v2929_v26 = vadd.f32 %v2928_v19, %v2927_v59  ;;  %v2962_v46 = vadd.f32 %v2961_v7, %v2960_v48  ;;  %v10067_v19 = vld [vmem:[#allocation54_spill] sm:$0xff]  ;;  %v10068_v59 = vld [vmem:[#allocation55_spill] sm:$0xff] }
0x132c   : > { %v2889_v35 = vmul.f32 %v2791_v12, %v10057_v14  ;;  %v2903_v12 = vmul.f32 %v2850_v9, %v10060_v17  ;;  %v10066_v14 = vld [vmem:[#allocation28_spill] sm:$0xff] }
0x132e   : > { %v2930_v42 = vsel %vm559_vm1, %v2889_v35, 0.0  ;;  %v2963_v16 = vsel %vm559_vm1, %v2903_v12, 0.0 }
0x132f   : > { %v2795_v21 = vpop.permute.xlu0 %2794  ;;  %v2854_v54 = vpop.permute.xlu1 %2853  ;;  %v2931_v5 = vadd.f32 %v2930_v42, %v2929_v26  ;;  %v2964_v55 = vadd.f32 %v2963_v16, %v2962_v46  ;;  %v10069_v42 = vld [vmem:[#allocation56_spill] sm:$0xff] }
0x1330   : > { %v2890_v4 = vmul.f32 %v2795_v21, %v10059_v45  ;;  %v2904_v32 = vmul.f32 %v2854_v54, %v10062_v61  ;;  %v10070_v61 = vld [vmem:[#allocation30_spill] sm:$0xff] }
0x1332   : > { %v2932_v0 = vsel %vm559_vm1, %v2890_v4, 0.0  ;;  %v2965_v15 = vsel %vm559_vm1, %v2904_v32, 0.0 }
0x1333   : > { %v2799_v29 = vpop.permute.xlu0 %2798  ;;  %v2858_v40 = vpop.permute.xlu1 %2857  ;;  %v2933_v39 = vadd.f32 %v2932_v0, %v2931_v5  ;;  %v2966_v11 = vadd.f32 %v2965_v15, %v2964_v55 }
0x1334   : > { %v2891_v13 = vmul.f32 %v2799_v29, %v10061_v1  ;;  %v2905_v60 = vmul.f32 %v2858_v40, %v10064_v38 }
0x1336   : > { %v2934_v9 = vsel %vm559_vm1, %v2891_v13, 0.0  ;;  %v2967_v29 = vsel %vm559_vm1, %v2905_v60, 0.0 }
0x1337   : > { %v2803_v22 = vpop.permute.xlu0 %2802  ;;  %v2862_v37 = vpop.permute.xlu1 %2861  ;;  %v2935_v53 = vadd.f32 %v2934_v9, %v2933_v39  ;;  %v2968_v12 = vadd.f32 %v2967_v29, %v2966_v11  ;;  %v10073_v39 = vld [vmem:[#allocation58_spill] sm:$0xff] }
0x1338   : > { %v2892_v21 = vmul.f32 %v2803_v22, %v10063_v6  ;;  %v2906_v54 = vmul.f32 %v2862_v37, %v10065_v58  ;;  %v10071_v6 = vld [vmem:[#allocation57_spill] sm:$0xff] }
0x133a   : > { %v2936_v63 = vsel %vm559_vm1, %v2892_v21, 0.0  ;;  %v2969_v25 = vsel %vm559_vm1, %v2906_v54, 0.0 }
0x133b   : > { %v2807_v62 = vpop.permute.xlu0 %2806  ;;  %v2866_v41 = vpop.permute.xlu1 %2865  ;;  %v2937_v2 = vadd.f32 %v2936_v63, %v2935_v53  ;;  %v2970_v26 = vadd.f32 %v2969_v25, %v2968_v12  ;;  %v3267_v25 = vld [vmem:[%s9734_s6 + $0x10] sm:$0xff]  ;;  %v3188_v12 = vld [vmem:[%s9733_s5 + $0x8] sm:$0xff] }
0x133c   : > { %v2893_v35 = vmul.f32 %v2807_v62, %v10066_v14  ;;  %v2907_v40 = vmul.f32 %v2866_v41, %v10067_v19  ;;  %v6637_v19 = vld [vmem:[#allocation2 + $0x2] sm:$0x3] }
0x133e   : > { %v2938_v44 = vsel %vm559_vm1, %v2893_v35, 0.0  ;;  %v2971_v13 = vsel %vm559_vm1, %v2907_v40, 0.0 }
0x133f   : > { %v2811_v45 = vpop.permute.xlu0 %2810  ;;  %v2870_v4 = vpop.permute.xlu1 %2869  ;;  %v2939_v1 = vadd.f32 %v2938_v44, %v2937_v2  ;;  %v2972_v48 = vadd.f32 %v2971_v13, %v2970_v26 }
0x1340   : > { %v2894_v8 = vmul.f32 %v2811_v45, %v10068_v59  ;;  %v2908_v17 = vmul.f32 %v2870_v4, %v10069_v42  ;;  %v3268_v45 = vld [vmem:[%s9734_s6 + $0x18] sm:$0xff]  ;;  %v3266_v59 = vld [vmem:[%s9734_s6 + $0x8] sm:$0xff] }
0x1341   : > { %v3190_v42 = vld [vmem:[%s9733_s5 + $0x18] sm:$0xff] }
0x1342   : > { %v2940_v52 = vsel %vm559_vm1, %v2894_v8, 0.0  ;;  %v2973_v0 = vsel %vm559_vm1, %v2908_v17, 0.0  ;;  %v3265_v8 = vld [vmem:[%s9734_s6] sm:$0xff]  ;;  %v3189_v17 = vld [vmem:[%s9733_s5 + $0x10] sm:$0xff]  ;;  %6329 = vmatpush3.msra.mxu0 %v3190_v42 }
0x1343   : > { %v2941_v22 = vadd.f32 %v2940_v52, %v2939_v1  ;;  %v3147_v37 = vpop.permute.xlu0 %3146  ;;  %v2874_v7 = vpop.permute.xlu1 %2873  ;;  %v2974_v38 = vadd.f32 %v2973_v0, %v2972_v48  ;;  %6330 = vmatprep.subr.mxu0 %v9963_v18  ;;  %v3187_v1 = vld [vmem:[%s9733_s5] sm:$0xff]  ;;  %v3462_v52 = vld [vmem:[%s9736_s8 + $0x18] sm:$0xff] }
0x1344   : > { %v3149_v32 = vsel %vm3145_vm10, %v10070_v61, %v3147_v37  ;;  %v2909_v21 = vmul.f32 %v2874_v7, %v10071_v6  ;;  %6331 = vmatpush3.msra.mxu0 %v3189_v17  ;;  %v3460_v7 = vld [vmem:[%s9736_s8 + $0x8] sm:$0xff]  ;;  %v3459_v0 = vld [vmem:[%s9736_s8] sm:$0xff] }
0x1345   : > { %v2942_v5 = vrot.slane %v2941_v22, 4  ;;  %3151 = vrot.lane.b32.xlu1 %v3149_v32, %s10072_s20  ;;  %6332 = vmatprep.subr.mxu0 %v9963_v18  ;;  %v10074_v32 = vld [vmem:[#allocation31_spill] sm:$0xff]  ;;  %v10076_v48 = vld [vmem:[#allocation32_spill] sm:$0xff] }
0x1346   : > { %v2975_v16 = vsel %vm559_vm1, %v2909_v21, 0.0  ;;  %6333 = vmatpush3.msra.mxu0 %v3188_v12  ;;  %v10075_v21 = vld [vmem:[#allocation29_spill] sm:$0xff] }
0x1347   : > { %v2943_v9 = vadd.f32 %v2942_v5, %v2941_v22  ;;  %v3158_v60 = vpop.permute.xlu0 %3157  ;;  %v2878_v46 = vpop.permute.xlu1 %2877  ;;  %v2976_v41 = vadd.f32 %v2975_v16, %v2974_v38  ;;  %6334 = vmatprep.subr.mxu0 %v9963_v18  ;;  %v3461_v22 = vld [vmem:[%s9736_s8 + $0x10] sm:$0xff]  ;;  %v3170_v5 = vsel %vm3145_vm10, %v10076_v48, %v10075_v21  ;;  %v5998_v48 = vld [vmem:[%s9737_s9] ss:$0 sm:$0xff] }
0x1348   : > { %3160 = vst.msk [vmem:[#allocation3] sm:$0x3] %vm1843_vm0, %v3158_v60  ;;  %v2910_v62 = vmul.f32 %v2878_v46, %v10073_v39  ;;  %6335 = vmatpush3.msra.mxu0 %v3187_v1  ;;  %v6638_v39 = vld [vmem:[#allocation4] sm:$0x3] }
0x1349   : > { %v2944_v63 = vrot.slane %v2943_v9, 2  ;;  %6350 = vmatprep.subr.mxu0 %v9963_v18 }
0x134a   : > { %v2977_v15 = vsel %vm559_vm1, %v2910_v62, 0.0 }
0x134b   : > { %v2978_v58 = vadd.f32 %v2977_v15, %v2976_v41  ;;  %v2945_v14 = vadd.f32 %v2944_v63, %v2943_v9  ;;  %v10077_v9 = vld [vmem:[#allocation34_spill] sm:$0xff] }
0x134d   : > { %v2979_v54 = vrot.slane %v2978_v58, 4  ;;  %v2946_v29 = vrot.slane %v2945_v14, 1 }
0x134f   : > { %v2980_v35 = vadd.f32 %v2979_v54, %v2978_v58  ;;  %v3182_v55 = vld [vmem:[#allocation3] sm:$0x3]  ;;  %v2947_v11 = vadd.f32 %v2946_v29, %v2945_v14 }
0x1350   : > { %3352 = vrot.lane.b32.xlu0 %v3182_v55, %s10072_s20 }
0x1351   : > { %v2981_v53 = vrot.slane %v2980_v35, 2 }
0x1353   : > { %v2982_v44 = vadd.f32 %v2981_v53, %v2980_v35  ;;  %v5993_v35 = vld [vmem:[%s6949_s27 + $0x4] sm:$0x3] }
0x1354   : > { %3161 = vrot.lane.b32.xlu0 %v6637_v19, %s10043_s26 }
0x1355   : > { %v2983_v40 = vrot.slane %v2982_v44, 1 }
0x1357   : > { %v2984_v2 = vadd.f32 %v2983_v40, %v2982_v44 }
0x1359   : > { %v3065_v4 = vsel %vm1433_vm15, %v2984_v2, %v2947_v11 }
0x135a   : > { %6326 = vmatmul.mubr.msk.f32.vlgmr.msra.gmra.mxu1 %vm559_vm1, %v3065_v4 }
0x135b   : > { %6340 = vmatpush3.msra.mxu1 %v3268_v45  ;;  %6347 = vmatprep.mubr.msk.f32.mxu1 %vm6791_vm2, %v9963_v18 }
0x135c   : > { %6341 = vmatprep.subr.mxu1 %v9963_v18 }
0x135d   : > { %6342 = vmatpush3.msra.mxu1 %v3267_v25 }
0x135e   : > { %6343 = vmatprep.subr.mxu1 %v9963_v18 }
0x135f   : > { %6344 = vmatpush3.msra.mxu1 %v3266_v59 }
0x1360   : > { %6345 = vmatprep.subr.mxu1 %v9963_v18 }
0x1361   : > { %6346 = vmatpush3.msra.mxu1 %v3265_v8 }
0x1362   : > { %6361 = vmatprep.subr.mxu1 %v9963_v18 }
0x13b7   : > { %v3152_v13 = vpop.permute.xlu1 %3151 }
0x13b8   : > { %3154 = vst.msk [vmem:[#allocation2] sm:$0x3] %vm1843_vm0, %v3152_v13 }
0x13bf   : > { %v8388_v26 = vld [vmem:[#allocation2] sm:$0x3] }
0x13c0   : > { %6348 = vmatmul.mubr.msk.f32.vlgmr.msra.gmra.mxu1 %vm559_vm1, %v8388_v26 }
0x13c1   : > { %6362 = vmatpush3.msra.mxu1 %v3462_v52  ;;  %6369 = vmatprep.mubr.msk.f32.mxu1 %vm6791_vm2, %v9963_v18  ;;  %v3376_v52 = vld [vmem:[%s9735_s7 + $0x18] sm:$0xff] }
0x13c2   : > { %v8397_v37 = vpop.permute.xlu0 %3352  ;;  %6363 = vmatprep.subr.mxu1 %v9963_v18 }
0x13c3   : > { %6364 = vmatpush3.msra.mxu1 %v3461_v22  ;;  %v3375_v22 = vld [vmem:[%s9735_s7 + $0x10] sm:$0xff] }
0x13c4   : > { %6365 = vmatprep.subr.mxu1 %v9963_v18 }
0x13c5   : > { %6366 = vmatpush3.msra.mxu1 %v3460_v7  ;;  %v3374_v7 = vld [vmem:[%s9735_s7 + $0x8] sm:$0xff] }
0x13c6   : > { %v3162_v61 = vpop.permute.xlu0 %3161  ;;  %6367 = vmatprep.subr.mxu1 %v9963_v18 }
0x13c7   : > { %v3164_v6 = vsel %vm3145_vm10, %v10074_v32, %v3162_v61  ;;  %6368 = vmatpush3.msra.mxu1 %v3459_v0  ;;  %v3373_v0 = vld [vmem:[%s9735_s7] sm:$0xff] }
0x13c8   : > { %3166 = vrot.lane.b32.xlu0 %v3164_v6, %s10072_s20  ;;  %6383 = vmatprep.subr.mxu1 %v9963_v18 }
0x13cc   : > { %3172 = vrot.lane.b32.xlu0 %v3170_v5, %s10043_s26 }
0x141a   : > { %v3134_v16 = vpop.f32.mrf.mxu1 }
0x141b   : > { %v3135_v38 = vadd.f32 %v3134_v16, %v10077_v9 }
0x141c   : > { %v6327_v60 = vpop.f32.mrf.mxu1 }
0x141d   : > { %6589 = vtanh.f32 %v3135_v38 }
0x142a   : > { %v6590_v46 = vpop.eup %6589 }
0x142b   : > { %5991 = vst.msk [vmem:[%s6951_s17 + $0x2] sm:$0x3] %vm1843_vm0, %v6590_v46  ;;  %v3176_v62 = vsel %vm3145_vm10, %v6590_v46, %v6638_v39  ;;  %vm10119_vm10 = vmmov %vm10118_vm3 }
0x142c   : > { %3177 = vst.msk [vmem:[#allocation4] sm:$0x3] %vm1843_vm0, %v3176_v62 }
0x1433   : > { %v3180_v41 = vld [vmem:[#allocation4] sm:$0x3] }
0x1434   : > { %6337 = vmatmul.mubr.msk.f32.vlgmr.msra.gmra.mxu0 %vm559_vm1, %v3180_v41 }
0x1435   : > { %6358 = vmatprep.mubr.msk.f32.mxu0 %vm6791_vm2, %v9963_v18  ;;  %6351 = vmatpush3.msra.mxu0 %v3376_v52 }
0x1436   : > { %6352 = vmatprep.subr.mxu0 %v9963_v18 }
0x1437   : > { %6353 = vmatpush3.msra.mxu0 %v3375_v22 }
0x1438   : > { %6354 = vmatprep.subr.mxu0 %v9963_v18 }
0x1439   : > { %6355 = vmatpush3.msra.mxu0 %v3374_v7 }
0x143a   : > { %v3167_v15 = vpop.permute.xlu0 %3166  ;;  %6356 = vmatprep.subr.mxu0 %v9963_v18 }
0x143b   : > { %3169 = vst.msk [vmem:[#allocation2 + $0x2] sm:$0x3] %vm1843_vm0, %v3167_v15  ;;  %6357 = vmatpush3.msra.mxu0 %v3373_v0 }
0x143c   : > { %6372 = vmatprep.subr.mxu0 %v9963_v18 }
0x143e   : > { %v3173_v63 = vpop.permute.xlu0 %3172 }
0x143f   : > { %3175 = vst.msk [vmem:[#allocation3 + $0x2] sm:$0x3] %vm1843_vm0, %v3173_v63 }
0x1442   : > { %v3183_v58 = vld [vmem:[#allocation2 + $0x2] sm:$0x3] }
0x1443   : > { %6370 = vmatmul.mubr.msk.f32.vlgmr.msra.gmra.mxu1 %vm559_vm1, %v3183_v58 }
0x1444   : > { %6391 = vmatprep.mubr.msk.f32.mxu1 %vm6791_vm2, %v9963_v18 }
0x1446   : > { %v3184_v43 = vld [vmem:[#allocation3 + $0x2] sm:$0x3] }
0x1447   : > { %3546 = vrot.lane.b32.xlu0 %v3184_v43, %s10072_s20 }
0x1480   : > { %v3338_v54 = vpop.f32.mrf.mxu1 }
0x1482   : > { %v6349_v14 = vpop.f32.mrf.mxu1 }
0x14b9   : > { %v8473_v43 = vpop.permute.xlu0 %3546 }
0x14ba   : > { %10080 = vst [vmem:[#allocation35_spill] sm:$0xff] %v8473_v43 }
0x14f4   : > { %v3260_v55 = vpop.f32.mrf.mxu0 }
0x14f5   : > { %v3264_v53 = vadd.f32 %v5993_v35, %v3260_v55  ;;  %v3569_v55 = vld [vmem:[%s9738_s10 + $0x18] sm:$0xff] }
0x14f6   : > { %v6338_v29 = vpop.f32.mrf.mxu0 }
0x14f7   : > { %v3342_v44 = vadd.f32 %v3338_v54, %v3264_v53  ;;  %v4289_v53 = vld [vmem:[%s9740_s12 + $0x18] sm:$0xff]  ;;  %v3568_v29 = vld [vmem:[%s9738_s10 + $0x10] sm:$0xff] }
0x14f8   : > { %6384 = vmatpush3.msra.mxu1 %v4289_v53  ;;  %v8582_v53 = vld [vmem:[%s9729_s1 + $0x20] sm:$0xff] }
0x14f9   : > { %v5996_v19 = vmul.f32 -1.442695, %v3342_v44  ;;  %6385 = vmatprep.subr.mxu1 %v9963_v18  ;;  %10087 = vst [vmem:[#allocation40_spill] sm:$0xff] %v8582_v53 }
0x14fb   : > { %6591 = vpow2.f32 %v5996_v19  ;;  %v3567_v19 = vld [vmem:[%s9738_s10 + $0x8] sm:$0xff] }
0x14fc   : > { %6593 = vtanh.f32 %v3342_v44  ;;  %v4288_v44 = vld [vmem:[%s9740_s12 + $0x10] sm:$0xff] }
0x14fd   : > { %6386 = vmatpush3.msra.mxu1 %v4288_v44 }
0x14fe   : > { %6387 = vmatprep.subr.mxu1 %v9963_v18 }
0x1503   : > { %v3532_v40 = vpop.f32.mrf.mxu1 }
0x1505   : > { %v6371_v11 = vpop.f32.mrf.mxu1 }
0x1506   : > { %v3566_v11 = vld [vmem:[%s9738_s10] sm:$0xff] }
0x1508   : > { %v6592_v2 = vpop.eup %6591 }
0x1509   : > { %v3347_v45 = vadd.f32 1.0, %v6592_v2  ;;  %v6594_v4 = vpop.eup %6593  ;;  %v4286_v2 = vld [vmem:[%s9740_s12] sm:$0xff] }
0x150b   : > { %6595 = vrcp.f32 %v3347_v45 }
0x1518   : > { %v6596_v25 = vpop.eup %6595 }
0x1519   : > { %v3350_v8 = vsel %vm7024_vm5, %v6594_v4, %v6596_v25 }
0x151a   : > { %3357 = vrot.lane.b32.xlu1 %v3350_v8, %s9993_s30  ;;  %v3355_v12 = vmul.f32 %v8397_v37, %v3350_v8 }
0x158c   : > { %v3358_v42 = vpop.permute.xlu1 %3357 }
0x158d   : > { %v3360_v17 = vmul.f32 %v3358_v42, %v3350_v8 }
0x158f   : > { %3362 = vrot.lane.b32.xlu1 %v3360_v17, %s10072_s20 }
0x1601   : > { %v3363_v1 = vpop.permute.xlu1 %3362 }
0x1602   : > { %v8439_v13 = vadd.f32 %v3363_v1, %v3355_v12  ;;  %v10084_v12 = vld [vmem:[#allocation27_spill] sm:$0xff] }
0x1604   : > { %6597 = vtanh.f32 %v8439_v13 }
0x1611   : > { %v6598_v61 = vpop.eup %6597 }
0x1612   : > { %3368 = vrot.lane.b32.xlu1 %v6598_v61, %s9993_s30  ;;  %v8529_v61 = vld [vmem:[%s9729_s1 + $0x8] sm:$0xff] }
0x1684   : > { %v3369_v32 = vpop.permute.xlu1 %3368 }
0x1685   : > { %v8459_v6 = vmul.f32 %v3369_v32, %v3350_v8  ;;  %v8534_v32 = vld [vmem:[%s9729_s1] sm:$0xff] }
0x1687   : > { %10079 = vst [vmem:[#allocation52_spill] sm:$0xff] %v8459_v6  ;;  %3378 = vrot.lane.b32.xlu1 %v8459_v6, %s10072_s20 }
0x16f9   : > { %v3379_v21 = vpop.permute.xlu1 %3378 }
0x16fa   : > { %6359 = vmatmul.mubr.msk.f32.vlgmr.msra.gmra.mxu0 %vm559_vm1, %v3379_v21 }
0x16fb   : > { %6380 = vmatprep.mubr.msk.f32.mxu0 %vm6791_vm2, %v9963_v18  ;;  %6373 = vmatpush3.msra.mxu0 %v3569_v55 }
0x16fc   : > { %6374 = vmatprep.subr.mxu0 %v9963_v18 }
0x16fd   : > { %6375 = vmatpush3.msra.mxu0 %v3568_v29  ;;  %v8587_v29 = vld [vmem:[%s9729_s1 + $0x90] sm:$0xff] }
0x16fe   : > { %6376 = vmatprep.subr.mxu0 %v9963_v18  ;;  %10088 = vst [vmem:[#allocation41_spill] sm:$0xff] %v8587_v29 }
0x16ff   : > { %6377 = vmatpush3.msra.mxu0 %v3567_v19 }
0x1700   : > { %6378 = vmatprep.subr.mxu0 %v9963_v18 }
0x1701   : > { %6379 = vmatpush3.msra.mxu0 %v3566_v11 }
0x1702   : > { %6394 = vmatprep.subr.mxu0 %v9963_v18 }
0x17ba   : > { %v3448_v5 = vpop.f32.mrf.mxu0 }
0x17bb   : > { %v3458_v16 = vadd.f32 %v5998_v48, %v3448_v5  ;;  %v8543_v5 = vld [vmem:[%s9729_s1 + $0x10] sm:$0xff] }
0x17bc   : > { %v6360_v9 = vpop.f32.mrf.mxu0 }
0x17bd   : > { %v3536_v38 = vadd.f32 %v3532_v40, %v3458_v16  ;;  %v4287_v40 = vld [vmem:[%s9740_s12 + $0x8] sm:$0xff]  ;;  %v8548_v16 = vld [vmem:[%s9729_s1 + $0x80] sm:$0xff] }
0x17be   : > { %6388 = vmatpush3.msra.mxu1 %v4287_v40  ;;  %10085 = vst [vmem:[#allocation38_spill] sm:$0xff] %v8548_v16 }
0x17bf   : > { %v6000_v60 = vmul.f32 -1.442695, %v3536_v38  ;;  %6389 = vmatprep.subr.mxu1 %v9963_v18 }
0x17c0   : > { %6390 = vmatpush3.msra.mxu1 %v4286_v2  ;;  %v8598_v2 = vld [vmem:[%s9729_s1 + $0x28] sm:$0xff] }
0x17c1   : > { %6599 = vpow2.f32 %v6000_v60  ;;  %6405 = vmatprep.subr.mxu1 %v9963_v18  ;;  %10089 = vst [vmem:[#allocation42_spill] sm:$0xff] %v8598_v2 }
0x17c2   : > { %6601 = vtanh.f32 %v3536_v38 }
0x17ce   : > { %v6600_v46 = vpop.eup %6599 }
0x17cf   : > { %v3541_v39 = vadd.f32 1.0, %v6600_v46  ;;  %v6602_v62 = vpop.eup %6601 }
0x17d1   : > { %6603 = vrcp.f32 %v3541_v39 }
0x17de   : > { %v6604_v41 = vpop.eup %6603 }
0x17df   : > { %v3544_v15 = vsel %vm7024_vm5, %v6602_v62, %v6604_v41 }
0x17e0   : > { %3551 = vrot.lane.b32.xlu1 %v3544_v15, %s9993_s30  ;;  %v3549_v54 = vmul.f32 %v8473_v43, %v3544_v15 }
0x1852   : > { %v3552_v63 = vpop.permute.xlu1 %3551 }
0x1853   : > { %v3554_v58 = vmul.f32 %v3552_v63, %v3544_v15  ;;  %v8571_v63 = vld [vmem:[%s9729_s1 + $0x88] sm:$0xff] }
0x1854   : > { %10086 = vst [vmem:[#allocation39_spill] sm:$0xff] %v8571_v63 }
0x1855   : > { %3556 = vrot.lane.b32.xlu1 %v3554_v58, %s10072_s20 }
0x18c7   : > { %v3557_v14 = vpop.permute.xlu1 %3556 }
0x18c8   : > { %v8476_v35 = vadd.f32 %v3557_v14, %v3549_v54 }
0x18ca   : > { %10081 = vst [vmem:[#allocation36_spill] sm:$0xff] %v8476_v35  ;;  %6605 = vtanh.f32 %v8476_v35 }
0x18d7   : > { %v6606_v45 = vpop.eup %6605 }
0x18d8   : > { %3562 = vrot.lane.b32.xlu0 %v6606_v45, %s9993_s30  ;;  %v8603_v45 = vld [vmem:[%s9729_s1 + $0x98] sm:$0xff] }
0x18d9   : > { %10090 = vst [vmem:[#allocation43_spill] sm:$0xff] %v8603_v45 }
0x194a   : > { %v3563_v4 = vpop.permute.xlu0 %3562 }
0x194b   : > { %v8512_v25 = vmul.f32 %v3563_v4, %v3544_v15  ;;  %v8566_v15 = vld [vmem:[%s9729_s1 + $0x18] sm:$0xff] }
0x194d   : > { %10082 = vst [vmem:[#allocation37_spill] sm:$0xff] %v8512_v25  ;;  %3571 = vrot.lane.b32.xlu1 %v8512_v25, %s10072_s20 }
0x19bf   : > { %v3572_v8 = vpop.permute.xlu1 %3571 }
0x19c0   : > { %6381 = vmatmul.mubr.msk.f32.vlgmr.msra.gmra.mxu0 %vm559_vm1, %v3572_v8  ;;  %6392 = vmatmul.mubr.msk.f32.vlgmr.msra.gmra.mxu1 %vm559_vm1, %v3572_v8 }
0x19c1   : > { %6402 = vmatprep.mubr.msk.f32.mxu0 %vm6791_vm2, %v9963_v18  ;;  %6413 = vmatprep.mubr.msk.f32.mxu1 %vm6791_vm2, %v9963_v18 }
0x1a80   : > { %v3641_v42 = vpop.f32.mrf.mxu0  ;;  %v8522_v17 = vpop.f32.mrf.mxu1 }
0x1a81   : > { %10083 = vst [vmem:[#allocation33_spill] sm:$0xff] %v8522_v17  ;;  %v3684_v1 = vrot.slane %v3641_v42, %v10084_v12  ;;  %v8763_v17 = vld [vmem:[%s9729_s1 + $0xe8] sm:$0xff] }
0x1a82   : > { %v6382_v52 = vpop.f32.mrf.mxu0  ;;  %v6393_v22 = vpop.f32.mrf.mxu1  ;;  %10110 = vst [vmem:[#allocation31_spill] sm:$0xff] %v8763_v17 }
0x1a83   : > { %v3685_v7 = vcombine.high %v3684_v1, %v3684_v1  ;;  %v3692_v0 = vrot.slane %v3684_v1, %v10084_v12  ;;  %v8614_v52 = vld [vmem:[%s9729_s1 + $0x30] sm:$0xff]  ;;  %v8619_v22 = vld [vmem:[%s9729_s1 + $0xa0] sm:$0xff] }
0x1a84   : > { %10091 = vst [vmem:[#allocation44_spill] sm:$0xff] %v8614_v52  ;;  %10092 = vst [vmem:[#allocation46_spill] sm:$0xff] %v8619_v22 }
0x1a85   : > { %v3699_v21 = vrot.slane %v3685_v7, %v10084_v12  ;;  %v8538_v48 = vrot.slane %v3692_v0, %v7149_v33  ;;  %v8747_v12 = vld [vmem:[%s9729_s1 + $0xe0] sm:$0xff] }
0x1a86   : > { %10108 = vst [vmem:[#allocation57_spill] sm:$0xff] %v8747_v12 }
0x1a87   : > { %v8551_v9 = vrot.slane %v3699_v21, %v7149_v33  ;;  %v3711_v38 = vmul.f32 %v8538_v48, %v8529_v61  ;;  %v3710_v60 = vmul.f32 %v8538_v48, %v8534_v32  ;;  %v3712_v62 = vmul.f32 %v8538_v48, %v8543_v5 }
0x1a88   : > { %v3713_v14 = vmul.f32 %v8538_v48, %v8566_v15  ;;  %v3714_v40 = vmul.f32 %v8538_v48, %v8582_v53  ;;  %v3715_v42 = vmul.f32 %v8538_v48, %v8598_v2  ;;  %v3716_v21 = vmul.f32 %v8538_v48, %v8614_v52 }
0x1a89   : > { %v3745_v46 = vsel %vm559_vm1, %v3711_v38, 0.0  ;;  %v3742_v39 = vsel %vm559_vm1, %v3710_v60, 0.0  ;;  %v3726_v41 = vmul.f32 %v8551_v9, %v8548_v16  ;;  %v3748_v58 = vsel %vm559_vm1, %v3712_v62, 0.0  ;;  %v8630_v60 = vld [vmem:[%s9729_s1 + $0x38] sm:$0xff]  ;;  %v10113_v16 = vld [vmem:[#allocation53_spill] sm:$0xff] }
0x1a8a   : > { %3746 = vadd.xlane.f32.xlu1 %v3745_v46  ;;  %3743 = vadd.xlane.f32.xlu0 %v3742_v39  ;;  %v3727_v55 = vmul.f32 %v8551_v9, %v8571_v63  ;;  %v3751_v44 = vsel %vm559_vm1, %v3713_v14, 0.0  ;;  %v3728_v11 = vmul.f32 %v8551_v9, %v8587_v29  ;;  %v3754_v4 = vsel %vm559_vm1, %v3714_v40, 0.0  ;;  %10093 = vst [vmem:[#allocation45_spill] sm:$0xff] %v8630_v60  ;;  %v8635_v46 = vld [vmem:[%s9729_s1 + $0xa8] sm:$0xff]  ;;  %v8651_v14 = vld [vmem:[%s9729_s1 + $0xb0] sm:$0xff] }
0x1a8b   : > { %v3790_v54 = vsel %vm559_vm1, %v3726_v41, 0.0  ;;  %v3729_v1 = vmul.f32 %v8551_v9, %v8603_v45  ;;  %v3757_v7 = vsel %vm559_vm1, %v3715_v42, 0.0  ;;  %v3730_v38 = vmul.f32 %v8551_v9, %v8619_v22  ;;  %10094 = vst [vmem:[#allocation48_spill] sm:$0xff] %v8635_v46  ;;  %10096 = vst [vmem:[#allocation50_spill] sm:$0xff] %v8651_v14 }
0x1a8c   : > { %v3793_v19 = vsel %vm559_vm1, %v3727_v55, 0.0  ;;  %v3796_v8 = vsel %vm559_vm1, %v3728_v11, 0.0  ;;  %v3760_v39 = vsel %vm559_vm1, %v3716_v21, 0.0  ;;  %v3717_v41 = vmul.f32 %v8538_v48, %v8630_v60  ;;  %v8662_v11 = vld [vmem:[%s9729_s1 + $0x48] sm:$0xff]  ;;  %v8683_v21 = vld [vmem:[%s9729_s1 + $0xc0] sm:$0xff] }
0x1a8d   : > { %v3799_v0 = vsel %vm559_vm1, %v3729_v1, 0.0  ;;  %v3802_v62 = vsel %vm559_vm1, %v3730_v38, 0.0  ;;  %v3732_v40 = vmul.f32 %v8551_v9, %v8651_v14  ;;  %10097 = vst [vmem:[#allocation49_spill] sm:$0xff] %v8662_v11  ;;  %v3719_v1 = vmul.f32 %v8538_v48, %v8662_v11  ;;  %10100 = vst [vmem:[#allocation24_spill] sm:$0xff] %v8683_v21 }
0x1a8e   : > { %3749 = vadd.xlane.f32.xlu1 %v3748_v58  ;;  %3791 = vadd.xlane.f32.xlu0 %v3790_v54  ;;  %v3731_v58 = vmul.f32 %v8551_v9, %v8635_v46  ;;  %v8646_v54 = vld [vmem:[%s9729_s1 + $0x40] sm:$0xff]  ;;  %v3763_v55 = vsel %vm559_vm1, %v3717_v41, 0.0  ;;  %v3734_v41 = vmul.f32 %v8551_v9, %v8683_v21 }
0x1a8f   : > { %10095 = vst [vmem:[#allocation47_spill] sm:$0xff] %v8646_v54  ;;  %v3808_v42 = vsel %vm559_vm1, %v3732_v40, 0.0  ;;  %v3769_v38 = vsel %vm559_vm1, %v3719_v1, 0.0  ;;  %v8715_v1 = vld [vmem:[%s9729_s1 + $0xd0] sm:$0xff] }
0x1a90   : > { %10104 = vst [vmem:[#allocation54_spill] sm:$0xff] %v8715_v1 }
0x1a92   : > { %3752 = vadd.xlane.f32.xlu1 %v3751_v44  ;;  %3794 = vadd.xlane.f32.xlu0 %v3793_v19  ;;  %v3805_v44 = vsel %vm559_vm1, %v3731_v58, 0.0  ;;  %v3718_v19 = vmul.f32 %v8538_v48, %v8646_v54  ;;  %v8694_v58 = vld [vmem:[%s9729_s1 + $0x58] sm:$0xff] }
0x1a93   : > { %10101 = vst [vmem:[#allocation26_spill] sm:$0xff] %v8694_v58  ;;  %v3721_v40 = vmul.f32 %v8538_v48, %v8694_v58 }
0x1a96   : > { %3755 = vadd.xlane.f32.xlu1 %v3754_v4  ;;  %3797 = vadd.xlane.f32.xlu0 %v3796_v8  ;;  %v8667_v4 = vld [vmem:[%s9729_s1 + $0xb8] sm:$0xff]  ;;  %v3766_v8 = vsel %vm559_vm1, %v3718_v19, 0.0  ;;  %v3814_v19 = vsel %vm559_vm1, %v3734_v41, 0.0  ;;  %v8726_v41 = vld [vmem:[%s9729_s1 + $0x68] sm:$0xff] }
0x1a97   : > { %10098 = vst [vmem:[#allocation51_spill] sm:$0xff] %v8667_v4  ;;  %10105 = vst [vmem:[#allocation55_spill] sm:$0xff] %v8726_v41 }
0x1a9a   : > { %3758 = vadd.xlane.f32.xlu1 %v3757_v7  ;;  %3800 = vadd.xlane.f32.xlu0 %v3799_v0  ;;  %v3733_v7 = vmul.f32 %v8551_v9, %v8667_v4  ;;  %v8678_v0 = vld [vmem:[%s9729_s1 + $0x50] sm:$0xff] }
0x1a9b   : > { %10099 = vst [vmem:[#allocation23_spill] sm:$0xff] %v8678_v0 }
0x1a9e   : > { %3761 = vadd.xlane.f32.xlu1 %v3760_v39  ;;  %3803 = vadd.xlane.f32.xlu0 %v3802_v62  ;;  %v3811_v39 = vsel %vm559_vm1, %v3733_v7, 0.0  ;;  %v3720_v62 = vmul.f32 %v8538_v48, %v8678_v0  ;;  %v3775_v7 = vsel %vm559_vm1, %v3721_v40, 0.0 }
0x1aa2   : > { %3764 = vadd.xlane.f32.xlu1 %v3763_v55  ;;  %3806 = vadd.xlane.f32.xlu0 %v3805_v44  ;;  %v8699_v55 = vld [vmem:[%s9729_s1 + $0xc8] sm:$0xff]  ;;  %v3772_v44 = vsel %vm559_vm1, %v3720_v62, 0.0  ;;  %v3736_v62 = vmul.f32 %v8551_v9, %v8715_v1 }
0x1aa3   : > { %10102 = vst [vmem:[#allocation25_spill] sm:$0xff] %v8699_v55 }
0x1aa4   : > { %v3820_v40 = vsel %vm559_vm1, %v3736_v62, 0.0 }
0x1aa6   : > { %3767 = vadd.xlane.f32.xlu1 %v3766_v8  ;;  %3809 = vadd.xlane.f32.xlu0 %v3808_v42  ;;  %v3735_v8 = vmul.f32 %v8551_v9, %v8699_v55  ;;  %v8710_v42 = vld [vmem:[%s9729_s1 + $0x60] sm:$0xff] }
0x1aa7   : > { %10103 = vst [vmem:[#allocation28_spill] sm:$0xff] %v8710_v42 }
0x1aaa   : > { %3770 = vadd.xlane.f32.xlu1 %v3769_v38  ;;  %3812 = vadd.xlane.f32.xlu0 %v3811_v39  ;;  %v3817_v38 = vsel %vm559_vm1, %v3735_v8, 0.0  ;;  %v3722_v39 = vmul.f32 %v8538_v48, %v8710_v42  ;;  %v3723_v8 = vmul.f32 %v8538_v48, %v8726_v41 }
0x1aae   : > { %3773 = vadd.xlane.f32.xlu1 %v3772_v44  ;;  %3815 = vadd.xlane.f32.xlu0 %v3814_v19  ;;  %v8731_v44 = vld [vmem:[%s9729_s1 + $0xd8] sm:$0xff]  ;;  %v3778_v19 = vsel %vm559_vm1, %v3722_v39, 0.0  ;;  %v3781_v39 = vsel %vm559_vm1, %v3723_v8, 0.0 }
0x1aaf   : > { %10106 = vst [vmem:[#allocation56_spill] sm:$0xff] %v8731_v44 }
0x1ab2   : > { %3776 = vadd.xlane.f32.xlu1 %v3775_v7  ;;  %3818 = vadd.xlane.f32.xlu0 %v3817_v38  ;;  %v3737_v7 = vmul.f32 %v8551_v9, %v8731_v44  ;;  %v8742_v38 = vld [vmem:[%s9729_s1 + $0x70] sm:$0xff] }
0x1ab3   : > { %10107 = vst [vmem:[#allocation30_spill] sm:$0xff] %v8742_v38  ;;  %v3724_v59 = vmul.f32 %v8538_v48, %v8742_v38 }
0x1ab4   : > { %v3823_v62 = vsel %vm559_vm1, %v3737_v7, 0.0 }
0x1ab5   : > { %v3784_v8 = vsel %vm559_vm1, %v3724_v59, 0.0 }
0x1ab6   : > { %3779 = vadd.xlane.f32.xlu1 %v3778_v19  ;;  %3821 = vadd.xlane.f32.xlu0 %v3820_v40  ;;  %v3738_v19 = vmul.f32 %v8551_v9, %v8747_v12  ;;  %v8758_v40 = vld [vmem:[%s9729_s1 + $0x78] sm:$0xff] }
0x1ab7   : > { %10109 = vst [vmem:[#allocation58_spill] sm:$0xff] %v8758_v40  ;;  %v3725_v35 = vmul.f32 %v8538_v48, %v8758_v40  ;;  %v8783_v48 = vld [vmem:[%s9729_s1 + $0xf8] sm:$0xff] }
0x1ab8   : > { %v3826_v7 = vsel %vm559_vm1, %v3738_v19, 0.0  ;;  %10112 = vst [vmem:[#allocation32_spill] sm:$0xff] %v8783_v48 }
0x1ab9   : > { %v3787_v43 = vsel %vm559_vm1, %v3725_v35, 0.0 }
0x1aba   : > { %3782 = vadd.xlane.f32.xlu1 %v3781_v39  ;;  %3824 = vadd.xlane.f32.xlu0 %v3823_v62  ;;  %v3739_v39 = vmul.f32 %v8551_v9, %v8763_v17  ;;  %v8774_v62 = vld [vmem:[%s9729_s1 + $0xf0] sm:$0xff] }
0x1abb   : > { %10111 = vst [vmem:[#allocation29_spill] sm:$0xff] %v8774_v62  ;;  %v3740_v59 = vmul.f32 %v8551_v9, %v8774_v62 }
0x1abc   : > { %v3829_v25 = vsel %vm559_vm1, %v3739_v39, 0.0 }
0x1abd   : > { %v3832_v19 = vsel %vm559_vm1, %v3740_v59, 0.0 }
0x1abe   : > { %3785 = vadd.xlane.f32.xlu1 %v3784_v8  ;;  %3827 = vadd.xlane.f32.xlu0 %v3826_v7  ;;  %v3741_v8 = vmul.f32 %v8551_v9, %v8783_v48 }
0x1ac0   : > { %v3835_v35 = vsel %vm559_vm1, %v3741_v8, 0.0 }
0x1ac2   : > { %3788 = vadd.xlane.f32.xlu1 %v3787_v43  ;;  %3830 = vadd.xlane.f32.xlu0 %v3829_v25 }
0x1ac6   : > { %3833 = vadd.xlane.f32.xlu0 %v3832_v19 }
0x1aca   : > { %3836 = vadd.xlane.f32.xlu0 %v3835_v35 }
0x1b13   : > { %v3747_v7 = vpop.xlane.xlu1 %3746  ;;  %v3744_v39 = vpop.xlane.xlu0 %3743 }
0x1b14   : > { %v3877_v11 = vrot.slane %v3747_v7, %v7464_v50  ;;  %v3873_v46 = vrot.slane %v3744_v39, %v7468_v3 }
0x1b16   : > { %v3878_v7 = vsel %vm1254_vm6, %v3877_v11, %v3873_v46 }
0x1b17   : > { %v3750_v6 = vpop.xlane.xlu1 %3749  ;;  %v3792_v62 = vpop.xlane.xlu0 %3791 }
0x1b18   : > { %v3882_v22 = vrot.slane %v3750_v6, %v7474_v36  ;;  %v3952_v45 = vrot.slane %v3792_v62, %v7468_v3 }
0x1b1b   : > { %v3753_v43 = vpop.xlane.xlu1 %3752  ;;  %v3795_v25 = vpop.xlane.xlu0 %3794 }
0x1b1c   : > { %v3956_v54 = vrot.slane %v3795_v25, %v7464_v50  ;;  %v3887_v52 = vrot.slane %v3753_v43, %v10028_v24 }
0x1b1e   : > { %v3957_v39 = vsel %vm1254_vm6, %v3956_v54, %v3952_v45 }
0x1b1f   : > { %v3756_v17 = vpop.xlane.xlu1 %3755  ;;  %v3798_v40 = vpop.xlane.xlu0 %3797 }
0x1b20   : > { %v3961_v60 = vrot.slane %v3798_v40, %v7474_v36  ;;  %v3892_v2 = vrot.slane %v3756_v17, %v10113_v16  ;;  %v3883_v40 = vsel %vm1261_vm7, %v3882_v22, %v3878_v7 }
0x1b22   : > { %v3962_v62 = vsel %vm1261_vm7, %v3961_v60, %v3957_v39 }
0x1b23   : > { %v3759_v12 = vpop.xlane.xlu1 %3758  ;;  %v3801_v38 = vpop.xlane.xlu0 %3800 }
0x1b24   : > { %v3966_v29 = vrot.slane %v3801_v38, %v10028_v24  ;;  %v3897_v25 = vrot.slane %v3759_v12, %v7490_v31 }
0x1b27   : > { %v3762_v44 = vpop.xlane.xlu1 %3761  ;;  %v3804_v1 = vpop.xlane.xlu0 %3803 }
0x1b28   : > { %v3971_v63 = vrot.slane %v3804_v1, %v10113_v16  ;;  %v3902_v43 = vrot.slane %v3762_v44, %v7495_v51  ;;  %v3888_v1 = vsel %vm10114_vm9, %v3887_v52, %v3883_v40  ;;  %v3967_v16 = vsel %vm10115_vm11, %v3966_v29, %v3962_v62 }
0x1b29   : > { %v3893_v12 = vsel %vm10116_vm8, %v3892_v2, %v3888_v1  ;;  %vm10120_vm9 = vcmask 458112   ;;  %vm10122_vm8 = vcmask 523712  }
0x1b2a   : > { %v3972_v54 = vsel %vm10117_vm12, %v3971_v63, %v3967_v16  ;;  %vm10121_vm11 = vmmov %vm10120_vm9 }
0x1b2b   : > { %v3765_v59 = vpop.xlane.xlu1 %3764  ;;  %v3807_v41 = vpop.xlane.xlu0 %3806  ;;  %vm10123_vm12 = vmmov %vm10122_vm8 }
0x1b2c   : > { %v3976_v6 = vrot.slane %v3807_v41, %v7490_v31  ;;  %v3907_v46 = vrot.slane %v3765_v59, %v7498_v20  ;;  %v3898_v41 = vsel %vm10118_vm3, %v3897_v25, %v3893_v12  ;;  %vm10124_vm3 = vcmask 589312  }
0x1b2d   : > { %v3903_v59 = vsel %vm10120_vm9, %v3902_v43, %v3898_v41  ;;  %vm10126_vm9 = vcmask 654912  }
0x1b2e   : > { %v3977_v44 = vsel %vm10119_vm10, %v3976_v6, %v3972_v54  ;;  %v3908_v63 = vsel %vm10122_vm8, %v3907_v46, %v3903_v59  ;;  %vm10125_vm10 = vmmov %vm10124_vm3  ;;  %vm10128_vm8 = vcmask 720512  }
0x1b2f   : > { %v3768_v55 = vpop.xlane.xlu1 %3767  ;;  %v3810_v9 = vpop.xlane.xlu0 %3809 }
0x1b30   : > { %v3981_v38 = vrot.slane %v3810_v9, %v7495_v51  ;;  %v3912_v22 = vrot.slane %v3768_v55, %v7502_v30 }
0x1b33   : > { %v3771_v19 = vpop.xlane.xlu1 %3770  ;;  %v3813_v48 = vpop.xlane.xlu0 %3812 }
0x1b34   : > { %v3986_v45 = vrot.slane %v3813_v48, %v7498_v20  ;;  %v3917_v52 = vrot.slane %v3771_v19, %v7505_v56  ;;  %v3982_v48 = vsel %vm10121_vm11, %v3981_v38, %v3977_v44  ;;  %v3913_v19 = vsel %vm10124_vm3, %v3912_v22, %v3908_v63  ;;  %vm10127_vm11 = vmmov %vm10126_vm9 }
0x1b35   : > { %vm10130_vm3 = vcmask 786112  }
0x1b36   : > { %v3987_v55 = vsel %vm10123_vm12, %v3986_v45, %v3982_v48  ;;  %v3918_v25 = vsel %vm10126_vm9, %v3917_v52, %v3913_v19  ;;  %vm10129_vm12 = vmmov %vm10128_vm8  ;;  %vm10132_vm9 = vcmask 851712  }
0x1b37   : > { %v3774_v8 = vpop.xlane.xlu1 %3773  ;;  %v3816_v35 = vpop.xlane.xlu0 %3815 }
0x1b38   : > { %v3991_v60 = vrot.slane %v3816_v35, %v7502_v30  ;;  %v3922_v2 = vrot.slane %v3774_v8, %v7520_v28 }
0x1b3a   : > { %v3923_v40 = vsel %vm10128_vm8, %v3922_v2, %v3918_v25  ;;  %vm10134_vm8 = vcmp.lt.s32.totalorder %v7020_v27, 8 }
0x1b3b   : > { %v8789_v42 = vpop.xlane.xlu1 %3776  ;;  %v3819_v21 = vpop.xlane.xlu0 %3818 }
0x1b3c   : > { %v3996_v29 = vrot.slane %v3819_v21, %v7505_v56  ;;  %v3927_v9 = vrot.slane %v8789_v42, %v7527_v10  ;;  %v3992_v21 = vsel %vm10125_vm10, %v3991_v60, %v3987_v55  ;;  %vm10131_vm10 = vmmov %vm10130_vm3 }
0x1b3e   : > { %v3997_v6 = vsel %vm10127_vm11, %v3996_v29, %v3992_v21  ;;  %vm10133_vm11 = vmmov %vm10132_vm9 }
0x1b3f   : > { %v8791_v58 = vpop.xlane.xlu1 %3779  ;;  %v3822_v4 = vpop.xlane.xlu0 %3821 }
0x1b40   : > { %v4001_v16 = vrot.slane %v3822_v4, %v7520_v28  ;;  %v3932_v7 = vrot.slane %v8791_v58, %v7530_v23 }
0x1b42   : > { %v4002_v62 = vsel %vm10129_vm12, %v4001_v16, %v3997_v6  ;;  %vm10135_vm12 = vcmask 1041408  }
0x1b43   : > { %v8793_v0 = vpop.xlane.xlu1 %3782  ;;  %v3825_v14 = vpop.xlane.xlu0 %3824 }
0x1b44   : > { %v4006_v35 = vrot.slane %v3825_v14, %v7527_v10  ;;  %v3937_v42 = vrot.slane %v8793_v0, %v7539_v34 }
0x1b46   : > { %v4007_v38 = vsel %vm10131_vm10, %v4006_v35, %v4002_v62 }
0x1b47   : > { %v3828_v53 = vpop.xlane.xlu0 %3827  ;;  %v3786_v17 = vpop.xlane.xlu1 %3785 }
0x1b48   : > { %v4011_v8 = vrot.slane %v3828_v53, %v7530_v23  ;;  %v3942_v43 = vrot.slane %v3786_v17, %v7546_v57  ;;  %v3928_v53 = vsel %vm10130_vm3, %v3927_v9, %v3923_v40  ;;  %vm10136_vm3 = vmmov %vm10135_vm12 }
0x1b49   : > { %v3933_v46 = vsel %vm10132_vm9, %v3932_v7, %v3928_v53  ;;  %v8869_v7 = vstv %s4440_s16 }
0x1b4a   : > { %v4012_v0 = vsel %vm10133_vm11, %v4011_v8, %v4007_v38  ;;  %v3938_v12 = vsel %vm1338_vm4, %v3937_v42, %v3933_v46  ;;  %vm4442_vm10 = vcmp.eq.s32.totalorder %v8869_v7, 1 }
0x1b4b   : > { %v3831_v11 = vpop.xlane.xlu0 %3830  ;;  %v3789_v39 = vpop.xlane.xlu1 %3788  ;;  %v3943_v17 = vsel %vm1345_vm13, %v3942_v43, %v3938_v12  ;;  %v4452_v8 = vsel %vm4442_vm10, %v8439_v13, %v8397_v37  ;;  %v4282_v37 = vld [vmem:[%s9739_s11] sm:$0xff] }
0x1b4c   : > { %v4016_v14 = vrot.slane %v3831_v11, %v7539_v34  ;;  %v3947_v1 = vrot.slane %v3789_v39, %v7549_v47  ;;  %v4285_v39 = vld [vmem:[%s9739_s11 + $0x18] sm:$0xff] }
0x1b4d   : > { %6395 = vmatpush3.msra.mxu0 %v4285_v39 }
0x1b4e   : > { %v4017_v54 = vsel %vm1338_vm4, %v4016_v14, %v4012_v0  ;;  %v3948_v11 = vsel %vm1352_vm14, %v3947_v1, %v3943_v17  ;;  %6396 = vmatprep.subr.mxu0 %v9963_v18 }
0x1b4f   : > { %v3834_v4 = vpop.xlane.xlu0 %3833 }
0x1b50   : > { %v4021_v58 = vrot.slane %v3834_v4, %v7546_v57  ;;  %v4284_v4 = vld [vmem:[%s9739_s11 + $0x10] sm:$0xff] }
0x1b51   : > { %6397 = vmatpush3.msra.mxu0 %v4284_v4 }
0x1b52   : > { %v4022_v60 = vsel %vm1345_vm13, %v4021_v58, %v4017_v54  ;;  %6398 = vmatprep.subr.mxu0 %v9963_v18 }
0x1b53   : > { %v3837_v45 = vpop.xlane.xlu0 %3836 }
0x1b54   : > { %v4026_v22 = vrot.slane %v3837_v45, %v7549_v47 }
0x1b56   : > { %v4027_v41 = vsel %vm1352_vm14, %v4026_v22, %v4022_v60 }
0x1b57   : > { %v4028_v44 = vsel %vm1433_vm15, %v4027_v41, %v3948_v11 }
0x1b58   : > { %v4030_v52 = vsel %vm10134_vm8, %v4028_v44, -1e+30  ;;  %vm10213_vm8 = vcmask 458112  }
0x1b59   : > { %v4031_v29 = vsel %vm10135_vm12, %v4030_v52, -inf  ;;  %vm10214_vm12 = vmmov %vm10213_vm8 }
0x1b5a   : > { %4032 = vmax.xlane.f32.xlu1 %v4031_v29 }
0x1be3   : > { %v4033_v59 = vpop.xlane.xlu1 %4032 }
0x1be4   : > { %v4034_v48 = vsub.f32 %v4030_v52, %v4033_v59  ;;  %v10137_v52 = vld [vmem:[#allocation40_spill] sm:$0xff] }
0x1be6   : > { %v4035_v2 = vmul.f32 1.442695, %v4034_v48 }
0x1be8   : > { %6607 = vpow2.f32 %v4035_v2 }
0x1bf5   : > { %v6608_v16 = vpop.eup %6607 }
0x1bf6   : > { %v4037_v63 = vsel %vm10136_vm3, %v6608_v16, 0.0  ;;  %vm10215_vm3 = vcmask 523712  }
0x1bf7   : > { %4038 = vadd.xlane.f32.xlu0 %v4037_v63 }
0x1c80   : > { %v4039_v55 = vpop.xlane.xlu0 %4038 }
0x1c81   : > { %6609 = vrcp.f32 %v4039_v55 }
0x1c8e   : > { %v6610_v9 = vpop.eup %6609 }
0x1c8f   : > { %v4041_v35 = vmul.f32 %v6610_v9, %v6608_v16  ;;  %v10140_v9 = vld [vmem:[#allocation38_spill] sm:$0xff] }
0x1c91   : > { %v4045_v19 = vrot.slane %v4041_v35, %v7149_v33  ;;  %6005 = vst [vmem:[%s6953_s21 + $0x4] sm:$0x3] %v4041_v35  ;;  %v4112_v21 = vrot.slane %v4041_v35, %v7626_v49 }
0x1c93   : > { %4051 = vbcast.lane.b32.xlu0 %v4045_v19, 264  ;;  %4047 = vbcast.lane.b32.xlu1 %v4045_v19, 256 }
0x1c97   : > { %4055 = vbcast.lane.b32.xlu0 %v4045_v19, 272  ;;  %4114 = vbcast.lane.b32.xlu1 %v4112_v21, 256 }
0x1c9b   : > { %4059 = vbcast.lane.b32.xlu0 %v4045_v19, 280  ;;  %4118 = vbcast.lane.b32.xlu1 %v4112_v21, 264 }
0x1c9f   : > { %4063 = vbcast.lane.b32.xlu0 %v4045_v19, 288  ;;  %4122 = vbcast.lane.b32.xlu1 %v4112_v21, 272 }
0x1ca3   : > { %4067 = vbcast.lane.b32.xlu0 %v4045_v19, 296  ;;  %4126 = vbcast.lane.b32.xlu1 %v4112_v21, 280 }
0x1ca7   : > { %4071 = vbcast.lane.b32.xlu0 %v4045_v19, 304  ;;  %4130 = vbcast.lane.b32.xlu1 %v4112_v21, 288 }
0x1cab   : > { %4075 = vbcast.lane.b32.xlu0 %v4045_v19, 312  ;;  %4134 = vbcast.lane.b32.xlu1 %v4112_v21, 296 }
0x1caf   : > { %4079 = vbcast.lane.b32.xlu0 %v4045_v19, 320  ;;  %4138 = vbcast.lane.b32.xlu1 %v4112_v21, 304 }
0x1cb3   : > { %4083 = vbcast.lane.b32.xlu0 %v4045_v19, 328  ;;  %4142 = vbcast.lane.b32.xlu1 %v4112_v21, 312 }
0x1cb7   : > { %4087 = vbcast.lane.b32.xlu0 %v4045_v19, 336  ;;  %4146 = vbcast.lane.b32.xlu1 %v4112_v21, 320 }
0x1cbb   : > { %4091 = vbcast.lane.b32.xlu0 %v4045_v19, 344  ;;  %4150 = vbcast.lane.b32.xlu1 %v4112_v21, 328 }
0x1cbf   : > { %4095 = vbcast.lane.b32.xlu0 %v4045_v19, 352  ;;  %4154 = vbcast.lane.b32.xlu1 %v4112_v21, 336 }
0x1cc3   : > { %4099 = vbcast.lane.b32.xlu0 %v4045_v19, 360  ;;  %4158 = vbcast.lane.b32.xlu1 %v4112_v21, 344 }
0x1cc7   : > { %4103 = vbcast.lane.b32.xlu0 %v4045_v19, 368  ;;  %4162 = vbcast.lane.b32.xlu1 %v4112_v21, 352 }
0x1ccb   : > { %4107 = vbcast.lane.b32.xlu0 %v4045_v19, 376  ;;  %4166 = vbcast.lane.b32.xlu1 %v4112_v21, 360 }
0x1ccf   : > { %4443 = vrot.lane.b32.xlu0 %v8388_v26, %s10043_s26  ;;  %4170 = vbcast.lane.b32.xlu1 %v4112_v21, 368  ;;  %v4283_v26 = vld [vmem:[%s9739_s11 + $0x8] sm:$0xff] }
0x1cd0   : > { %6399 = vmatpush3.msra.mxu0 %v4283_v26 }
0x1cd1   : > { %6400 = vmatprep.subr.mxu0 %v9963_v18 }
0x1cd2   : > { %6401 = vmatpush3.msra.mxu0 %v4282_v37 }
0x1cd3   : > { %4454 = vrot.lane.b32.xlu0 %v4452_v8, %s10043_s26  ;;  %4174 = vbcast.lane.b32.xlu1 %v4112_v21, 376  ;;  %v10141_v21 = vld [vmem:[#allocation41_spill] sm:$0xff]  ;;  %v10142_v8 = vld [vmem:[#allocation44_spill] sm:$0xff] }
0x1cd4   : > { %6416 = vmatprep.subr.mxu0 %v9963_v18 }
0x1d05   : > { %v4052_v13 = vpop.permute.xlu0 %4051  ;;  %v4048_v25 = vpop.permute.xlu1 %4047 }
0x1d06   : > { %v4177_v45 = vmul.f32 %v4052_v13, %v8529_v61  ;;  %v4176_v12 = vmul.f32 %v4048_v25, %v8534_v32  ;;  %v10138_v32 = vld [vmem:[#allocation39_spill] sm:$0xff] }
0x1d08   : > { %v4209_v60 = vsel %vm559_vm1, %v4177_v45, 0.0  ;;  %v4208_v11 = vsel %vm559_vm1, %v4176_v12, 0.0  ;;  %v10145_v12 = vld [vmem:[#allocation46_spill] sm:$0xff] }
0x1d09   : > { %v4056_v6 = vpop.permute.xlu0 %4055  ;;  %v4115_v42 = vpop.permute.xlu1 %4114  ;;  %v4210_v59 = vadd.f32 %v4209_v60, %v4208_v11 }
0x1d0a   : > { %v4178_v54 = vmul.f32 %v4056_v6, %v8543_v5  ;;  %v10139_v5 = vld [vmem:[#allocation42_spill] sm:$0xff]  ;;  %v4192_v35 = vmul.f32 %v4115_v42, %v10140_v9  ;;  %v10143_v6 = vld [vmem:[#allocation43_spill] sm:$0xff] }
0x1d0b   : > { %v10150_v9 = vld [vmem:[#allocation23_spill] sm:$0xff] }
0x1d0c   : > { %v4211_v44 = vsel %vm559_vm1, %v4178_v54, 0.0  ;;  %v10146_v54 = vld [vmem:[#allocation47_spill] sm:$0xff] }
0x1d0d   : > { %v4060_v14 = vpop.permute.xlu0 %4059  ;;  %v4119_v40 = vpop.permute.xlu1 %4118  ;;  %v4212_v55 = vadd.f32 %v4211_v44, %v4210_v59 }
0x1d0e   : > { %v4179_v41 = vmul.f32 %v4060_v14, %v8566_v15  ;;  %v4193_v16 = vmul.f32 %v4119_v40, %v10138_v32  ;;  %v10144_v40 = vld [vmem:[#allocation45_spill] sm:$0xff] }
0x1d10   : > { %v4213_v61 = vsel %vm559_vm1, %v4179_v41, 0.0  ;;  %v4246_v13 = vsel %vm559_vm1, %v4193_v16, 0.0 }
0x1d11   : > { %v4064_v62 = vpop.permute.xlu0 %4063  ;;  %v4123_v43 = vpop.permute.xlu1 %4122  ;;  %v4214_v4 = vadd.f32 %v4213_v61, %v4212_v55  ;;  %v10148_v61 = vld [vmem:[#allocation49_spill] sm:$0xff]  ;;  %v10149_v55 = vld [vmem:[#allocation50_spill] sm:$0xff] }
0x1d12   : > { %v4180_v29 = vmul.f32 %v4064_v62, %v10137_v52  ;;  %v4194_v15 = vmul.f32 %v4123_v43, %v10141_v21 }
0x1d14   : > { %v4215_v19 = vsel %vm559_vm1, %v4180_v29, 0.0  ;;  %v4248_v45 = vsel %vm559_vm1, %v4194_v15, 0.0 }
0x1d15   : > { %v4068_v58 = vpop.permute.xlu0 %4067  ;;  %v4127_v53 = vpop.permute.xlu1 %4126  ;;  %v4216_v42 = vadd.f32 %v4215_v19, %v4214_v4  ;;  %v10151_v4 = vld [vmem:[#allocation51_spill] sm:$0xff] }
0x1d16   : > { %v4181_v63 = vmul.f32 %v4068_v58, %v10139_v5  ;;  %v4195_v14 = vmul.f32 %v4127_v53, %v10143_v6  ;;  %v4245_v58 = vsel %vm559_vm1, %v4192_v35, 0.0 }
0x1d17   : > { %v4247_v11 = vadd.f32 %v4246_v13, %v4245_v58  ;;  %v10152_v13 = vld [vmem:[#allocation26_spill] sm:$0xff]  ;;  %v10154_v58 = vld [vmem:[#allocation28_spill] sm:$0xff] }
0x1d18   : > { %v4217_v25 = vsel %vm559_vm1, %v4181_v63, 0.0  ;;  %v4250_v29 = vsel %vm559_vm1, %v4195_v14, 0.0 }
0x1d19   : > { %v4072_v38 = vpop.permute.xlu0 %4071  ;;  %v4131_v1 = vpop.permute.xlu1 %4130  ;;  %v4218_v41 = vadd.f32 %v4217_v25, %v4216_v42  ;;  %v4249_v16 = vadd.f32 %v4248_v45, %v4247_v11 }
0x1d1a   : > { %v4182_v39 = vmul.f32 %v4072_v38, %v10142_v8  ;;  %v4196_v38 = vmul.f32 %v4131_v1, %v10145_v12 }
0x1d1b   : > { %v4251_v19 = vadd.f32 %v4250_v29, %v4249_v16 }
0x1d1c   : > { %v4219_v43 = vsel %vm559_vm1, %v4182_v39, 0.0  ;;  %v4252_v63 = vsel %vm559_vm1, %v4196_v38, 0.0 }
0x1d1d   : > { %v4076_v46 = vpop.permute.xlu0 %4075  ;;  %v4135_v0 = vpop.permute.xlu1 %4134  ;;  %v4220_v5 = vadd.f32 %v4219_v43, %v4218_v41  ;;  %v4253_v6 = vadd.f32 %v4252_v63, %v4251_v19  ;;  %v10156_v41 = vld [vmem:[#allocation55_spill] sm:$0xff] }
0x1d1e   : > { %v4183_v62 = vmul.f32 %v4076_v46, %v10144_v40  ;;  %v10147_v46 = vld [vmem:[#allocation48_spill] sm:$0xff] }
0x1d1f   : > { %v4197_v59 = vmul.f32 %v4135_v0, %v10147_v46 }
0x1d20   : > { %v4221_v53 = vsel %vm559_vm1, %v4183_v62, 0.0  ;;  %v10153_v62 = vld [vmem:[#allocation24_spill] sm:$0xff] }
0x1d21   : > { %v4080_v22 = vpop.permute.xlu0 %4079  ;;  %v4139_v17 = vpop.permute.xlu1 %4138  ;;  %v4222_v21 = vadd.f32 %v4221_v53, %v4220_v5  ;;  %v4254_v39 = vsel %vm559_vm1, %v4197_v59, 0.0  ;;  %v10157_v59 = vld [vmem:[#allocation54_spill] sm:$0xff] }
0x1d22   : > { %v4184_v60 = vmul.f32 %v4080_v22, %v10146_v54  ;;  %v4198_v22 = vmul.f32 %v4139_v17, %v10149_v55  ;;  %v4255_v45 = vadd.f32 %v4254_v39, %v4253_v6 }
0x1d24   : > { %v4223_v1 = vsel %vm559_vm1, %v4184_v60, 0.0  ;;  %v4256_v40 = vsel %vm559_vm1, %v4198_v22, 0.0  ;;  %v10155_v60 = vld [vmem:[#allocation25_spill] sm:$0xff]  ;;  %v10158_v22 = vld [vmem:[#allocation56_spill] sm:$0xff] }
0x1d25   : > { %v4084_v48 = vpop.permute.xlu0 %4083  ;;  %v4143_v2 = vpop.permute.xlu1 %4142  ;;  %v4224_v14 = vadd.f32 %v4223_v1, %v4222_v21  ;;  %v4257_v29 = vadd.f32 %v4256_v40, %v4255_v45 }
0x1d26   : > { %v4185_v32 = vmul.f32 %v4084_v48, %v10148_v61  ;;  %v4199_v48 = vmul.f32 %v4143_v2, %v10151_v4 }
0x1d28   : > { %v4225_v0 = vsel %vm559_vm1, %v4185_v32, 0.0  ;;  %v4258_v54 = vsel %vm559_vm1, %v4199_v48, 0.0 }
0x1d29   : > { %v4088_v26 = vpop.permute.xlu0 %4087  ;;  %v4147_v37 = vpop.permute.xlu1 %4146  ;;  %v4226_v43 = vadd.f32 %v4225_v0, %v4224_v14  ;;  %v4259_v32 = vadd.f32 %v4258_v54, %v4257_v29  ;;  %v10160_v0 = vld [vmem:[#allocation57_spill] sm:$0xff]  ;;  %v10161_v14 = vld [vmem:[#allocation58_spill] sm:$0xff] }
0x1d2a   : > { %v4186_v35 = vmul.f32 %v4088_v26, %v10150_v9  ;;  %v4200_v26 = vmul.f32 %v4147_v37, %v10153_v62  ;;  %v10159_v9 = vld [vmem:[#allocation30_spill] sm:$0xff] }
0x1d2c   : > { %v4227_v17 = vsel %vm559_vm1, %v4186_v35, 0.0  ;;  %v4260_v46 = vsel %vm559_vm1, %v4200_v26, 0.0 }
0x1d2d   : > { %v4092_v44 = vpop.permute.xlu0 %4091  ;;  %v4151_v52 = vpop.permute.xlu1 %4150  ;;  %v4228_v53 = vadd.f32 %v4227_v17, %v4226_v43  ;;  %v4261_v19 = vadd.f32 %v4260_v46, %v4259_v32  ;;  %v10162_v17 = vld [vmem:[#allocation31_spill] sm:$0xff] }
0x1d2e   : > { %v4187_v25 = vmul.f32 %v4092_v44, %v10152_v13  ;;  %v4201_v11 = vmul.f32 %v4151_v52, %v10155_v60  ;;  %v10163_v60 = vld [vmem:[#allocation52_spill] sm:$0xff] }
0x1d30   : > { %v4229_v2 = vsel %vm559_vm1, %v4187_v25, 0.0  ;;  %v4262_v1 = vsel %vm559_vm1, %v4201_v11, 0.0 }
0x1d31   : > { %v4096_v15 = vpop.permute.xlu0 %4095  ;;  %v4155_v8 = vpop.permute.xlu1 %4154  ;;  %v4230_v16 = vadd.f32 %v4229_v2, %v4228_v53  ;;  %v4263_v4 = vadd.f32 %v4262_v1, %v4261_v19 }
0x1d32   : > { %v4188_v42 = vmul.f32 %v4096_v15, %v10154_v58  ;;  %v4202_v61 = vmul.f32 %v4155_v8, %v10157_v59 }
0x1d34   : > { %v4231_v37 = vsel %vm559_vm1, %v4188_v42, 0.0  ;;  %v4264_v15 = vsel %vm559_vm1, %v4202_v61, 0.0 }
0x1d35   : > { %v4100_v12 = vpop.permute.xlu0 %4099  ;;  %v4159_v38 = vpop.permute.xlu1 %4158  ;;  %v4232_v21 = vadd.f32 %v4231_v37, %v4230_v16  ;;  %v4265_v26 = vadd.f32 %v4264_v15, %v4263_v4  ;;  %v10165_v16 = vld [vmem:[#allocation32_spill] sm:$0xff] }
0x1d36   : > { %v4189_v44 = vmul.f32 %v4100_v12, %v10156_v41  ;;  %v4203_v52 = vmul.f32 %v4159_v38, %v10158_v22  ;;  %v10164_v41 = vld [vmem:[#allocation29_spill] sm:$0xff] }
0x1d38   : > { %v4233_v55 = vsel %vm559_vm1, %v4189_v44, 0.0  ;;  %v4266_v6 = vsel %vm559_vm1, %v4203_v52, 0.0 }
0x1d39   : > { %v4104_v5 = vpop.permute.xlu0 %4103  ;;  %v4163_v63 = vpop.permute.xlu1 %4162  ;;  %v4234_v48 = vadd.f32 %v4233_v55, %v4232_v21  ;;  %v4267_v43 = vadd.f32 %v4266_v6, %v4265_v26  ;;  %v4564_v6 = vld [vmem:[%s9734_s6 + $0x10] sm:$0xff]  ;;  %v4485_v26 = vld [vmem:[%s9733_s5 + $0x8] sm:$0xff] }
0x1d3a   : > { %v4190_v35 = vmul.f32 %v4104_v5, %v10159_v9  ;;  %v4204_v8 = vmul.f32 %v4163_v63, %v10160_v0  ;;  %v6639_v0 = vld [vmem:[#allocation2 + $0x2] sm:$0x3] }
0x1d3c   : > { %v4235_v39 = vsel %vm559_vm1, %v4190_v35, 0.0  ;;  %v4268_v42 = vsel %vm559_vm1, %v4204_v8, 0.0 }
0x1d3d   : > { %v4108_v13 = vpop.permute.xlu0 %4107  ;;  %v4167_v25 = vpop.permute.xlu1 %4166  ;;  %v4236_v58 = vadd.f32 %v4235_v39, %v4234_v48  ;;  %v4269_v29 = vadd.f32 %v4268_v42, %v4267_v43 }
0x1d3e   : > { %v4191_v40 = vmul.f32 %v4108_v13, %v10161_v14  ;;  %v4205_v62 = vmul.f32 %v4167_v25, %v10162_v17  ;;  %v4565_v13 = vld [vmem:[%s9734_s6 + $0x18] sm:$0xff]  ;;  %v4563_v14 = vld [vmem:[%s9734_s6 + $0x8] sm:$0xff] }
0x1d3f   : > { %v4487_v17 = vld [vmem:[%s9733_s5 + $0x18] sm:$0xff] }
0x1d40   : > { %v4237_v45 = vsel %vm559_vm1, %v4191_v40, 0.0  ;;  %v4270_v2 = vsel %vm559_vm1, %v4205_v62, 0.0  ;;  %v4562_v40 = vld [vmem:[%s9734_s6] sm:$0xff]  ;;  %v4486_v62 = vld [vmem:[%s9733_s5 + $0x10] sm:$0xff]  ;;  %6406 = vmatpush3.msra.mxu1 %v4487_v17 }
0x1d41   : > { %v4238_v12 = vadd.f32 %v4237_v45, %v4236_v58  ;;  %v4444_v38 = vpop.permute.xlu0 %4443  ;;  %v4171_v54 = vpop.permute.xlu1 %4170  ;;  %v4271_v59 = vadd.f32 %v4270_v2, %v4269_v29  ;;  %6407 = vmatprep.subr.mxu1 %v9963_v18  ;;  %v4484_v58 = vld [vmem:[%s9733_s5] sm:$0xff]  ;;  %v4759_v45 = vld [vmem:[%s9736_s8 + $0x18] sm:$0xff] }
0x1d42   : > { %v4446_v11 = vsel %vm4442_vm10, %v10163_v60, %v4444_v38  ;;  %v4206_v44 = vmul.f32 %v4171_v54, %v10164_v41  ;;  %6408 = vmatpush3.msra.mxu1 %v4486_v62  ;;  %v4757_v54 = vld [vmem:[%s9736_s8 + $0x8] sm:$0xff]  ;;  %v4756_v2 = vld [vmem:[%s9736_s8] sm:$0xff] }
0x1d43   : > { %v4239_v53 = vrot.slane %v4238_v12, 4  ;;  %4448 = vrot.lane.b32.xlu1 %v4446_v11, %s10072_s20  ;;  %6409 = vmatprep.subr.mxu1 %v9963_v18  ;;  %v10166_v11 = vld [vmem:[#allocation37_spill] sm:$0xff]  ;;  %v10168_v29 = vld [vmem:[#allocation36_spill] sm:$0xff] }
0x1d44   : > { %v4272_v46 = vsel %vm559_vm1, %v4206_v44, 0.0  ;;  %6410 = vmatpush3.msra.mxu1 %v4485_v26  ;;  %v10167_v44 = vld [vmem:[#allocation35_spill] sm:$0xff] }
0x1d45   : > { %v4240_v37 = vadd.f32 %v4239_v53, %v4238_v12  ;;  %v4455_v61 = vpop.permute.xlu0 %4454  ;;  %v4175_v32 = vpop.permute.xlu1 %4174  ;;  %v4273_v63 = vadd.f32 %v4272_v46, %v4271_v59  ;;  %6411 = vmatprep.subr.mxu1 %v9963_v18  ;;  %v4758_v12 = vld [vmem:[%s9736_s8 + $0x10] sm:$0xff]  ;;  %v4467_v53 = vsel %vm4442_vm10, %v10168_v29, %v10167_v44  ;;  %v6011_v29 = vld [vmem:[%s9737_s9] ss:$0 sm:$0xff] }
0x1d46   : > { %4457 = vst.msk [vmem:[#allocation3] sm:$0x3] %vm1843_vm0, %v4455_v61  ;;  %v4207_v5 = vmul.f32 %v4175_v32, %v10165_v16  ;;  %6412 = vmatpush3.msra.mxu1 %v4484_v58  ;;  %v6640_v16 = vld [vmem:[#allocation4] sm:$0x3] }
0x1d47   : > { %v4241_v55 = vrot.slane %v4240_v37, 2  ;;  %6427 = vmatprep.subr.mxu1 %v9963_v18 }
0x1d48   : > { %v4274_v1 = vsel %vm559_vm1, %v4207_v5, 0.0 }
0x1d49   : > { %v4275_v22 = vadd.f32 %v4274_v1, %v4273_v63  ;;  %v4242_v9 = vadd.f32 %v4241_v55, %v4240_v37  ;;  %v10169_v37 = vld [vmem:[#allocation33_spill] sm:$0xff] }
0x1d4b   : > { %v4276_v52 = vrot.slane %v4275_v22, 4  ;;  %v4243_v15 = vrot.slane %v4242_v9, 1 }
0x1d4d   : > { %v4277_v35 = vadd.f32 %v4276_v52, %v4275_v22  ;;  %v4479_v19 = vld [vmem:[#allocation3] sm:$0x3]  ;;  %v4244_v4 = vadd.f32 %v4243_v15, %v4242_v9 }
0x1d4e   : > { %4649 = vrot.lane.b32.xlu0 %v4479_v19, %s10072_s20 }
0x1d4f   : > { %v4278_v21 = vrot.slane %v4277_v35, 2 }
0x1d51   : > { %v4279_v39 = vadd.f32 %v4278_v21, %v4277_v35  ;;  %v6006_v35 = vld [vmem:[%s6949_s27 + $0x6] sm:$0x3] }
0x1d52   : > { %4458 = vrot.lane.b32.xlu0 %v6639_v0, %s10043_s26 }
0x1d53   : > { %v4280_v8 = vrot.slane %v4279_v39, 1 }
0x1d55   : > { %v4281_v48 = vadd.f32 %v4280_v8, %v4279_v39 }
0x1d57   : > { %v4362_v25 = vsel %vm1433_vm15, %v4281_v48, %v4244_v4 }
0x1d58   : > { %6403 = vmatmul.mubr.msk.f32.vlgmr.msra.gmra.mxu0 %vm559_vm1, %v4362_v25 }
0x1d59   : > { %6417 = vmatpush3.msra.mxu0 %v4565_v13  ;;  %6424 = vmatprep.mubr.msk.f32.mxu0 %vm6791_vm2, %v9963_v18 }
0x1d5a   : > { %6418 = vmatprep.subr.mxu0 %v9963_v18 }
0x1d5b   : > { %6419 = vmatpush3.msra.mxu0 %v4564_v6 }
0x1d5c   : > { %6420 = vmatprep.subr.mxu0 %v9963_v18 }
0x1d5d   : > { %6421 = vmatpush3.msra.mxu0 %v4563_v14 }
0x1d5e   : > { %6422 = vmatprep.subr.mxu0 %v9963_v18 }
0x1d5f   : > { %6423 = vmatpush3.msra.mxu0 %v4562_v40 }
0x1d60   : > { %6438 = vmatprep.subr.mxu0 %v9963_v18 }
0x1db5   : > { %v4449_v42 = vpop.permute.xlu1 %4448 }
0x1db6   : > { %4451 = vst.msk [vmem:[#allocation2] sm:$0x3] %vm1843_vm0, %v4449_v42 }
0x1dbd   : > { %v9006_v43 = vld [vmem:[#allocation2] sm:$0x3] }
0x1dbe   : > { %6425 = vmatmul.mubr.msk.f32.vlgmr.msra.gmra.mxu0 %vm559_vm1, %v9006_v43 }
0x1dbf   : > { %6439 = vmatpush3.msra.mxu0 %v4759_v45  ;;  %6446 = vmatprep.mubr.msk.f32.mxu0 %vm6791_vm2, %v9963_v18  ;;  %v4673_v45 = vld [vmem:[%s9735_s7 + $0x18] sm:$0xff] }
0x1dc0   : > { %v9015_v38 = vpop.permute.xlu0 %4649  ;;  %6440 = vmatprep.subr.mxu0 %v9963_v18 }
0x1dc1   : > { %6441 = vmatpush3.msra.mxu0 %v4758_v12  ;;  %v4672_v12 = vld [vmem:[%s9735_s7 + $0x10] sm:$0xff] }
0x1dc2   : > { %6442 = vmatprep.subr.mxu0 %v9963_v18 }
0x1dc3   : > { %6443 = vmatpush3.msra.mxu0 %v4757_v54  ;;  %v4671_v54 = vld [vmem:[%s9735_s7 + $0x8] sm:$0xff] }
0x1dc4   : > { %v4459_v60 = vpop.permute.xlu0 %4458  ;;  %6444 = vmatprep.subr.mxu0 %v9963_v18 }
0x1dc5   : > { %v4461_v41 = vsel %vm4442_vm10, %v10166_v11, %v4459_v60  ;;  %6445 = vmatpush3.msra.mxu0 %v4756_v2  ;;  %v4670_v2 = vld [vmem:[%s9735_s7] sm:$0xff] }
0x1dc6   : > { %4463 = vrot.lane.b32.xlu0 %v4461_v41, %s10072_s20  ;;  %6460 = vmatprep.subr.mxu0 %v9963_v18 }
0x1dca   : > { %4469 = vrot.lane.b32.xlu0 %v4467_v53, %s10043_s26 }
0x1e18   : > { %v4431_v46 = vpop.f32.mrf.mxu0 }
0x1e19   : > { %v4432_v59 = vadd.f32 %v4431_v46, %v10169_v37 }
0x1e1a   : > { %v6404_v61 = vpop.f32.mrf.mxu0 }
0x1e1b   : > { %6611 = vtanh.f32 %v4432_v59 }
0x1e28   : > { %v6612_v32 = vpop.eup %6611 }
0x1e29   : > { %6004 = vst.msk [vmem:[%s6951_s17 + $0x4] sm:$0x3] %vm1843_vm0, %v6612_v32  ;;  %v4473_v5 = vsel %vm4442_vm10, %v6612_v32, %v6640_v16  ;;  %vm10216_vm10 = vmmov %vm10215_vm3 }
0x1e2a   : > { %4474 = vst.msk [vmem:[#allocation4] sm:$0x3] %vm1843_vm0, %v4473_v5 }
0x1e31   : > { %v4477_v63 = vld [vmem:[#allocation4] sm:$0x3] }
0x1e32   : > { %6414 = vmatmul.mubr.msk.f32.vlgmr.msra.gmra.mxu1 %vm559_vm1, %v4477_v63 }
0x1e33   : > { %6435 = vmatprep.mubr.msk.f32.mxu1 %vm6791_vm2, %v9963_v18  ;;  %6428 = vmatpush3.msra.mxu1 %v4673_v45 }
0x1e34   : > { %6429 = vmatprep.subr.mxu1 %v9963_v18 }
0x1e35   : > { %6430 = vmatpush3.msra.mxu1 %v4672_v12 }
0x1e36   : > { %6431 = vmatprep.subr.mxu1 %v9963_v18 }
0x1e37   : > { %6432 = vmatpush3.msra.mxu1 %v4671_v54 }
0x1e38   : > { %v4464_v1 = vpop.permute.xlu0 %4463  ;;  %6433 = vmatprep.subr.mxu1 %v9963_v18 }
0x1e39   : > { %4466 = vst.msk [vmem:[#allocation2 + $0x2] sm:$0x3] %vm1843_vm0, %v4464_v1  ;;  %6434 = vmatpush3.msra.mxu1 %v4670_v2 }
0x1e3a   : > { %6449 = vmatprep.subr.mxu1 %v9963_v18 }
0x1e3c   : > { %v4470_v55 = vpop.permute.xlu0 %4469 }
0x1e3d   : > { %4472 = vst.msk [vmem:[#allocation3 + $0x2] sm:$0x3] %vm1843_vm0, %v4470_v55 }
0x1e40   : > { %v9047_v22 = vld [vmem:[#allocation2 + $0x2] sm:$0x3] }
0x1e41   : > { %6447 = vmatmul.mubr.msk.f32.vlgmr.msra.gmra.mxu0 %vm559_vm1, %v9047_v22 }
0x1e42   : > { %6468 = vmatprep.mubr.msk.f32.mxu0 %vm6791_vm2, %v9963_v18 }
0x1e44   : > { %v4481_v7 = vld [vmem:[#allocation3 + $0x2] sm:$0x3] }
0x1e45   : > { %4843 = vrot.lane.b32.xlu0 %v4481_v7, %s10072_s20 }
0x1e7e   : > { %v4635_v52 = vpop.f32.mrf.mxu0 }
0x1e80   : > { %v6426_v9 = vpop.f32.mrf.mxu0 }
0x1ef2   : > { %v4557_v19 = vpop.f32.mrf.mxu1 }
0x1ef3   : > { %v4561_v21 = vadd.f32 %v6006_v35, %v4557_v19 }
0x1ef4   : > { %v6415_v15 = vpop.f32.mrf.mxu1 }
0x1ef5   : > { %v4639_v39 = vadd.f32 %v4635_v52, %v4561_v21  ;;  %v9094_v52 = vpop.permute.xlu0 %4843  ;;  %v4866_v21 = vld [vmem:[%s9738_s10 + $0x18] sm:$0xff] }
0x1ef6   : > { %v5586_v15 = vld [vmem:[%s9740_s12 + $0x18] sm:$0xff] }
0x1ef7   : > { %v6009_v0 = vmul.f32 -1.442695, %v4639_v39  ;;  %6461 = vmatpush3.msra.mxu0 %v5586_v15  ;;  %v9200_v15 = vld [vmem:[%s9729_s1 + $0x20] sm:$0xff] }
0x1ef8   : > { %6462 = vmatprep.subr.mxu0 %v9963_v18  ;;  %10180 = vst [vmem:[#allocation45_spill] sm:$0xff] %v9200_v15 }
0x1ef9   : > { %6613 = vpow2.f32 %v6009_v0  ;;  %v5585_v0 = vld [vmem:[%s9740_s12 + $0x10] sm:$0xff] }
0x1efa   : > { %6615 = vtanh.f32 %v4639_v39  ;;  %v4865_v39 = vld [vmem:[%s9738_s10 + $0x10] sm:$0xff]  ;;  %6463 = vmatpush3.msra.mxu0 %v5585_v0 }
0x1efb   : > { %6464 = vmatprep.subr.mxu0 %v9963_v18 }
0x1f01   : > { %v4829_v8 = vpop.f32.mrf.mxu0 }
0x1f03   : > { %v6448_v4 = vpop.f32.mrf.mxu0 }
0x1f04   : > { %v5584_v4 = vld [vmem:[%s9740_s12 + $0x8] sm:$0xff] }
0x1f05   : > { %6465 = vmatpush3.msra.mxu0 %v5584_v4 }
0x1f06   : > { %v6614_v48 = vpop.eup %6613  ;;  %6466 = vmatprep.subr.mxu0 %v9963_v18 }
0x1f07   : > { %v4644_v13 = vadd.f32 1.0, %v6614_v48  ;;  %v6616_v25 = vpop.eup %6615  ;;  %v4863_v48 = vld [vmem:[%s9738_s10] sm:$0xff] }
0x1f09   : > { %6617 = vrcp.f32 %v4644_v13  ;;  %v5583_v13 = vld [vmem:[%s9740_s12] sm:$0xff] }
0x1f0a   : > { %6467 = vmatpush3.msra.mxu0 %v5583_v13  ;;  %v9216_v13 = vld [vmem:[%s9729_s1 + $0x28] sm:$0xff] }
0x1f0b   : > { %10182 = vst [vmem:[#allocation47_spill] sm:$0xff] %v9216_v13 }
0x1f16   : > { %v6618_v6 = vpop.eup %6617 }
0x1f17   : > { %v4647_v40 = vsel %vm7024_vm5, %v6616_v25, %v6618_v6 }
0x1f18   : > { %4654 = vrot.lane.b32.xlu1 %v4647_v40, %s9993_s30  ;;  %v4652_v26 = vmul.f32 %v9015_v38, %v4647_v40 }
0x1f8a   : > { %v4655_v17 = vpop.permute.xlu1 %4654 }
0x1f8b   : > { %v4657_v62 = vmul.f32 %v4655_v17, %v4647_v40 }
0x1f8d   : > { %4659 = vrot.lane.b32.xlu1 %v4657_v62, %s10072_s20 }
0x1fff   : > { %v4660_v58 = vpop.permute.xlu1 %4659 }
0x2000   : > { %v9060_v42 = vadd.f32 %v4660_v58, %v4652_v26  ;;  %v10174_v26 = vld [vmem:[#allocation27_spill] sm:$0xff] }
0x2002   : > { %6619 = vtanh.f32 %v9060_v42 }
0x200f   : > { %v6620_v60 = vpop.eup %6619 }
0x2010   : > { %4665 = vrot.lane.b32.xlu1 %v6620_v60, %s9993_s30  ;;  %v9147_v60 = vld [vmem:[%s9729_s1 + $0x8] sm:$0xff] }
0x2082   : > { %v4666_v11 = vpop.permute.xlu1 %4665 }
0x2083   : > { %v9080_v41 = vmul.f32 %v4666_v11, %v4647_v40  ;;  %v9152_v11 = vld [vmem:[%s9729_s1] sm:$0xff] }
0x2084   : > { %10175 = vst [vmem:[#allocation42_spill] sm:$0xff] %v9152_v11 }
0x2085   : > { %10171 = vst [vmem:[#allocation34_spill] sm:$0xff] %v9080_v41  ;;  %4675 = vrot.lane.b32.xlu1 %v9080_v41, %s10072_s20 }
0x20f7   : > { %v4676_v44 = vpop.permute.xlu1 %4675 }
0x20f8   : > { %6436 = vmatmul.mubr.msk.f32.vlgmr.msra.gmra.mxu1 %vm559_vm1, %v4676_v44 }
0x20f9   : > { %6457 = vmatprep.mubr.msk.f32.mxu1 %vm6791_vm2, %v9963_v18  ;;  %6450 = vmatpush3.msra.mxu1 %v4866_v21 }
0x20fa   : > { %6451 = vmatprep.subr.mxu1 %v9963_v18 }
0x20fb   : > { %6452 = vmatpush3.msra.mxu1 %v4865_v39  ;;  %v9205_v39 = vld [vmem:[%s9729_s1 + $0x90] sm:$0xff] }
0x20fc   : > { %6453 = vmatprep.subr.mxu1 %v9963_v18  ;;  %10181 = vst [vmem:[#allocation46_spill] sm:$0xff] %v9205_v39 }
0x21b8   : > { %v4745_v53 = vpop.f32.mrf.mxu1 }
0x21b9   : > { %v4755_v46 = vadd.f32 %v6011_v29, %v4745_v53  ;;  %v9161_v53 = vld [vmem:[%s9729_s1 + $0x10] sm:$0xff] }
0x21ba   : > { %v6437_v37 = vpop.f32.mrf.mxu1  ;;  %10176 = vst [vmem:[#allocation38_spill] sm:$0xff] %v9161_v53 }
0x21bb   : > { %v4833_v59 = vadd.f32 %v4829_v8, %v4755_v46  ;;  %v4864_v8 = vld [vmem:[%s9738_s10 + $0x8] sm:$0xff]  ;;  %v9166_v46 = vld [vmem:[%s9729_s1 + $0x80] sm:$0xff] }
0x21bc   : > { %6454 = vmatpush3.msra.mxu1 %v4864_v8  ;;  %10177 = vst [vmem:[#allocation41_spill] sm:$0xff] %v9166_v46 }
0x21bd   : > { %v6013_v61 = vmul.f32 -1.442695, %v4833_v59  ;;  %6455 = vmatprep.subr.mxu1 %v9963_v18 }
0x21be   : > { %6456 = vmatpush3.msra.mxu1 %v4863_v48 }
0x21bf   : > { %6621 = vpow2.f32 %v6013_v61  ;;  %6471 = vmatprep.subr.mxu1 %v9963_v18 }
0x21c0   : > { %6623 = vtanh.f32 %v4833_v59 }
0x21cc   : > { %v6622_v32 = vpop.eup %6621 }
0x21cd   : > { %v4838_v16 = vadd.f32 1.0, %v6622_v32  ;;  %v6624_v5 = vpop.eup %6623 }
0x21cf   : > { %6625 = vrcp.f32 %v4838_v16 }
0x21dc   : > { %v6626_v63 = vpop.eup %6625 }
0x21dd   : > { %v4841_v1 = vsel %vm7024_vm5, %v6624_v5, %v6626_v63 }
0x21de   : > { %4848 = vrot.lane.b32.xlu1 %v4841_v1, %s9993_s30  ;;  %v4846_v9 = vmul.f32 %v9094_v52, %v4841_v1 }
0x2250   : > { %v4849_v55 = vpop.permute.xlu1 %4848 }
0x2251   : > { %v4851_v7 = vmul.f32 %v4849_v55, %v4841_v1  ;;  %v9189_v55 = vld [vmem:[%s9729_s1 + $0x88] sm:$0xff] }
0x2252   : > { %10179 = vst [vmem:[#allocation43_spill] sm:$0xff] %v9189_v55 }
0x2253   : > { %4853 = vrot.lane.b32.xlu1 %v4851_v7, %s10072_s20 }
0x22c5   : > { %v4854_v35 = vpop.permute.xlu1 %4853 }
0x22c6   : > { %v9097_v19 = vadd.f32 %v4854_v35, %v4846_v9 }
0x22c8   : > { %6627 = vtanh.f32 %v9097_v19 }
0x22d5   : > { %v6628_v25 = vpop.eup %6627 }
0x22d6   : > { %4859 = vrot.lane.b32.xlu0 %v6628_v25, %s9993_s30  ;;  %v9221_v25 = vld [vmem:[%s9729_s1 + $0x98] sm:$0xff] }
0x22d7   : > { %10183 = vst [vmem:[#allocation48_spill] sm:$0xff] %v9221_v25 }
0x2348   : > { %v4860_v6 = vpop.permute.xlu0 %4859 }
0x2349   : > { %v9132_v14 = vmul.f32 %v4860_v6, %v4841_v1  ;;  %v9184_v1 = vld [vmem:[%s9729_s1 + $0x18] sm:$0xff] }
0x234a   : > { %10178 = vst [vmem:[#allocation44_spill] sm:$0xff] %v9184_v1 }
0x234b   : > { %10172 = vst [vmem:[#allocation40_spill] sm:$0xff] %v9132_v14  ;;  %4868 = vrot.lane.b32.xlu1 %v9132_v14, %s10072_s20  ;;  %v9381_v14 = vld [vmem:[%s9729_s1 + $0xe8] sm:$0xff] }
0x234c   : > { %10203 = vst [vmem:[#allocation35_spill] sm:$0xff] %v9381_v14 }
0x23bd   : > { %v4869_v40 = vpop.permute.xlu1 %4868 }
0x23be   : > { %6458 = vmatmul.mubr.msk.f32.vlgmr.msra.gmra.mxu1 %vm559_vm1, %v4869_v40  ;;  %6469 = vmatmul.mubr.msk.f32.vlgmr.msra.gmra.mxu0 %vm559_vm1, %v4869_v40 }
0x23bf   : > { %6479 = vmatprep.mubr.msk.f32.mxu1 %vm6791_vm2, %v9963_v18  ;;  %vm10207_vm2 = vcmask 261312  }
0x23c0   : > { %vm10208_vm5 = vmmov %vm10207_vm2 }
0x247e   : > { %v4938_v17 = vpop.f32.mrf.mxu1  ;;  %v9140_v62 = vpop.f32.mrf.mxu0 }
0x247f   : > { %10173 = vst [vmem:[#allocation39_spill] sm:$0xff] %v9140_v62  ;;  %v4981_v58 = vrot.slane %v4938_v17, %v10174_v26 }
0x2480   : > { %v6459_v45 = vpop.f32.mrf.mxu1  ;;  %v6470_v12 = vpop.f32.mrf.mxu0 }
0x2481   : > { %v4982_v54 = vcombine.high %v4981_v58, %v4981_v58  ;;  %v4989_v2 = vrot.slane %v4981_v58, %v10174_v26  ;;  %v9232_v58 = vld [vmem:[%s9729_s1 + $0x30] sm:$0xff]  ;;  %v9237_v45 = vld [vmem:[%s9729_s1 + $0xa0] sm:$0xff] }
0x2482   : > { %10184 = vst [vmem:[#allocation49_spill] sm:$0xff] %v9232_v58  ;;  %10185 = vst [vmem:[#allocation50_spill] sm:$0xff] %v9237_v45 }
0x2483   : > { %v4996_v44 = vrot.slane %v4982_v54, %v10174_v26  ;;  %v9156_v29 = vrot.slane %v4989_v2, %v7149_v33 }
0x2485   : > { %v9169_v37 = vrot.slane %v4996_v44, %v7149_v33  ;;  %v5008_v59 = vmul.f32 %v9156_v29, %v9147_v60  ;;  %v5007_v61 = vmul.f32 %v9156_v29, %v9152_v11  ;;  %v5009_v5 = vmul.f32 %v9156_v29, %v9161_v53 }
0x2486   : > { %v5010_v35 = vmul.f32 %v9156_v29, %v9184_v1  ;;  %v5011_v4 = vmul.f32 %v9156_v29, %v9200_v15  ;;  %v5012_v17 = vmul.f32 %v9156_v29, %v9216_v13  ;;  %v5013_v2 = vmul.f32 %v9156_v29, %v9232_v58  ;;  %v10206_v15 = vld [vmem:[#allocation53_spill] sm:$0xff] }
0x2487   : > { %v5042_v32 = vsel %vm559_vm1, %v5008_v59, 0.0  ;;  %v5039_v16 = vsel %vm559_vm1, %v5007_v61, 0.0  ;;  %v5023_v63 = vmul.f32 %v9169_v37, %v9166_v46  ;;  %v5045_v7 = vsel %vm559_vm1, %v5009_v5, 0.0  ;;  %v9248_v59 = vld [vmem:[%s9729_s1 + $0x38] sm:$0xff]  ;;  %v9253_v61 = vld [vmem:[%s9729_s1 + $0xa8] sm:$0xff] }
0x2488   : > { %5043 = vadd.xlane.f32.xlu1 %v5042_v32  ;;  %5040 = vadd.xlane.f32.xlu0 %v5039_v16  ;;  %v5024_v21 = vmul.f32 %v9169_v37, %v9189_v55  ;;  %v5048_v0 = vsel %vm559_vm1, %v5010_v35, 0.0  ;;  %v5025_v48 = vmul.f32 %v9169_v37, %v9205_v39  ;;  %v5051_v6 = vsel %vm559_vm1, %v5011_v4, 0.0  ;;  %10186 = vst [vmem:[#allocation23_spill] sm:$0xff] %v9248_v59  ;;  %v9280_v4 = vld [vmem:[%s9729_s1 + $0x48] sm:$0xff] }
0x2489   : > { %v5087_v9 = vsel %vm559_vm1, %v5023_v63, 0.0  ;;  %v5026_v26 = vmul.f32 %v9169_v37, %v9221_v25  ;;  %v5054_v12 = vsel %vm559_vm1, %v5012_v17, 0.0  ;;  %v5027_v44 = vmul.f32 %v9169_v37, %v9237_v45  ;;  %10187 = vst [vmem:[#allocation51_spill] sm:$0xff] %v9253_v61  ;;  %10190 = vst [vmem:[#allocation28_spill] sm:$0xff] %v9280_v4 }
0x248a   : > { %v5090_v8 = vsel %vm559_vm1, %v5024_v21, 0.0  ;;  %v5093_v40 = vsel %vm559_vm1, %v5025_v48, 0.0  ;;  %v5057_v32 = vsel %vm559_vm1, %v5013_v2, 0.0  ;;  %v5014_v5 = vmul.f32 %v9156_v29, %v9248_v59  ;;  %v9285_v48 = vld [vmem:[%s9729_s1 + $0xb8] sm:$0xff] }
0x248b   : > { %v5096_v54 = vsel %vm559_vm1, %v5026_v26, 0.0  ;;  %v5099_v16 = vsel %vm559_vm1, %v5027_v44, 0.0  ;;  %v5028_v63 = vmul.f32 %v9169_v37, %v9253_v61  ;;  %10191 = vst [vmem:[#allocation25_spill] sm:$0xff] %v9285_v48  ;;  %v5016_v17 = vmul.f32 %v9156_v29, %v9280_v4 }
0x248c   : > { %5046 = vadd.xlane.f32.xlu1 %v5045_v7  ;;  %5088 = vadd.xlane.f32.xlu0 %v5087_v9  ;;  %v9264_v7 = vld [vmem:[%s9729_s1 + $0x40] sm:$0xff]  ;;  %v9269_v9 = vld [vmem:[%s9729_s1 + $0xb0] sm:$0xff]  ;;  %v5060_v35 = vsel %vm559_vm1, %v5014_v5, 0.0  ;;  %v5030_v26 = vmul.f32 %v9169_v37, %v9285_v48  ;;  %v9312_v5 = vld [vmem:[%s9729_s1 + $0x58] sm:$0xff] }
0x248d   : > { %10188 = vst [vmem:[#allocation26_spill] sm:$0xff] %v9264_v7  ;;  %10189 = vst [vmem:[#allocation24_spill] sm:$0xff] %v9269_v9  ;;  %v5102_v21 = vsel %vm559_vm1, %v5028_v63, 0.0  ;;  %v5066_v2 = vsel %vm559_vm1, %v5016_v17, 0.0  ;;  %v9317_v63 = vld [vmem:[%s9729_s1 + $0xc8] sm:$0xff] }
0x248e   : > { %v5108_v44 = vsel %vm559_vm1, %v5030_v26, 0.0  ;;  %10194 = vst [vmem:[#allocation56_spill] sm:$0xff] %v9312_v5  ;;  %10195 = vst [vmem:[#allocation30_spill] sm:$0xff] %v9317_v63 }
0x2490   : > { %5049 = vadd.xlane.f32.xlu1 %v5048_v0  ;;  %5091 = vadd.xlane.f32.xlu0 %v5090_v8  ;;  %v5015_v0 = vmul.f32 %v9156_v29, %v9264_v7  ;;  %v5029_v8 = vmul.f32 %v9169_v37, %v9269_v9 }
0x2494   : > { %5052 = vadd.xlane.f32.xlu1 %v5051_v6  ;;  %5094 = vadd.xlane.f32.xlu0 %v5093_v40  ;;  %v5063_v6 = vsel %vm559_vm1, %v5015_v0, 0.0  ;;  %v5105_v40 = vsel %vm559_vm1, %v5029_v8, 0.0  ;;  %v5018_v0 = vmul.f32 %v9156_v29, %v9312_v5  ;;  %v5032_v8 = vmul.f32 %v9169_v37, %v9317_v63 }
0x2496   : > { %v5072_v17 = vsel %vm559_vm1, %v5018_v0, 0.0  ;;  %v5114_v26 = vsel %vm559_vm1, %v5032_v8, 0.0 }
0x2498   : > { %5055 = vadd.xlane.f32.xlu1 %v5054_v12  ;;  %5097 = vadd.xlane.f32.xlu0 %v5096_v54  ;;  %v9296_v12 = vld [vmem:[%s9729_s1 + $0x50] sm:$0xff]  ;;  %v9301_v54 = vld [vmem:[%s9729_s1 + $0xc0] sm:$0xff] }
0x2499   : > { %10192 = vst [vmem:[#allocation55_spill] sm:$0xff] %v9296_v12  ;;  %10193 = vst [vmem:[#allocation54_spill] sm:$0xff] %v9301_v54 }
0x249c   : > { %5058 = vadd.xlane.f32.xlu1 %v5057_v32  ;;  %5100 = vadd.xlane.f32.xlu0 %v5099_v16  ;;  %v5017_v32 = vmul.f32 %v9156_v29, %v9296_v12  ;;  %v5031_v16 = vmul.f32 %v9169_v37, %v9301_v54 }
0x24a0   : > { %5061 = vadd.xlane.f32.xlu1 %v5060_v35  ;;  %5103 = vadd.xlane.f32.xlu0 %v5102_v21  ;;  %v5069_v35 = vsel %vm559_vm1, %v5017_v32, 0.0  ;;  %v5111_v21 = vsel %vm559_vm1, %v5031_v16, 0.0  ;;  %v9344_v32 = vld [vmem:[%s9729_s1 + $0x68] sm:$0xff]  ;;  %v9349_v16 = vld [vmem:[%s9729_s1 + $0xd8] sm:$0xff] }
0x24a1   : > { %10198 = vst [vmem:[#allocation31_spill] sm:$0xff] %v9344_v32  ;;  %10199 = vst [vmem:[#allocation52_spill] sm:$0xff] %v9349_v16  ;;  %v5020_v0 = vmul.f32 %v9156_v29, %v9344_v32  ;;  %v5034_v8 = vmul.f32 %v9169_v37, %v9349_v16 }
0x24a4   : > { %5064 = vadd.xlane.f32.xlu1 %v5063_v6  ;;  %5106 = vadd.xlane.f32.xlu0 %v5105_v40  ;;  %v9328_v6 = vld [vmem:[%s9729_s1 + $0x60] sm:$0xff]  ;;  %v9333_v40 = vld [vmem:[%s9729_s1 + $0xd0] sm:$0xff] }
0x24a5   : > { %10196 = vst [vmem:[#allocation57_spill] sm:$0xff] %v9328_v6  ;;  %10197 = vst [vmem:[#allocation58_spill] sm:$0xff] %v9333_v40 }
0x24a8   : > { %5067 = vadd.xlane.f32.xlu1 %v5066_v2  ;;  %5109 = vadd.xlane.f32.xlu0 %v5108_v44  ;;  %v5019_v2 = vmul.f32 %v9156_v29, %v9328_v6  ;;  %v5033_v44 = vmul.f32 %v9169_v37, %v9333_v40 }
0x24ac   : > { %5070 = vadd.xlane.f32.xlu1 %v5069_v35  ;;  %5112 = vadd.xlane.f32.xlu0 %v5111_v21  ;;  %v5075_v35 = vsel %vm559_vm1, %v5019_v2, 0.0  ;;  %v5117_v21 = vsel %vm559_vm1, %v5033_v44, 0.0  ;;  %v5078_v2 = vsel %vm559_vm1, %v5020_v0, 0.0  ;;  %v5120_v44 = vsel %vm559_vm1, %v5034_v8, 0.0 }
0x24b0   : > { %5073 = vadd.xlane.f32.xlu1 %v5072_v17  ;;  %5115 = vadd.xlane.f32.xlu0 %v5114_v26  ;;  %v9360_v17 = vld [vmem:[%s9729_s1 + $0x70] sm:$0xff]  ;;  %v9365_v26 = vld [vmem:[%s9729_s1 + $0xe0] sm:$0xff] }
0x24b1   : > { %10200 = vst [vmem:[#allocation29_spill] sm:$0xff] %v9360_v17  ;;  %10201 = vst [vmem:[#allocation32_spill] sm:$0xff] %v9365_v26  ;;  %v5021_v62 = vmul.f32 %v9156_v29, %v9360_v17 }
0x24b3   : > { %v5081_v0 = vsel %vm559_vm1, %v5021_v62, 0.0 }
0x24b4   : > { %5076 = vadd.xlane.f32.xlu1 %v5075_v35  ;;  %5118 = vadd.xlane.f32.xlu0 %v5117_v21  ;;  %v5035_v35 = vmul.f32 %v9169_v37, %v9365_v26  ;;  %v9376_v21 = vld [vmem:[%s9729_s1 + $0x78] sm:$0xff] }
0x24b5   : > { %10202 = vst [vmem:[#allocation37_spill] sm:$0xff] %v9376_v21  ;;  %v5022_v41 = vmul.f32 %v9156_v29, %v9376_v21  ;;  %v9401_v29 = vld [vmem:[%s9729_s1 + $0xf8] sm:$0xff] }
0x24b6   : > { %v5123_v8 = vsel %vm559_vm1, %v5035_v35, 0.0  ;;  %10205 = vst [vmem:[#allocation33_spill] sm:$0xff] %v9401_v29 }
0x24b7   : > { %v5084_v26 = vsel %vm559_vm1, %v5022_v41, 0.0 }
0x24b8   : > { %5079 = vadd.xlane.f32.xlu1 %v5078_v2  ;;  %5121 = vadd.xlane.f32.xlu0 %v5120_v44  ;;  %v5036_v2 = vmul.f32 %v9169_v37, %v9381_v14  ;;  %v9392_v44 = vld [vmem:[%s9729_s1 + $0xf0] sm:$0xff] }
0x24b9   : > { %10204 = vst [vmem:[#allocation36_spill] sm:$0xff] %v9392_v44  ;;  %v5037_v62 = vmul.f32 %v9169_v37, %v9392_v44 }
0x24ba   : > { %v5126_v17 = vsel %vm559_vm1, %v5036_v2, 0.0 }
0x24bb   : > { %v5129_v35 = vsel %vm559_vm1, %v5037_v62, 0.0 }
0x24bc   : > { %5082 = vadd.xlane.f32.xlu1 %v5081_v0  ;;  %5124 = vadd.xlane.f32.xlu0 %v5123_v8  ;;  %v5038_v0 = vmul.f32 %v9169_v37, %v9401_v29 }
0x24be   : > { %v5132_v41 = vsel %vm559_vm1, %v5038_v0, 0.0 }
0x24c0   : > { %5085 = vadd.xlane.f32.xlu1 %v5084_v26  ;;  %5127 = vadd.xlane.f32.xlu0 %v5126_v17 }
0x24c4   : > { %5130 = vadd.xlane.f32.xlu0 %v5129_v35 }
0x24c8   : > { %5133 = vadd.xlane.f32.xlu0 %v5132_v41 }
0x2511   : > { %v5044_v8 = vpop.xlane.xlu1 %5043  ;;  %v5041_v2 = vpop.xlane.xlu0 %5040 }
0x2512   : > { %v5174_v45 = vrot.slane %v5044_v8, %v7464_v50  ;;  %v5170_v59 = vrot.slane %v5041_v2, %v7468_v3 }
0x2514   : > { %v5175_v8 = vsel %vm1254_vm6, %v5174_v45, %v5170_v59 }
0x2515   : > { %v5047_v14 = vpop.xlane.xlu1 %5046  ;;  %v5089_v44 = vpop.xlane.xlu0 %5088 }
0x2516   : > { %v5179_v58 = vrot.slane %v5047_v14, %v7474_v36  ;;  %v5249_v46 = vrot.slane %v5089_v44, %v7468_v3 }
0x2519   : > { %v5050_v26 = vpop.xlane.xlu1 %5049  ;;  %v5092_v17 = vpop.xlane.xlu0 %5091 }
0x251a   : > { %v5253_v25 = vrot.slane %v5092_v17, %v7464_v50  ;;  %v5184_v13 = vrot.slane %v5050_v26, %v10028_v24 }
0x251c   : > { %v5254_v2 = vsel %vm1254_vm6, %v5253_v25, %v5249_v46  ;;  %vm10209_vm6 = vcmask 326912  }
0x251d   : > { %v5053_v21 = vpop.xlane.xlu1 %5052  ;;  %v5095_v16 = vpop.xlane.xlu0 %5094  ;;  %vm10210_vm9 = vmmov %vm10209_vm6 }
0x251e   : > { %v5258_v39 = vrot.slane %v5095_v16, %v7474_v36  ;;  %v5189_v1 = vrot.slane %v5053_v21, %v10206_v15  ;;  %v5180_v36 = vsel %vm1261_vm7, %v5179_v58, %v5175_v8 }
0x2520   : > { %v5259_v3 = vsel %vm1261_vm7, %v5258_v39, %v5254_v2  ;;  %vm10211_vm7 = vcmask 392512  }
0x2521   : > { %v5056_v40 = vpop.xlane.xlu1 %5055  ;;  %v5098_v32 = vpop.xlane.xlu0 %5097  ;;  %vm10212_vm11 = vmmov %vm10211_vm7 }
0x2522   : > { %v5263_v55 = vrot.slane %v5098_v32, %v10028_v24  ;;  %v5194_v50 = vrot.slane %v5056_v40, %v7490_v31 }
0x2525   : > { %v5059_v63 = vpop.xlane.xlu1 %5058  ;;  %v5101_v6 = vpop.xlane.xlu0 %5100 }
0x2526   : > { %v5268_v53 = vrot.slane %v5101_v6, %v10206_v15  ;;  %v5199_v16 = vrot.slane %v5059_v63, %v7495_v51  ;;  %v5185_v15 = vsel %vm10207_vm2, %v5184_v13, %v5180_v36  ;;  %v5264_v6 = vsel %vm10208_vm5, %v5263_v55, %v5259_v3 }
0x2527   : > { %v5190_v25 = vsel %vm10209_vm6, %v5189_v1, %v5185_v15  ;;  %vm10217_vm2 = vcmask 589312   ;;  %vm10219_vm6 = vcmask 654912  }
0x2528   : > { %vm10218_vm5 = vmmov %vm10217_vm2 }
0x2529   : > { %v5062_v62 = vpop.xlane.xlu1 %5061  ;;  %v5104_v54 = vpop.xlane.xlu0 %5103 }
0x252a   : > { %v5273_v14 = vrot.slane %v5104_v54, %v7490_v31  ;;  %v5204_v45 = vrot.slane %v5062_v62, %v7498_v20  ;;  %v5269_v31 = vsel %vm10210_vm9, %v5268_v53, %v5264_v6  ;;  %vm10220_vm9 = vmmov %vm10219_vm6 }
0x252c   : > { %v5274_v54 = vsel %vm10212_vm11, %v5273_v14, %v5269_v31 }
0x252d   : > { %v5065_v5 = vpop.xlane.xlu1 %5064  ;;  %v5107_v37 = vpop.xlane.xlu0 %5106 }
0x252e   : > { %v5278_v24 = vrot.slane %v5107_v37, %v7495_v51  ;;  %v5209_v58 = vrot.slane %v5065_v5, %v7502_v30  ;;  %v5195_v51 = vsel %vm10211_vm7, %v5194_v50, %v5190_v25  ;;  %vm10221_vm7 = vcmask 720512  }
0x252f   : > { %v5200_v63 = vsel %vm10213_vm8, %v5199_v16, %v5195_v51  ;;  %vm10222_vm11 = vmmov %vm10221_vm7  ;;  %vm10223_vm8 = vcmask 786112  }
0x2530   : > { %v5205_v5 = vsel %vm10215_vm3, %v5204_v45, %v5200_v63  ;;  %vm10225_vm3 = vcmask 851712  }
0x2531   : > { %v5068_v35 = vpop.xlane.xlu1 %5067  ;;  %v5110_v29 = vpop.xlane.xlu0 %5109  ;;  %v5210_v44 = vsel %vm10217_vm2, %v5209_v58, %v5205_v5  ;;  %vm10227_vm2 = vcmp.lt.s32.totalorder %v7020_v27, 8 }
0x2532   : > { %v5283_v46 = vrot.slane %v5110_v29, %v7498_v20  ;;  %v5214_v13 = vrot.slane %v5068_v35, %v7505_v56  ;;  %v5279_v20 = vsel %vm10214_vm12, %v5278_v24, %v5274_v54  ;;  %vm10224_vm12 = vmmov %vm10223_vm8 }
0x2535   : > { %v5071_v0 = vpop.xlane.xlu1 %5070  ;;  %v5113_v41 = vpop.xlane.xlu0 %5112 }
0x2536   : > { %v5288_v39 = vrot.slane %v5113_v41, %v7502_v30  ;;  %v5219_v1 = vrot.slane %v5071_v0, %v7520_v28  ;;  %v5284_v30 = vsel %vm10216_vm10, %v5283_v46, %v5279_v20  ;;  %vm10226_vm10 = vmmov %vm10225_vm3 }
0x2539   : > { %v9407_v48 = vpop.xlane.xlu1 %5073  ;;  %v5116_v12 = vpop.xlane.xlu0 %5115 }
0x253a   : > { %v5293_v55 = vrot.slane %v5116_v12, %v7505_v56  ;;  %v5224_v40 = vrot.slane %v9407_v48, %v7527_v10  ;;  %v5289_v56 = vsel %vm10218_vm5, %v5288_v39, %v5284_v30  ;;  %vm10228_vm5 = vcmask 1041408   ;;  %v5581_v39 = vld [vmem:[%s9739_s11 + $0x10] sm:$0xff] }
0x253c   : > { %v5294_v17 = vsel %vm10220_vm9, %v5293_v55, %v5289_v56  ;;  %v10230_v56 = vld [vmem:[#allocation42_spill] sm:$0xff] }
0x253d   : > { %v9409_v9 = vpop.xlane.xlu1 %5076  ;;  %v5119_v4 = vpop.xlane.xlu0 %5118 }
0x253e   : > { %v5298_v53 = vrot.slane %v5119_v4, %v7520_v28  ;;  %v5229_v12 = vrot.slane %v9409_v9, %v7530_v23  ;;  %v5215_v4 = vsel %vm10219_vm6, %v5214_v13, %v5210_v44 }
0x2540   : > { %v5299_v62 = vsel %vm10222_vm11, %v5298_v53, %v5294_v17  ;;  %v10232_v17 = vld [vmem:[#allocation44_spill] sm:$0xff] }
0x2541   : > { %v9411_v61 = vpop.xlane.xlu1 %5079  ;;  %v5122_v7 = vpop.xlane.xlu0 %5121 }
0x2542   : > { %v5303_v21 = vrot.slane %v5122_v7, %v7527_v10  ;;  %v5234_v48 = vrot.slane %v9411_v61, %v7539_v34  ;;  %v5220_v7 = vsel %vm10221_vm7, %v5219_v1, %v5215_v4 }
0x2545   : > { %v5125_v11 = vpop.xlane.xlu0 %5124  ;;  %v5083_v32 = vpop.xlane.xlu1 %5082 }
0x2546   : > { %v5308_v29 = vrot.slane %v5125_v11, %v7530_v23  ;;  %v5239_v37 = vrot.slane %v5083_v32, %v7546_v57  ;;  %v5225_v23 = vsel %vm10223_vm8, %v5224_v40, %v5220_v7  ;;  %v5304_v11 = vsel %vm10224_vm12, %v5303_v21, %v5299_v62  ;;  %v10233_v7 = vld [vmem:[#allocation45_spill] sm:$0xff] }
0x2547   : > { %v5230_v0 = vsel %vm10225_vm3, %v5229_v12, %v5225_v23 }
0x2548   : > { %v5309_v61 = vsel %vm10226_vm10, %v5308_v29, %v5304_v11  ;;  %v10234_v11 = vld [vmem:[#allocation43_spill] sm:$0xff] }
0x2549   : > { %v5128_v59 = vpop.xlane.xlu0 %5127  ;;  %v5086_v26 = vpop.xlane.xlu1 %5085 }
0x254a   : > { %v5313_v10 = vrot.slane %v5128_v59, %v7539_v34  ;;  %v5244_v35 = vrot.slane %v5086_v26, %v7549_v47  ;;  %v5235_v34 = vsel %vm1338_vm4, %v5234_v48, %v5230_v0  ;;  %v5579_v59 = vld [vmem:[%s9739_s11] sm:$0xff] }
0x254b   : > { %v5240_v50 = vsel %vm1345_vm13, %v5239_v37, %v5235_v34  ;;  %v10235_v0 = vld [vmem:[#allocation47_spill] sm:$0xff]  ;;  %v10236_v34 = vld [vmem:[#allocation41_spill] sm:$0xff] }
0x254c   : > { %v5314_v8 = vsel %vm1338_vm4, %v5313_v10, %v5309_v61  ;;  %v5245_v14 = vsel %vm1352_vm14, %v5244_v35, %v5240_v50  ;;  %vm10229_vm4 = vmmov %vm10228_vm5  ;;  %v10237_v50 = vld [vmem:[#allocation46_spill] sm:$0xff] }
0x254d   : > { %v5131_v28 = vpop.xlane.xlu0 %5130 }
0x254e   : > { %v5318_v9 = vrot.slane %v5131_v28, %v7546_v57 }
0x2550   : > { %v5319_v57 = vsel %vm1345_vm13, %v5318_v9, %v5314_v8 }
0x2551   : > { %v5134_v41 = vpop.xlane.xlu0 %5133 }
0x2552   : > { %v5323_v2 = vrot.slane %v5134_v41, %v7549_v47 }
0x2554   : > { %v5324_v36 = vsel %vm1352_vm14, %v5323_v2, %v5319_v57 }
0x2555   : > { %v5325_v3 = vsel %vm1433_vm15, %v5324_v36, %v5245_v14  ;;  %v10238_v14 = vld [vmem:[#allocation49_spill] sm:$0xff] }
0x2556   : > { %v5327_v16 = vsel %vm10227_vm2, %v5325_v3, -1e+30 }
0x2557   : > { %v5328_v24 = vsel %vm10228_vm5, %v5327_v16, -inf }
0x2558   : > { %5329 = vmax.xlane.f32.xlu1 %v5328_v24 }
0x25e1   : > { %v5330_v32 = vpop.xlane.xlu1 %5329 }
0x25e2   : > { %v5331_v15 = vsub.f32 %v5327_v16, %v5330_v32 }
0x25e4   : > { %v5332_v47 = vmul.f32 1.442695, %v5331_v15 }
0x25e6   : > { %6629 = vpow2.f32 %v5332_v47  ;;  %v10239_v47 = vld [vmem:[#allocation48_spill] sm:$0xff] }
0x25f3   : > { %v6630_v6 = vpop.eup %6629 }
0x25f4   : > { %v5334_v45 = vsel %vm10229_vm4, %v6630_v6, 0.0 }
0x25f5   : > { %5335 = vadd.xlane.f32.xlu0 %v5334_v45  ;;  %v10240_v45 = vld [vmem:[#allocation23_spill] sm:$0xff] }
0x267e   : > { %v5336_v46 = vpop.xlane.xlu0 %5335 }
0x267f   : > { %6631 = vrcp.f32 %v5336_v46 }
0x268c   : > { %v6632_v25 = vpop.eup %6631 }
0x268d   : > { %v5338_v31 = vmul.f32 %v6632_v25, %v6630_v6 }
0x268f   : > { %v5342_v58 = vrot.slane %v5338_v31, %v7149_v33  ;;  %6018 = vst [vmem:[%s6953_s21 + $0x6] sm:$0x3] %v5338_v31  ;;  %v5409_v27 = vrot.slane %v5338_v31, %v7626_v49  ;;  %v9489_v33 = vstv %s5737_s23  ;;  %v5582_v49 = vld [vmem:[%s9739_s11 + $0x18] sm:$0xff] }
0x2690   : > { %6472 = vmatpush3.msra.mxu1 %v5582_v49  ;;  %vm5739_vm13 = vcmp.eq.s32.totalorder %v9489_v33, 1  ;;  %v10241_v49 = vld [vmem:[#allocation50_spill] sm:$0xff] }
0x2691   : > { %5348 = vbcast.lane.b32.xlu0 %v5342_v58, 264  ;;  %5344 = vbcast.lane.b32.xlu1 %v5342_v58, 256  ;;  %v5764_v51 = vsel %vm5739_vm13, %v9097_v19, %v9094_v52  ;;  %v10231_v19 = vld [vmem:[#allocation38_spill] sm:$0xff] }
0x2692   : > { %6473 = vmatprep.subr.mxu1 %v9963_v18 }
0x2693   : > { %6474 = vmatpush3.msra.mxu1 %v5581_v39 }
0x2694   : > { %6475 = vmatprep.subr.mxu1 %v9963_v18 }
0x2695   : > { %5352 = vbcast.lane.b32.xlu0 %v5342_v58, 272  ;;  %5411 = vbcast.lane.b32.xlu1 %v5409_v27, 256 }
0x2699   : > { %5356 = vbcast.lane.b32.xlu0 %v5342_v58, 280  ;;  %5415 = vbcast.lane.b32.xlu1 %v5409_v27, 264 }
0x269d   : > { %5360 = vbcast.lane.b32.xlu0 %v5342_v58, 288  ;;  %5419 = vbcast.lane.b32.xlu1 %v5409_v27, 272 }
0x26a1   : > { %5364 = vbcast.lane.b32.xlu0 %v5342_v58, 296  ;;  %5423 = vbcast.lane.b32.xlu1 %v5409_v27, 280 }
0x26a5   : > { %5368 = vbcast.lane.b32.xlu0 %v5342_v58, 304  ;;  %5427 = vbcast.lane.b32.xlu1 %v5409_v27, 288 }
0x26a9   : > { %5372 = vbcast.lane.b32.xlu0 %v5342_v58, 312  ;;  %5431 = vbcast.lane.b32.xlu1 %v5409_v27, 296 }
0x26ad   : > { %5376 = vbcast.lane.b32.xlu0 %v5342_v58, 320  ;;  %5435 = vbcast.lane.b32.xlu1 %v5409_v27, 304 }
0x26b1   : > { %5380 = vbcast.lane.b32.xlu0 %v5342_v58, 328  ;;  %5439 = vbcast.lane.b32.xlu1 %v5409_v27, 312 }
0x26b5   : > { %5384 = vbcast.lane.b32.xlu0 %v5342_v58, 336  ;;  %5443 = vbcast.lane.b32.xlu1 %v5409_v27, 320 }
0x26b9   : > { %5388 = vbcast.lane.b32.xlu0 %v5342_v58, 344  ;;  %5447 = vbcast.lane.b32.xlu1 %v5409_v27, 328 }
0x26bd   : > { %5392 = vbcast.lane.b32.xlu0 %v5342_v58, 352  ;;  %5451 = vbcast.lane.b32.xlu1 %v5409_v27, 336 }
0x26c1   : > { %5396 = vbcast.lane.b32.xlu0 %v5342_v58, 360  ;;  %5455 = vbcast.lane.b32.xlu1 %v5409_v27, 344 }
0x26c5   : > { %5400 = vbcast.lane.b32.xlu0 %v5342_v58, 368  ;;  %5459 = vbcast.lane.b32.xlu1 %v5409_v27, 352 }
0x26c9   : > { %5404 = vbcast.lane.b32.xlu0 %v5342_v58, 376  ;;  %5463 = vbcast.lane.b32.xlu1 %v5409_v27, 360 }
0x26cd   : > { %5740 = vrot.lane.b32.xlu0 %v9006_v43, %s10043_s26  ;;  %5467 = vbcast.lane.b32.xlu1 %v5409_v27, 368  ;;  %v5580_v43 = vld [vmem:[%s9739_s11 + $0x8] sm:$0xff] }
0x26ce   : > { %6476 = vmatpush3.msra.mxu1 %v5580_v43  ;;  %v10242_v43 = vld [vmem:[#allocation26_spill] sm:$0xff] }
0x26cf   : > { %6477 = vmatprep.subr.mxu1 %v9963_v18 }
0x26d0   : > { %6478 = vmatpush3.msra.mxu1 %v5579_v59 }
0x26d1   : > { %5471 = vbcast.lane.b32.xlu1 %v5409_v27, 376 }
0x26d5   : > { %5755 = vrot.lane.b32.xlu1 %v9047_v22, %s10043_s26  ;;  %v5749_v22 = vsel %vm5739_vm13, %v9060_v42, %v9015_v38 }
0x26d9   : > { %5751 = vrot.lane.b32.xlu1 %v5749_v22, %s10043_s26 }
0x26dd   : > { %5766 = vrot.lane.b32.xlu1 %v5764_v51, %s10043_s26 }
0x2703   : > { %v5349_v54 = vpop.permute.xlu0 %5348  ;;  %v5345_v13 = vpop.permute.xlu1 %5344 }
0x2704   : > { %v5474_v44 = vmul.f32 %v5349_v54, %v9147_v60  ;;  %v5473_v52 = vmul.f32 %v5345_v13, %v10230_v56  ;;  %v10246_v56 = vld [vmem:[#allocation55_spill] sm:$0xff] }
0x2706   : > { %v5506_v28 = vsel %vm559_vm1, %v5474_v44, 0.0  ;;  %v5505_v4 = vsel %vm559_vm1, %v5473_v52, 0.0 }
0x2707   : > { %v5353_v55 = vpop.permute.xlu0 %5352  ;;  %v5412_v63 = vpop.permute.xlu1 %5411  ;;  %v5507_v37 = vadd.f32 %v5506_v28, %v5505_v4 }
0x2708   : > { %v5475_v12 = vmul.f32 %v5353_v55, %v10231_v19  ;;  %v5489_v8 = vmul.f32 %v5412_v63, %v10236_v34 }
0x270a   : > { %v5508_v10 = vsel %vm559_vm1, %v5475_v12, 0.0  ;;  %v5542_v25 = vsel %vm559_vm1, %v5489_v8, 0.0 }
0x270b   : > { %v5357_v20 = vpop.permute.xlu0 %5356  ;;  %v5416_v1 = vpop.permute.xlu1 %5415  ;;  %v5509_v41 = vadd.f32 %v5508_v10, %v5507_v37  ;;  %v10248_v10 = vld [vmem:[#allocation56_spill] sm:$0xff] }
0x270c   : > { %v5476_v48 = vmul.f32 %v5357_v20, %v10232_v17  ;;  %v5490_v35 = vmul.f32 %v5416_v1, %v10234_v11  ;;  %v10243_v20 = vld [vmem:[#allocation51_spill] sm:$0xff]  ;;  %v10247_v17 = vld [vmem:[#allocation25_spill] sm:$0xff] }
0x270e   : > { %v5510_v60 = vsel %vm559_vm1, %v5476_v48, 0.0  ;;  %v5543_v32 = vsel %vm559_vm1, %v5490_v35, 0.0  ;;  %v10250_v35 = vld [vmem:[#allocation57_spill] sm:$0xff] }
0x270f   : > { %v5361_v38 = vpop.permute.xlu0 %5360  ;;  %v5420_v42 = vpop.permute.xlu1 %5419  ;;  %v5511_v3 = vadd.f32 %v5510_v60, %v5509_v41  ;;  %v5544_v22 = vadd.f32 %v5543_v32, %v5542_v25  ;;  %v10249_v60 = vld [vmem:[#allocation54_spill] sm:$0xff] }
0x2710   : > { %v5477_v62 = vmul.f32 %v5361_v38, %v10233_v7  ;;  %v5491_v57 = vmul.f32 %v5420_v42, %v10237_v50  ;;  %v10244_v38 = vld [vmem:[#allocation28_spill] sm:$0xff]  ;;  %v10251_v50 = vld [vmem:[#allocation30_spill] sm:$0xff] }
0x2712   : > { %v5512_v2 = vsel %vm559_vm1, %v5477_v62, 0.0  ;;  %v5545_v58 = vsel %vm559_vm1, %v5491_v57, 0.0 }
0x2713   : > { %v5365_v53 = vpop.permute.xlu0 %5364  ;;  %v5424_v5 = vpop.permute.xlu1 %5423  ;;  %v5513_v31 = vadd.f32 %v5512_v2, %v5511_v3 }
0x2714   : > { %v5478_v61 = vmul.f32 %v5365_v53, %v10235_v0  ;;  %v5492_v6 = vmul.f32 %v5424_v5, %v10239_v47  ;;  %v5546_v53 = vadd.f32 %v5545_v58, %v5544_v22 }
0x2716   : > { %v5514_v15 = vsel %vm559_vm1, %v5478_v61, 0.0  ;;  %v5547_v55 = vsel %vm559_vm1, %v5492_v6, 0.0 }
0x2717   : > { %v5369_v30 = vpop.permute.xlu0 %5368  ;;  %v5428_v18 = vpop.permute.xlu1 %5427  ;;  %v5515_v51 = vadd.f32 %v5514_v15, %v5513_v31  ;;  %v5548_v19 = vadd.f32 %v5547_v55, %v5546_v53  ;;  %v10253_v15 = vld [vmem:[#allocation58_spill] sm:$0xff]  ;;  %v10257_v53 = vld [vmem:[#allocation37_spill] sm:$0xff] }
0x2718   : > { %v5479_v36 = vmul.f32 %v5369_v30, %v10238_v14  ;;  %v5493_v39 = vmul.f32 %v5428_v18, %v10241_v49  ;;  %v10252_v14 = vld [vmem:[#allocation31_spill] sm:$0xff] }
0x271a   : > { %v5516_v27 = vsel %vm559_vm1, %v5479_v36, 0.0  ;;  %v5549_v30 = vsel %vm559_vm1, %v5493_v39, 0.0  ;;  %v10255_v39 = vld [vmem:[#allocation29_spill] sm:$0xff] }
0x271b   : > { %v5373_v40 = vpop.permute.xlu0 %5372  ;;  %v5432_v21 = vpop.permute.xlu1 %5431  ;;  %v5517_v5 = vadd.f32 %v5516_v27, %v5515_v51  ;;  %v5550_v62 = vadd.f32 %v5549_v30, %v5548_v19  ;;  %v10254_v27 = vld [vmem:[#allocation52_spill] sm:$0xff]  ;;  %v10258_v30 = vld [vmem:[#allocation35_spill] sm:$0xff] }
0x271c   : > { %v5480_v46 = vmul.f32 %v5373_v40, %v10240_v45  ;;  %v5494_v1 = vmul.f32 %v5432_v21, %v10243_v20  ;;  %v10245_v40 = vld [vmem:[#allocation24_spill] sm:$0xff] }
0x271e   : > { %v5518_v63 = vsel %vm559_vm1, %v5480_v46, 0.0  ;;  %v5551_v4 = vsel %vm559_vm1, %v5494_v1, 0.0 }
0x271f   : > { %v5377_v29 = vpop.permute.xlu0 %5376  ;;  %v5436_v26 = vpop.permute.xlu1 %5435  ;;  %v5519_v12 = vadd.f32 %v5518_v63, %v5517_v5  ;;  %v5552_v61 = vadd.f32 %v5551_v4, %v5550_v62 }
0x2720   : > { %v5481_v59 = vmul.f32 %v5377_v29, %v10242_v43  ;;  %v5495_v44 = vmul.f32 %v5436_v26, %v10245_v40 }
0x2722   : > { %v5520_v18 = vsel %vm559_vm1, %v5481_v59, 0.0 }
0x2723   : > { %v5381_v9 = vpop.permute.xlu0 %5380  ;;  %v5440_v23 = vpop.permute.xlu1 %5439  ;;  %v5521_v37 = vadd.f32 %v5520_v18, %v5519_v12 }
0x2724   : > { %v5482_v42 = vmul.f32 %v5381_v9, %v10244_v38  ;;  %v5496_v48 = vmul.f32 %v5440_v23, %v10247_v17  ;;  %v5553_v9 = vsel %vm559_vm1, %v5495_v44, 0.0 }
0x2725   : > { %v5554_v3 = vadd.f32 %v5553_v9, %v5552_v61 }
0x2726   : > { %v5522_v21 = vsel %vm559_vm1, %v5482_v42, 0.0  ;;  %v5555_v2 = vsel %vm559_vm1, %v5496_v48, 0.0  ;;  %v10260_v48 = vld [vmem:[#allocation36_spill] sm:$0xff] }
0x2727   : > { %v5385_v16 = vpop.permute.xlu0 %5384  ;;  %v5444_v24 = vpop.permute.xlu1 %5443  ;;  %v5523_v41 = vadd.f32 %v5522_v21, %v5521_v37  ;;  %v5556_v6 = vadd.f32 %v5555_v2, %v5554_v3  ;;  %v10259_v21 = vld [vmem:[#allocation34_spill] sm:$0xff]  ;;  %v10262_v2 = vld [vmem:[#allocation40_spill] sm:$0xff] }
0x2728   : > { %v5483_v52 = vmul.f32 %v5385_v16, %v10246_v56  ;;  %v5497_v11 = vmul.f32 %v5444_v24, %v10249_v60 }
0x272a   : > { %v5524_v26 = vsel %vm559_vm1, %v5483_v52, 0.0  ;;  %v5557_v32 = vsel %vm559_vm1, %v5497_v11, 0.0  ;;  %v10261_v11 = vld [vmem:[#allocation33_spill] sm:$0xff] }
0x272b   : > { %v5389_v54 = vpop.permute.xlu0 %5388  ;;  %v5448_v13 = vpop.permute.xlu1 %5447  ;;  %v5525_v16 = vadd.f32 %v5524_v26, %v5523_v41  ;;  %v5558_v59 = vadd.f32 %v5557_v32, %v5556_v6 }
0x272c   : > { %v5484_v7 = vmul.f32 %v5389_v54, %v10248_v10  ;;  %v5498_v57 = vmul.f32 %v5448_v13, %v10251_v50  ;;  %v10256_v13 = vld [vmem:[#allocation32_spill] sm:$0xff] }
0x272e   : > { %v5526_v23 = vsel %vm559_vm1, %v5484_v7, 0.0  ;;  %v5559_v31 = vsel %vm559_vm1, %v5498_v57, 0.0 }
0x272f   : > { %v5393_v29 = vpop.permute.xlu0 %5392  ;;  %v5452_v28 = vpop.permute.xlu1 %5451  ;;  %v5527_v45 = vadd.f32 %v5526_v23, %v5525_v16  ;;  %v5560_v63 = vadd.f32 %v5559_v31, %v5558_v59 }
0x2730   : > { %v5485_v0 = vmul.f32 %v5393_v29, %v10250_v35  ;;  %v5499_v47 = vmul.f32 %v5452_v28, %v10253_v15 }
0x2732   : > { %v5528_v24 = vsel %vm559_vm1, %v5485_v0, 0.0  ;;  %v5561_v51 = vsel %vm559_vm1, %v5499_v47, 0.0 }
0x2733   : > { %v5397_v34 = vpop.permute.xlu0 %5396  ;;  %v5456_v8 = vpop.permute.xlu1 %5455  ;;  %v5529_v22 = vadd.f32 %v5528_v24, %v5527_v45  ;;  %v5562_v40 = vadd.f32 %v5561_v51, %v5560_v63 }
0x2734   : > { %v5486_v36 = vmul.f32 %v5397_v34, %v10252_v14  ;;  %v5500_v49 = vmul.f32 %v5456_v8, %v10254_v27 }
0x2736   : > { %v5530_v58 = vsel %vm559_vm1, %v5486_v36, 0.0  ;;  %v5563_v42 = vsel %vm559_vm1, %v5500_v49, 0.0 }
0x2737   : > { %v5401_v46 = vpop.permute.xlu0 %5400  ;;  %v5460_v25 = vpop.permute.xlu1 %5459  ;;  %v5531_v20 = vadd.f32 %v5530_v58, %v5529_v22  ;;  %v5564_v19 = vadd.f32 %v5563_v42, %v5562_v40  ;;  %v10263_v58 = vld [vmem:[#allocation39_spill] sm:$0xff] }
0x2738   : > { %v5487_v43 = vmul.f32 %v5401_v46, %v10255_v39  ;;  %v5501_v55 = vmul.f32 %v5460_v25, %v10256_v13 }
0x273a   : > { %v5532_v54 = vsel %vm559_vm1, %v5487_v43, 0.0  ;;  %v5565_v56 = vsel %vm559_vm1, %v5501_v55, 0.0  ;;  %v6641_v43 = vld [vmem:[#allocation4] sm:$0x3] }
0x273b   : > { %v5405_v1 = vpop.permute.xlu0 %5404  ;;  %v5464_v38 = vpop.permute.xlu1 %5463  ;;  %v5533_v44 = vadd.f32 %v5532_v54, %v5531_v20  ;;  %v5566_v7 = vadd.f32 %v5565_v56, %v5564_v19 }
0x273c   : > { %v5488_v5 = vmul.f32 %v5405_v1, %v10257_v53  ;;  %v5502_v18 = vmul.f32 %v5464_v38, %v10258_v30 }
0x273e   : > { %v5534_v52 = vsel %vm559_vm1, %v5488_v5, 0.0  ;;  %v5567_v4 = vsel %vm559_vm1, %v5502_v18, 0.0 }
0x273f   : > { %v5535_v12 = vadd.f32 %v5534_v52, %v5533_v44  ;;  %v5741_v29 = vpop.permute.xlu0 %5740  ;;  %v5468_v28 = vpop.permute.xlu1 %5467  ;;  %v5568_v26 = vadd.f32 %v5567_v4, %v5566_v7 }
0x2740   : > { %v5743_v17 = vsel %vm5739_vm13, %v10259_v21, %v5741_v29  ;;  %v5503_v10 = vmul.f32 %v5468_v28, %v10260_v48 }
0x2741   : > { %v5536_v62 = vrot.slane %v5535_v12, 4  ;;  %5745 = vrot.lane.b32.xlu0 %v5743_v17, %s10072_s20 }
0x2742   : > { %v5569_v37 = vsel %vm559_vm1, %v5503_v10, 0.0 }
0x2743   : > { %v5537_v9 = vadd.f32 %v5536_v62, %v5535_v12  ;;  %v5472_v60 = vpop.permute.xlu1 %5471  ;;  %v5570_v0 = vadd.f32 %v5569_v37, %v5568_v26 }
0x2744   : > { %v5504_v35 = vmul.f32 %v5472_v60, %v10261_v11 }
0x2745   : > { %v5538_v41 = vrot.slane %v5537_v9, 2 }
0x2746   : > { %v5571_v61 = vsel %vm559_vm1, %v5504_v35, 0.0 }
0x2747   : > { %v5572_v34 = vadd.f32 %v5571_v61, %v5570_v0  ;;  %v5756_v8 = vpop.permute.xlu1 %5755  ;;  %v5539_v57 = vadd.f32 %v5538_v41, %v5537_v9 }
0x2748   : > { %v5758_v23 = vsel %vm5739_vm13, %v10262_v2, %v5756_v8 }
0x2749   : > { %v5573_v50 = vrot.slane %v5572_v34, 4  ;;  %5760 = vrot.lane.b32.xlu0 %v5758_v23, %s10072_s20  ;;  %v5540_v16 = vrot.slane %v5539_v57, 1 }
0x274b   : > { %v5574_v14 = vadd.f32 %v5573_v50, %v5572_v34  ;;  %v5752_v36 = vpop.permute.xlu1 %5751  ;;  %v5541_v47 = vadd.f32 %v5540_v16, %v5539_v57 }
0x274c   : > { %5754 = vst.msk [vmem:[#allocation3] sm:$0x3] %vm1843_vm0, %v5752_v36 }
0x274d   : > { %v5575_v3 = vrot.slane %v5574_v14, 2 }
0x274f   : > { %v5576_v32 = vadd.f32 %v5575_v3, %v5574_v14  ;;  %v5767_v24 = vpop.permute.xlu1 %5766 }
0x2750   : > { %5769 = vst.msk [vmem:[#allocation3 + $0x2] sm:$0x3] %vm1843_vm0, %v5767_v24 }
0x2751   : > { %v5577_v15 = vrot.slane %v5576_v32, 1 }
0x2753   : > { %v5578_v6 = vadd.f32 %v5577_v15, %v5576_v32 }
0x2755   : > { %v5659_v45 = vsel %vm1433_vm15, %v5578_v6, %v5541_v47 }
0x2756   : > { %6480 = vmatmul.mubr.msk.f32.vlgmr.msra.gmra.mxu1 %vm559_vm1, %v5659_v45 }
0x27b3   : > { %v5746_v46 = vpop.permute.xlu0 %5745 }
0x27b4   : > { %5748 = vst.msk [vmem:[#allocation2] sm:$0x3] %vm1843_vm0, %v5746_v46 }
0x27bb   : > { %v5761_v25 = vpop.permute.xlu0 %5760 }
0x27bc   : > { %5763 = vst.msk [vmem:[#allocation2 + $0x2] sm:$0x3] %vm1843_vm0, %v5761_v25 }
0x2816   : > { %v5728_v31 = vpop.f32.mrf.mxu1 }
0x2817   : > { %v5729_v27 = vadd.f32 %v5728_v31, %v10263_v58 }
0x2818   : > { %v6481_v49 = vpop.f32.mrf.mxu1 }
0x2819   : > { %6633 = vtanh.f32 %v5729_v27 }
0x2824   : > { %5775 = sbr.rel (%p6019_p3) target bundleno = 10284 (0x282c), region = 80 }
0x2826   : > { %v6634_v39 = vpop.eup %6633 }
0x2827   : > { %6017 = vst.msk [vmem:[%s6951_s17 + $0x6] sm:$0x3] %vm1843_vm0, %v6634_v39  ;;  %v5770_v59 = vsel %vm5739_vm13, %v6634_v39, %v6641_v43 }
0x2828   : > { %5771 = vst.msk [vmem:[#allocation4] sm:$0x3] %vm1843_vm0, %v5770_v59 }
0x2829   : > { %v5776_v22 = vld [vmem:[#allocation2] sm:$0x3]  ;;  %v5777_v51 = vld [vmem:[#allocation2 + $0x2] sm:$0x3]  ;;  %v5780_v54 = vld [vmem:[#allocation3] sm:$0x3] }
0x282a   : > { %5778 = vst.msk [vmem:[#allocation9] sm:$0x3] %vm1843_vm0, %v5776_v22  ;;  %5779 = vst.msk [vmem:[#allocation9 + $0x2] sm:$0x3] %vm1843_vm0, %v5777_v51  ;;  %v5781_v13 = vld [vmem:[#allocation3 + $0x2] sm:$0x3] }
0x282b   : > { %5782 = vst.msk [vmem:[#allocation10] sm:$0x3] %vm1843_vm0, %v5780_v54  ;;  %5783 = vst.msk [vmem:[#allocation10 + $0x2] sm:$0x3] %vm1843_vm0, %v5781_v13 }
0x282c PF: > { %s5789_s26 = sand.u32 1, %s6907_s25   ;;  %s6032_s20 = sshll.u32 %s6907_s25, 7 }
0x282d   : > { %s9615_s23 = scalar_lea.hbm %s9742_s14, %s6032_s20  ;;  %s5819_s28 = sshll.u32 %s6953_s21, 4  ;;  %s9618_s28 = int_to_ptr.vmem [resolvable:$true] %s5819_s28 }
0x282e   : > { %s9620_s29 = scalar_lea.sflag [#allocation8], %s5789_s26  ;;  %s6642_s15 = scalar_lea.vmem %s9618_s28, 128 }
0x282f   : > { %p6643_p4 = scmp.ne.s32.totalorder %s9618_s28, %s6642_s15  ;;  %s6796_s2 = smov [#allocation7]  }
0x2830   : > { %s6646_s19 = sshll.u32 %s6796_s2, 4  ;;  %s6647_s19 = int_to_ptr.vmem [resolvable:$false] %s6646_s19 }
0x2831   : > { %p6644_p7 = pnand %p6643_p4, %p6928_p5  ;;  %s6648_s30 = scalar_lea.vmem %s6647_s19, 256 }
0x2832   : > { %p6649_p9 = scmp.lt.s32.totalorder %s9618_s28, %s6647_s19  ;;  %p6650_p10 = scmp.lt.s32.totalorder %s6648_s30, %s6642_s15 }
0x2833   : > { %p6645_p8 = pneg %p6644_p7 }
0x2834   : > { %p6651_p11 = por %p6650_p10, %p6649_p9 }
0x2836   : > { %p6652_p12 = pnand %p6651_p11, %p6645_p8 }
0x2838   : > { %6655 = shalt.err (!%p6652_p12)
}
0x2839   : > { %s6656_s21 = scalar_lea.hbm %s9615_s23, 128  ;;  %s6660_s26 = scalar_lea.hbm %s9742_s14, 256 }
0x283a   : > { %p6657_p13 = scmp.ne.s32.totalorder %s9615_s23, %s6656_s21  ;;  %p6661_p3 = scmp.lt.s32.totalorder %s9615_s23, %s9742_s14 }
0x283b   : > { %p6662_p4 = scmp.lt.s32.totalorder %s6660_s26, %s6656_s21 }
0x283c   : > { %p6658_p0 = pnand %p6657_p13, %p6928_p5 }
0x283d   : > { %p6663_p7 = por %p6662_p4, %p6661_p3 }
0x283e   : > { %p6659_p1 = pneg %p6658_p0 }
0x2840   : > { %p6664_p8 = pnand %p6663_p7, %p6659_p1 }
0x2842   : > { %6667 = shalt.err (!%p6664_p8)
}
0x2843   : > { %s6797_s15 = smov 2   ;;  %s10264_s2 = smov 32  }
0x2844   : > { %6483 = dma.vmem_to_hbm [thread:$0]  (%p6928_p5), %s9618_s28, 128, %s9615_s23, %s9620_s29, %s10264_s2, %s10264_s2, %s6797_s15  }
0x2845   : > { %s9651_s21 = scalar_lea.hbm %s9741_s13, %s6032_s20  ;;  %s5803_s16 = sshll.u32 %s6951_s17, 4  ;;  %s9654_s16 = int_to_ptr.vmem [resolvable:$true] %s5803_s16 }
0x2846   : > { %s10265_s27 = sand.u32 1, %s6780_s22   ;;  %s6668_s24 = scalar_lea.vmem %s9654_s16, 128 }
0x2847   : > { %s5785_s26 = scalar_lea.sflag [#allocation6], %s10265_s27  ;;  %p6669_p9 = scmp.ne.s32.totalorder %s9654_s16, %s6668_s24 }
0x2848   : > { %s6798_s23 = smov [#allocation5]  }
0x2849   : > { %p6670_p10 = pnand %p6669_p9, %p6928_p5  ;;  %s6672_s28 = sshll.u32 %s6798_s23, 4  ;;  %s6673_s28 = int_to_ptr.vmem [resolvable:$false] %s6672_s28 }
0x284a   : > { %s6674_s29 = scalar_lea.vmem %s6673_s28, 256  ;;  %p6675_p12 = scmp.lt.s32.totalorder %s9654_s16, %s6673_s28 }
0x284b   : > { %p6671_p11 = pneg %p6670_p10  ;;  %p6676_p13 = scmp.lt.s32.totalorder %s6674_s29, %s6668_s24 }
0x284d   : > { %p6677_p0 = por %p6676_p13, %p6675_p12 }
0x284f   : > { %p6678_p1 = pnand %p6677_p0, %p6671_p11 }
0x2851   : > { %6681 = shalt.err (!%p6678_p1)
}
0x2852   : > { %s6682_s17 = scalar_lea.hbm %s9651_s21, 128  ;;  %s6686_s19 = scalar_lea.hbm %s9741_s13, 256 }
0x2853   : > { %p6683_p3 = scmp.ne.s32.totalorder %s9651_s21, %s6682_s17  ;;  %p6687_p8 = scmp.lt.s32.totalorder %s9651_s21, %s9741_s13 }
0x2854   : > { %p6688_p9 = scmp.lt.s32.totalorder %s6686_s19, %s6682_s17 }
0x2855   : > { %p6684_p4 = pnand %p6683_p3, %p6928_p5 }
0x2856   : > { %p6689_p10 = por %p6688_p9, %p6687_p8 }
0x2857   : > { %p6685_p7 = pneg %p6684_p4 }
0x2859   : > { %p6690_p11 = pnand %p6689_p10, %p6685_p7 }
0x285b   : > { %6693 = shalt.err (!%p6690_p11)
}
0x285c   : > { %6482 = dma.vmem_to_hbm [thread:$0]  (%p6928_p5), %s9654_s16, 128, %s9651_s21, %s5785_s26, %s10264_s2, %s10264_s2, %s6797_s15  }
0x285d   : > { %s6799_s24 = smov [#allocation9]   ;;  %s6800_s28 = smov [#allocation10]  }
0x285e   : > { %s5832_s23 = sshll.u32 %s6799_s24, 4  ;;  %s5845_s29 = sshll.u32 %s6800_s28, 4  ;;  %s5833_s23 = int_to_ptr.vmem [resolvable:$true] %s5832_s23  ;;  %s5846_s29 = int_to_ptr.vmem [resolvable:$true] %s5845_s29 }
0x285f   : > { %s6694_s20 = scalar_lea.vmem %s5833_s23, 64  ;;  %p6701_p1 = scmp.lt.s32.totalorder %s5833_s23, %s5833_s23 }
0x2860   : > { %p6695_p12 = scmp.ne.s32.totalorder %s5833_s23, %s6694_s20  ;;  %p6702_p3 = scmp.lt.s32.totalorder %s6694_s20, %s6694_s20 }
0x2862   : > { %p6696_p13 = pnand %p6695_p12, %p330_p2  ;;  %p6703_p4 = por %p6702_p3, %p6701_p1 }
0x2864   : > { %p6697_p0 = pneg %p6696_p13 }
0x2866   : > { %p6704_p7 = pnand %p6703_p4, %p6697_p0 }
0x2868   : > { %6707 = shalt.err (!%p6704_p7)
}
0x2869   : > { %s10266_s16 = sld [smem:[#allocation61_spill]]  ;;  %s6718_s26 = scalar_lea.vmem %s5846_s29, 64 }
0x286a   : > { %p6719_p5 = scmp.ne.s32.totalorder %s5846_s29, %s6718_s26  ;;  %p6725_p10 = scmp.lt.s32.totalorder %s5846_s29, %s5846_s29 }
0x286b   : > { %p6726_p11 = scmp.lt.s32.totalorder %s6718_s26, %s6718_s26 }
0x286c   : > { %p6720_p8 = pnand %p6719_p5, %p330_p2 }
0x286d   : > { %p6727_p12 = por %p6726_p11, %p6725_p10 }
0x286e   : > { %p6721_p9 = pneg %p6720_p8 }
0x286f   : > { %6485 = dma.vmem_to_hbm [thread:$0]  (%p330_p2), %s5833_s23, 64, %s10266_s16, [#allocation8], %s10264_s2, %s10264_s2, %s6797_s15  }
0x2870   : > { %p6728_p13 = pnand %p6727_p12, %p6721_p9 }
0x2872   : > { %6731 = shalt.err (!%p6728_p13)
}
0x2873   : > { %s10267_s19 = sld [smem:[#allocation62_spill]] }
0x2879   : > { %6487 = dma.vmem_to_hbm [thread:$0]  (%p330_p2), %s5846_s29, 64, %s10267_s19, [#allocation11], %s10264_s2, %s10264_s2, %s6797_s15  }
0x287a   : > { %6759 = dma.done.wait (%p330_p2), [#allocation8], 64  }
0x287b   : > { %6761 = vsyncadd (%p330_p2), [#allocation8], 4294967232 }
0x287c   : > { %6763 = dma.done.wait (%p330_p2), [#allocation11], 64  }
0x287d   : > { %6765 = vsyncadd (%p330_p2), [#allocation11], 4294967232 }
0x287e PF: > { %s10268_s30 = sld [smem:[#allocation18_spill]] }
0x287f   : > { %s10269_s27 = sld [smem:[#allocation16_spill]] }
0x2884   : > { %p6505_p0 = scmp.ge.s32.totalorder %s10268_s30, 2 }
0x2885   : > { %s5868_s23 = sand.u32 1, %s10269_s27  }
0x2886   : > { %p6495_p1 = pnand %p6505_p0, %p6932_p6  ;;  %s5869_s15 = scalar_lea.sflag [#allocation6], %s5868_s23 }
0x2888   : > { %p6496_p3 = pneg %p6495_p1 }
0x288a   : > { %6767 = dma.done.wait (%p6496_p3), %s5869_s15, 128  }
0x288b   : > { %6769 = vsyncadd (%p6496_p3), %s5869_s15, 4294967168  ;;  %s10271_s2 = sadd.s32 4294967294, %s10268_s30  }
0x288c   : > { %s5877_s28 = sand.u32 1, %s10271_s2  }
0x288d   : > { %s5878_s29 = scalar_lea.sflag [#allocation8], %s5877_s28 }
0x288e   : > { %6771 = dma.done.wait (%p6496_p3), %s5878_s29, 128  }
0x288f   : > { %6773 = vsyncadd (%p6496_p3), %s5878_s29, 4294967168  ;;  %s10272_s24 = sld [smem:[#allocation19_spill]]  ;;  %s10275_s21 = smov %s6780_s22 }
0x2890   : > { %s10273_s25 = sld [smem:[#allocation17_spill]] }
0x2891   : > { %s10274_s23 = sld [smem:[#allocation20_spill]] }
0x2895   : > { %p31_p2 = scmp.ge.s32.totalorder %s10272_s24, 4  }
0x2896   : > { %s10276_s22 = smov %s10273_s25 }
0x2897   :  { %33 = sbr.rel (!%p31_p2) target bundleno = 11 (0xb), region = 159 }
0x289c   :  { %5883 = vsyncpa [#allocation6], 1 }
0x289d   :  { %5885 = vsyncpa [#allocation6 + $0x1], 1 }
0x289e   :  { %5886 = vsyncpa [#allocation8], 1 }
0x289f   :  { %5888 = vsyncpa [#allocation8 + $0x1], 1 }
0x28a0   :  { %5889 = vsyncpa [#allocation11], 1 }

</bundles_post_ra>
